<compile_context>
chip_gen: v7x
topology: tpu7x:2x2x1
jax: 0.10.0
libtpu: 0.0.40
codegen_flags: <defaults>
</compile_context>

<pallas_src>
import functools
import math

import jax
import jax.numpy as jnp
from jax import lax
from jax.experimental import pallas as pl
from jax.experimental.pallas import tpu as pltpu


# ----------------------------------------------------------------------------- kernel
def mh_eugat_kernel(h_ref, meta_ref, wt_ref, w1ab_ref, w1c_ref, w2_ref,
                    u1t_ref, bu1_ref, u2bd_ref, bu2_ref, fcbd_ref, fcb_ref,
                    b2_sm, o_ref, *, heads, hidden, k):
    bt, n, in_f = h_ref.shape
    out_fc = o_ref.shape[-1]
    hh = heads * hidden
    tj = min(n, 128)                        # j-tile keeps the (bt,n,tj,hh) block bounded

    h2d = h_ref[...].reshape(bt * n, in_f)  # fold batch tile into the matmul M dim

    # ---- stage 1: head-stacked shared-weight matmuls (one MXU call per stage) ----
    wh = jnp.dot(h2d, wt_ref[...], preferred_element_type=jnp.float32)        # (bt*n, heads*F)
    ab = jnp.dot(wh, w1ab_ref[...], preferred_element_type=jnp.float32)       # (bt*n, 2*hh)
    ai = ab[:, :hh].reshape(bt, n, hh)
    aj = ab[:, hh:].reshape(bt, n, hh)

    b0 = pl.multiple_of(pl.program_id(0) * bt, bt)
    meta_b = meta_ref[pl.ds(b0, bt), :]                                        # (bt, md+1)
    c = jnp.dot(meta_b, w1c_ref[...], preferred_element_type=jnp.float32)      # (bt, hh) incl. b1
    ajc = aj + c[:, None, :]

    uh = jnp.maximum(
        jnp.dot(h2d, u1t_ref[...], preferred_element_type=jnp.float32)
        + bu1_ref[...], 0.0)                                                   # (bt*n, heads*in_f//2)
    u_all = jax.nn.sigmoid(
        jnp.dot(uh, u2bd_ref[...], preferred_element_type=jnp.float32)
        + bu2_ref[...])                                                        # (bt*n, heads)

    vraw = jnp.dot(wh, fcbd_ref[...], preferred_element_type=jnp.float32)      # (bt*n, heads*out_fc)

    # ---- stage 2: edge scores, dense over the heads*H lanes, j-blocked ----
    w2row = w2_ref[...].reshape(1, 1, 1, hh)
    e_blocks = [[] for _ in range(heads)]
    for j0 in range(0, n, tj):
        hid = jnp.maximum(ai[:, :, None, :] + ajc[:, None, j0:j0 + tj, :], 0.0)  # (bt,n,tj,hh)
        hw = hid * w2row
        for hd in range(heads):                      # only the 64-lane segment reduce is per head
            e_blocks[hd].append(jnp.sum(hw[..., hd * hidden:(hd + 1) * hidden], axis=-1))
    e_heads = []
    for hd in range(heads):
        e_h = (e_blocks[hd][0] if len(e_blocks[hd]) == 1
               else jnp.concatenate(e_blocks[hd], axis=-1))                      # (bt, n, n)
        e_heads.append(e_h + b2_sm[hd])
    eij = jnp.stack(e_heads, axis=1)                                             # (bt, heads, n, n)

    # ---- stage 3: top-k 0/1 mask + softmax, whole (batch, head) tile at once ----
    col = lax.broadcasted_iota(jnp.int32, eij.shape, 3)
    mask0 = jnp.zeros_like(eij)
    neg_inf = jnp.float32(-jnp.inf)

    def tk_body(_, carry):                            # iterative argmax, min-index tie-break
        m_mask, work = carry
        row_max = jnp.max(work, axis=-1, keepdims=True)
        is_max = work == row_max
        idx = jnp.min(jnp.where(is_max, col, n), axis=-1, keepdims=True)
        sel = col == idx
        return (jnp.where(sel, 1.0, m_mask), jnp.where(sel, neg_inf, work))

    mask, _ = lax.fori_loop(0, k, tk_body, (mask0, eij), unroll=k <= 8)

    # PyTorch multiplies by the 0/1 mask (non-selected scores become 0, NOT -inf)
    e = eij * mask
    p = jnp.exp(e - jnp.max(e, axis=-1, keepdims=True))
    denom = jnp.sum(p, axis=-1, keepdims=True)
    inv = pl.reciprocal(denom, approx=True)
    inv = inv * (2.0 - denom * inv)                   # one Newton step (well inside 1e-3/1e-4)
    att = p * inv                                     # dropout(p=0.0) is the identity

    # ---- stage 4: per-head att @ V with fc folded (V_h = u_h * Wh_h @ fcW_h^T) ----
    out3 = None
    for hd in range(heads):
        v_h = (vraw[:, hd * out_fc:(hd + 1) * out_fc]
               * u_all[:, hd:hd + 1]).reshape(bt, n, out_fc)
        contrib = jnp.einsum('bij,bjf->bif', att[:, hd], v_h,
                             preferred_element_type=jnp.float32)
        out3 = contrib if out3 is None else out3 + contrib

    o_ref[...] = (out3 + fcb_ref[...].reshape(1, 1, out_fc)).astype(o_ref.dtype)


# ----------------------------------------------------------------------------- wrapper
def _default_b_tile(B):
    # v5e / v6e: single TensorCore -> one big grid step.  v7x: 2 TCs -> even grid.
    try:
        kind = jax.devices()[0].device_kind.lower()
    except Exception:
        kind = ""
    single_tc = any(t in kind for t in ("v5 lite", "v5lite", "v5e", "v6 lite", "v6e", "v6"))
    if single_tc or (B % 2):
        return B
    return max(B // 2, 1)


def multi_head_eugat(h, meta, head_params, fc_w, fc_b, prune_ratio=0.1, b_tile=None):
    B, N, in_f = h.shape
    meta_dim = meta.shape[-1]
    heads = len(head_params)
    out_f = head_params[0][0].shape[0]      # F
    hidden = head_params[0][1].shape[0]     # hidden_edge
    half = head_params[0][5].shape[0]       # in_f // 2
    out_fc = fc_w.shape[0]
    k = max(1, math.ceil(prune_ratio * N))

    if b_tile is None:
        b_tile = _default_b_tile(B)
    assert B % b_tile == 0

    FF, HH, UU = heads * out_f, heads * hidden, heads * half

    # --- host-side: lane-stacked / block-diagonal weight packing (one-time) ---
    wt = jnp.zeros((in_f, FF), jnp.float32)
    w1ab = jnp.zeros((FF, 2 * HH), jnp.float32)
    w1c = jnp.zeros((meta_dim + 1, HH), jnp.float32)
    w2row = jnp.zeros((1, HH), jnp.float32)
    u1t = jnp.zeros((in_f, UU), jnp.float32)
    bu1 = jnp.zeros((1, UU), jnp.float32)
    u2bd = jnp.zeros((UU, heads), jnp.float32)
    bu2 = jnp.zeros((1, heads), jnp.float32)
    fcbd = jnp.zeros((FF, heads * out_fc), jnp.float32)
    b2v = jnp.zeros((heads,), jnp.float32)

    for hd, (W, W1, b1, W2, b2h, U1, bu1h, U2, bu2h) in enumerate(head_params):
        wt = wt.at[:, hd * out_f:(hd + 1) * out_f].set(W.T)
        w1ab = w1ab.at[hd * out_f:(hd + 1) * out_f,
                       hd * hidden:(hd + 1) * hidden].set(W1[:, :out_f].T)
        w1ab = w1ab.at[hd * out_f:(hd + 1) * out_f,
                       HH + hd * hidden:HH + (hd + 1) * hidden].set(W1[:, out_f:2 * out_f].T)
        w1c = w1c.at[:meta_dim, hd * hidden:(hd + 1) * hidden].set(W1[:, 2 * out_f:].T)
        w1c = w1c.at[meta_dim, hd * hidden:(hd + 1) * hidden].set(b1)   # b1 via ones column
        w2row = w2row.at[0, hd * hidden:(hd + 1) * hidden].set(W2[0])
        u1t = u1t.at[:, hd * half:(hd + 1) * half].set(U1.T)
        bu1 = bu1.at[0, hd * half:(hd + 1) * half].set(bu1h)
        u2bd = u2bd.at[hd * half:(hd + 1) * half, hd].set(U2[0])
        bu2 = bu2.at[0, hd].set(bu2h[0])
        b2v = b2v.at[hd].set(b2h[0])
        fcbd = fcbd.at[hd * out_f:(hd + 1) * out_f,
                       hd * out_fc:(hd + 1) * out_fc].set(fc_w[:, hd * out_f:(hd + 1) * out_f].T)

    fcb = fc_b.reshape(1, out_fc)
    meta_aug = jnp.concatenate([meta, jnp.ones((B, 1), meta.dtype)], axis=-1)

    def whole(a):
        nd = a.ndim
        return pl.BlockSpec(a.shape, lambda g, _nd=nd: (0,) * _nd)

    kern = functools.partial(mh_eugat_kernel, heads=heads, hidden=hidden, k=k)

    return pl.pallas_call(
        kern,
        out_shape=jax.ShapeDtypeStruct((B, N, out_fc), jnp.float32),
        grid_spec=pltpu.PrefetchScalarGridSpec(
            num_scalar_prefetch=0,
            grid=(B // b_tile,),
            in_specs=[
                pl.BlockSpec((b_tile, N, in_f), lambda g: (g, 0, 0)),
                whole(meta_aug),        # meta passed whole; row-sliced by grid index in-kernel
                whole(wt), whole(w1ab), whole(w1c), whole(w2row),
                whole(u1t), whole(bu1), whole(u2bd), whole(bu2),
                whole(fcbd), whole(fcb),
                pl.BlockSpec(memory_space=pltpu.MemorySpace.SMEM),   # b2 per-head scalars
            ],
            out_specs=pl.BlockSpec((b_tile, N, out_fc), lambda g: (g, 0, 0)),
        ),
        compiler_params=pltpu.CompilerParams(
            dimension_semantics=("parallel",),
            vmem_limit_bytes=32 * 1024 * 1024,
        ),
    )(h, meta_aug, wt, w1ab, w1c, w2row, u1t, bu1, u2bd, bu2, fcbd, fcb, b2v)


# ----------------------------------------------------------------------------- reference
def _layer_ref(h, meta, p, prune_ratio):
    W, W1, b1, W2, b2, U1, bu1, U2, bu2 = p
    Wh = h @ W.T
    B, N, F = Wh.shape
    md = meta.shape[-1]
    Wh_i = jnp.broadcast_to(Wh[:, :, None, :], (B, N, N, F))
    Wh_j = jnp.broadcast_to(Wh[:, None, :, :], (B, N, N, F))
    mexp = jnp.broadcast_to(meta[:, None, None, :], (B, N, N, md))
    cat = jnp.concatenate([Wh_i, Wh_j, mexp], -1)
    hid = jnp.maximum(cat @ W1.T + b1, 0.0)
    eij = (hid @ W2.T + b2)[..., 0]
    k = max(1, math.ceil(prune_ratio * N))
    _, idx = jax.lax.top_k(eij, k)
    mask = jnp.max(jax.nn.one_hot(idx, N, dtype=eij.dtype), axis=2)
    e = eij * mask
    att = jax.nn.softmax(e, axis=-1)
    uh = jnp.maximum(h @ U1.T + bu1, 0.0)
    u = jax.nn.sigmoid(uh @ U2.T + bu2)[..., 0]
    att = att * u[:, None, :]
    return att @ Wh


def reference(h, meta, head_params, fc_w, fc_b, prune_ratio=0.1):
    outs = [_layer_ref(h, meta, p, prune_ratio) for p in head_params]
    return jnp.concatenate(outs, -1) @ fc_w.T + fc_b


# ----------------------------------------------------------------------------- main
if __name__ == "__main__":
    B, N = 4, 8
    in_f, out_f, meta_dim, hidden_edge, heads = 32, 32, 8, 64, 4
    prune_ratio = 0.1

    key = jax.random.PRNGKey(0)
    k_heads, k_fc, k_h, k_meta = jax.random.split(key, 4)

    def lin_w(k_, out_d, in_d):
        bound = 1.0 / math.sqrt(in_d)
        return jax.random.uniform(k_, (out_d, in_d), jnp.float32, -bound, bound)

    def lin_b(k_, out_d, in_d):
        bound = 1.0 / math.sqrt(in_d)
        return jax.random.uniform(k_, (out_d,), jnp.float32, -bound, bound)

    head_params = []
    for hk in jax.random.split(k_heads, heads):
        ks = jax.random.split(hk, 9)
        W = lin_w(ks[0], out_f, in_f)
        W1 = lin_w(ks[1], hidden_edge, 2 * out_f + meta_dim)
        b1 = lin_b(ks[2], hidden_edge, 2 * out_f + meta_dim)
        W2 = lin_w(ks[3], 1, hidden_edge)
        b2 = lin_b(ks[4], 1, hidden_edge)
        U1 = lin_w(ks[5], in_f // 2, in_f)
        bu1 = lin_b(ks[6], in_f // 2, in_f)
        U2 = lin_w(ks[7], 1, in_f // 2)
        bu2 = lin_b(ks[8], 1, in_f // 2)
        head_params.append((W, W1, b1, W2, b2, U1, bu1, U2, bu2))

    kf1, kf2 = jax.random.split(k_fc)
    fc_w = lin_w(kf1, out_f, heads * out_f)
    fc_b = lin_b(kf2, out_f, heads * out_f)

    h = jax.random.normal(k_h, (B, N, in_f), jnp.float32)
    meta = jax.random.normal(k_meta, (B, meta_dim), jnp.float32)

    out = multi_head_eugat(h, meta, head_params, fc_w, fc_b, prune_ratio)
    out = jax.block_until_ready(out)

    ref = jax.block_until_ready(reference(h, meta, head_params, fc_w, fc_b, prune_ratio))
    assert out.shape == (B, N, out_f)
    err = float(jnp.max(jnp.abs(out - ref)))
    assert jnp.allclose(out, ref, rtol=1e-3, atol=1e-4), f"max abs err {err}"

    print("KERNEL_OK")
</pallas_src>

<mosaic_0001>
module attributes {stable_mosaic.version = 11 : i64} {
  func.func @mh_eugat_kernel(%arg0: i32, %arg1: memref<2x8x32xf32, #tpu.memory_space<vmem>>, %arg2: memref<4x9xf32, #tpu.memory_space<vmem>>, %arg3: memref<32x128xf32, #tpu.memory_space<vmem>>, %arg4: memref<128x512xf32, #tpu.memory_space<vmem>>, %arg5: memref<9x256xf32, #tpu.memory_space<vmem>>, %arg6: memref<1x256xf32, #tpu.memory_space<vmem>>, %arg7: memref<32x64xf32, #tpu.memory_space<vmem>>, %arg8: memref<1x64xf32, #tpu.memory_space<vmem>>, %arg9: memref<64x4xf32, #tpu.memory_space<vmem>>, %arg10: memref<1x4xf32, #tpu.memory_space<vmem>>, %arg11: memref<128x128xf32, #tpu.memory_space<vmem>>, %arg12: memref<1x32xf32, #tpu.memory_space<vmem>>, %arg13: memref<4xf32, #tpu.memory_space<smem>>, %arg14: memref<2x8x32xf32, #tpu.memory_space<vmem>>) attributes {dimension_semantics = [#tpu.dimension_semantics<parallel>], iteration_bounds = array<i64: 2>, scalar_prefetch = 0 : i64, scratch_operands = 0 : i64, tpu.core_type = #tpu.core_type<tc>, window_params = [{transform_indices = @transform_0, window_bounds = array<i64: 2, 8, 32>}, {pipeline_mode = #tpu.pipeline_mode<synchronous>, transform_indices = @transform_1, window_bounds = array<i64: 4, 9>}, {pipeline_mode = #tpu.pipeline_mode<synchronous>, transform_indices = @transform_2, window_bounds = array<i64: 32, 128>}, {pipeline_mode = #tpu.pipeline_mode<synchronous>, transform_indices = @transform_3, window_bounds = array<i64: 128, 512>}, {pipeline_mode = #tpu.pipeline_mode<synchronous>, transform_indices = @transform_4, window_bounds = array<i64: 9, 256>}, {pipeline_mode = #tpu.pipeline_mode<synchronous>, transform_indices = @transform_5, window_bounds = array<i64: 1, 256>}, {pipeline_mode = #tpu.pipeline_mode<synchronous>, transform_indices = @transform_6, window_bounds = array<i64: 32, 64>}, {pipeline_mode = #tpu.pipeline_mode<synchronous>, transform_indices = @transform_7, window_bounds = array<i64: 1, 64>}, {pipeline_mode = #tpu.pipeline_mode<synchronous>, transform_indices = @transform_8, window_bounds = array<i64: 64, 4>}, {pipeline_mode = #tpu.pipeline_mode<synchronous>, transform_indices = @transform_9, window_bounds = array<i64: 1, 4>}, {pipeline_mode = #tpu.pipeline_mode<synchronous>, transform_indices = @transform_10, window_bounds = array<i64: 128, 128>}, {pipeline_mode = #tpu.pipeline_mode<synchronous>, transform_indices = @transform_11, window_bounds = array<i64: 1, 32>}, {transform_indices = @transform_12, window_bounds = array<i64: 4>}, {transform_indices = @transform_13, window_bounds = array<i64: 2, 8, 32>}]} {
    %c0 = arith.constant 0 : index
    %c0_0 = arith.constant 0 : index
    %c0_1 = arith.constant 0 : index
    %0 = vector.load %arg1[%c0, %c0_0, %c0_1] : memref<2x8x32xf32, #tpu.memory_space<vmem>>, vector<2x8x32xf32>
    %1 = vector.shape_cast %0 : vector<2x8x32xf32> to vector<16x32xf32>
    %c0_2 = arith.constant 0 : index
    %c0_3 = arith.constant 0 : index
    %2 = vector.load %arg3[%c0_2, %c0_3] : memref<32x128xf32, #tpu.memory_space<vmem>>, vector<32x128xf32>
    %cst = arith.constant dense<0.000000e+00> : vector<16x128xf32>
    %3 = tpu.matmul %1, %2, %cst {dimension_numbers = #tpu.dot_dimension_numbers<[1], [0], [0], [1], [0, 0, 1, 1], [], []>} : vector<16x32xf32>, vector<32x128xf32>, vector<16x128xf32> -> vector<16x128xf32>
    %c0_4 = arith.constant 0 : index
    %c0_5 = arith.constant 0 : index
    %4 = vector.load %arg4[%c0_4, %c0_5] : memref<128x512xf32, #tpu.memory_space<vmem>>, vector<128x512xf32>
    %cst_6 = arith.constant dense<0.000000e+00> : vector<16x512xf32>
    %5 = tpu.matmul %3, %4, %cst_6 {dimension_numbers = #tpu.dot_dimension_numbers<[1], [0], [0], [1], [0, 0, 1, 1], [], []>} : vector<16x128xf32>, vector<128x512xf32>, vector<16x512xf32> -> vector<16x512xf32>
    %6 = vector.extract_strided_slice %5 {offsets = [0, 0], sizes = [16, 256], strides = [1, 1]} : vector<16x512xf32> to vector<16x256xf32>
    %7 = vector.shape_cast %6 : vector<16x256xf32> to vector<2x8x256xf32>
    %8 = vector.extract_strided_slice %5 {offsets = [0, 256], sizes = [16, 256], strides = [1, 1]} : vector<16x512xf32> to vector<16x256xf32>
    %9 = vector.shape_cast %8 : vector<16x256xf32> to vector<2x8x256xf32>
    %c2_i32 = arith.constant 2 : i32
    %10 = arith.muli %arg0, %c2_i32 : i32
    %11 = tpu.assume_multiple %10, 2 : i32
    %12 = arith.index_cast %11 : i32 to index
    %c0_7 = arith.constant 0 : index
    %13 = vector.load %arg2[%12, %c0_7] : memref<4x9xf32, #tpu.memory_space<vmem>>, vector<2x9xf32>
    %c0_8 = arith.constant 0 : index
    %c0_9 = arith.constant 0 : index
    %14 = vector.load %arg5[%c0_8, %c0_9] : memref<9x256xf32, #tpu.memory_space<vmem>>, vector<9x256xf32>
    %cst_10 = arith.constant dense<0.000000e+00> : vector<2x256xf32>
    %15 = tpu.matmul %13, %14, %cst_10 {dimension_numbers = #tpu.dot_dimension_numbers<[1], [0], [0], [1], [0, 0, 1, 1], [], []>} : vector<2x9xf32>, vector<9x256xf32>, vector<2x256xf32> -> vector<2x256xf32>
    %16 = vector.shape_cast %15 : vector<2x256xf32> to vector<2x1x256xf32>
    %17 = vector.broadcast %16 : vector<2x1x256xf32> to vector<2x8x256xf32>
    %18 = arith.addf %9, %17 : vector<2x8x256xf32>
    %c0_11 = arith.constant 0 : index
    %c0_12 = arith.constant 0 : index
    %19 = vector.load %arg7[%c0_11, %c0_12] : memref<32x64xf32, #tpu.memory_space<vmem>>, vector<32x64xf32>
    %cst_13 = arith.constant dense<0.000000e+00> : vector<16x64xf32>
    %20 = tpu.matmul %1, %19, %cst_13 {dimension_numbers = #tpu.dot_dimension_numbers<[1], [0], [0], [1], [0, 0, 1, 1], [], []>} : vector<16x32xf32>, vector<32x64xf32>, vector<16x64xf32> -> vector<16x64xf32>
    %c0_14 = arith.constant 0 : index
    %c0_15 = arith.constant 0 : index
    %21 = vector.load %arg8[%c0_14, %c0_15] : memref<1x64xf32, #tpu.memory_space<vmem>>, vector<1x64xf32>
    %22 = vector.broadcast %21 : vector<1x64xf32> to vector<16x64xf32>
    %23 = arith.addf %20, %22 : vector<16x64xf32>
    %cst_16 = arith.constant 0.000000e+00 : f32
    %24 = vector.broadcast %cst_16 : f32 to vector<16x64xf32>
    %25 = arith.maximumf %23, %24 : vector<16x64xf32>
    %c0_17 = arith.constant 0 : index
    %c0_18 = arith.constant 0 : index
    %26 = vector.load %arg9[%c0_17, %c0_18] : memref<64x4xf32, #tpu.memory_space<vmem>>, vector<64x4xf32>
    %cst_19 = arith.constant dense<0.000000e+00> : vector<16x4xf32>
    %27 = tpu.matmul %25, %26, %cst_19 {dimension_numbers = #tpu.dot_dimension_numbers<[1], [0], [0], [1], [0, 0, 1, 1], [], []>} : vector<16x64xf32>, vector<64x4xf32>, vector<16x4xf32> -> vector<16x4xf32>
    %c0_20 = arith.constant 0 : index
    %c0_21 = arith.constant 0 : index
    %28 = vector.load %arg10[%c0_20, %c0_21] : memref<1x4xf32, #tpu.memory_space<vmem>>, vector<1x4xf32>
    %29 = vector.broadcast %28 : vector<1x4xf32> to vector<16x4xf32>
    %30 = arith.addf %27, %29 : vector<16x4xf32>
    %31 = arith.negf %30 : vector<16x4xf32>
    %32 = math.exp %31 : vector<16x4xf32>
    %cst_22 = arith.constant 1.000000e+00 : f32
    %33 = vector.broadcast %cst_22 : f32 to vector<16x4xf32>
    %34 = arith.addf %33, %32 : vector<16x4xf32>
    %35 = arith.divf %33, %34 : vector<16x4xf32>
    %c0_23 = arith.constant 0 : index
    %c0_24 = arith.constant 0 : index
    %36 = vector.load %arg11[%c0_23, %c0_24] : memref<128x128xf32, #tpu.memory_space<vmem>>, vector<128x128xf32>
    %cst_25 = arith.constant dense<0.000000e+00> : vector<16x128xf32>
    %37 = tpu.matmul %3, %36, %cst_25 {dimension_numbers = #tpu.dot_dimension_numbers<[1], [0], [0], [1], [0, 0, 1, 1], [], []>} : vector<16x128xf32>, vector<128x128xf32>, vector<16x128xf32> -> vector<16x128xf32>
    %c0_26 = arith.constant 0 : index
    %c0_27 = arith.constant 0 : index
    %38 = vector.load %arg6[%c0_26, %c0_27] : memref<1x256xf32, #tpu.memory_space<vmem>>, vector<1x256xf32>
    %39 = vector.shape_cast %38 : vector<1x256xf32> to vector<1x1x1x256xf32>
    %40 = vector.shape_cast %7 : vector<2x8x256xf32> to vector<2x8x1x256xf32>
    %41 = vector.shape_cast %18 : vector<2x8x256xf32> to vector<2x1x8x256xf32>
    %42 = vector.broadcast %40 : vector<2x8x1x256xf32> to vector<2x8x8x256xf32>
    %43 = vector.broadcast %41 : vector<2x1x8x256xf32> to vector<2x8x8x256xf32>
    %44 = arith.addf %42, %43 : vector<2x8x8x256xf32>
    %cst_28 = arith.constant 0.000000e+00 : f32
    %45 = vector.broadcast %cst_28 : f32 to vector<2x8x8x256xf32>
    %46 = arith.maximumf %44, %45 : vector<2x8x8x256xf32>
    %47 = vector.broadcast %39 : vector<1x1x1x256xf32> to vector<2x8x8x256xf32>
    %48 = arith.mulf %46, %47 : vector<2x8x8x256xf32>
    %49 = vector.extract_strided_slice %48 {offsets = [0, 0, 0, 0], sizes = [2, 8, 8, 64], strides = [1, 1, 1, 1]} : vector<2x8x8x256xf32> to vector<2x8x8x64xf32>
    %cst_29 = arith.constant dense<0.000000e+00> : vector<2x8x8xf32>
    %50 = vector.multi_reduction <add>, %49, %cst_29 [3] : vector<2x8x8x64xf32> to vector<2x8x8xf32>
    %51 = vector.extract_strided_slice %48 {offsets = [0, 0, 0, 64], sizes = [2, 8, 8, 64], strides = [1, 1, 1, 1]} : vector<2x8x8x256xf32> to vector<2x8x8x64xf32>
    %cst_30 = arith.constant dense<0.000000e+00> : vector<2x8x8xf32>
    %52 = vector.multi_reduction <add>, %51, %cst_30 [3] : vector<2x8x8x64xf32> to vector<2x8x8xf32>
    %53 = vector.extract_strided_slice %48 {offsets = [0, 0, 0, 128], sizes = [2, 8, 8, 64], strides = [1, 1, 1, 1]} : vector<2x8x8x256xf32> to vector<2x8x8x64xf32>
    %cst_31 = arith.constant dense<0.000000e+00> : vector<2x8x8xf32>
    %54 = vector.multi_reduction <add>, %53, %cst_31 [3] : vector<2x8x8x64xf32> to vector<2x8x8xf32>
    %55 = vector.extract_strided_slice %48 {offsets = [0, 0, 0, 192], sizes = [2, 8, 8, 64], strides = [1, 1, 1, 1]} : vector<2x8x8x256xf32> to vector<2x8x8x64xf32>
    %cst_32 = arith.constant dense<0.000000e+00> : vector<2x8x8xf32>
    %56 = vector.multi_reduction <add>, %55, %cst_32 [3] : vector<2x8x8x64xf32> to vector<2x8x8xf32>
    %c0_33 = arith.constant 0 : index
    %57 = memref.load %arg13[%c0_33] : memref<4xf32, #tpu.memory_space<smem>>
    %58 = vector.broadcast %57 : f32 to vector<2x8x8xf32>
    %59 = arith.addf %50, %58 : vector<2x8x8xf32>
    %c1 = arith.constant 1 : index
    %60 = memref.load %arg13[%c1] : memref<4xf32, #tpu.memory_space<smem>>
    %61 = vector.broadcast %60 : f32 to vector<2x8x8xf32>
    %62 = arith.addf %52, %61 : vector<2x8x8xf32>
    %c2 = arith.constant 2 : index
    %63 = memref.load %arg13[%c2] : memref<4xf32, #tpu.memory_space<smem>>
    %64 = vector.broadcast %63 : f32 to vector<2x8x8xf32>
    %65 = arith.addf %54, %64 : vector<2x8x8xf32>
    %c3 = arith.constant 3 : index
    %66 = memref.load %arg13[%c3] : memref<4xf32, #tpu.memory_space<smem>>
    %67 = vector.broadcast %66 : f32 to vector<2x8x8xf32>
    %68 = arith.addf %56, %67 : vector<2x8x8xf32>
    %69 = vector.shape_cast %59 : vector<2x8x8xf32> to vector<2x1x8x8xf32>
    %70 = vector.shape_cast %62 : vector<2x8x8xf32> to vector<2x1x8x8xf32>
    %71 = vector.shape_cast %65 : vector<2x8x8xf32> to vector<2x1x8x8xf32>
    %72 = vector.shape_cast %68 : vector<2x8x8xf32> to vector<2x1x8x8xf32>
    %73 = tpu.concatenate %69, %70, %71, %72 in 1 : vector<2x1x8x8xf32>, vector<2x1x8x8xf32>, vector<2x1x8x8xf32>, vector<2x1x8x8xf32> -> vector<2x4x8x8xf32>
    %74 = tpu.iota {dimensions = array<i32: 3>} : vector<2x4x8x8xi32>
    %cst_34 = arith.constant 0.000000e+00 : f32
    %75 = vector.broadcast %cst_34 : f32 to vector<2x4x8x8xf32>
    %cst_35 = arith.constant 0xFF800000 : f32
    %c0_i32 = arith.constant 0 : i32
    %cst_36 = arith.constant dense<0xFF800000> : vector<2x4x8xf32>
    %76 = vector.multi_reduction <maximumf>, %73, %cst_36 [3] : vector<2x4x8x8xf32> to vector<2x4x8xf32>
    %77 = vector.shape_cast %76 : vector<2x4x8xf32> to vector<2x4x8x1xf32>
    %78 = vector.broadcast %77 : vector<2x4x8x1xf32> to vector<2x4x8x8xf32>
    %79 = arith.cmpf oeq, %73, %78 : vector<2x4x8x8xf32>
    %c8_i32 = arith.constant 8 : i32
    %80 = vector.broadcast %c8_i32 : i32 to vector<2x4x8x8xi32>
    %81 = arith.select %79, %74, %80 : vector<2x4x8x8xi1>, vector<2x4x8x8xi32>
    %cst_37 = arith.constant dense<2147483647> : vector<2x4x8xi32>
    %82 = vector.multi_reduction <minsi>, %81, %cst_37 [3] : vector<2x4x8x8xi32> to vector<2x4x8xi32>
    %83 = vector.shape_cast %82 : vector<2x4x8xi32> to vector<2x4x8x1xi32>
    %84 = vector.broadcast %83 : vector<2x4x8x1xi32> to vector<2x4x8x8xi32>
    %85 = arith.cmpi eq, %74, %84 : vector<2x4x8x8xi32>
    %cst_38 = arith.constant 1.000000e+00 : f32
    %86 = vector.broadcast %cst_38 : f32 to vector<2x4x8x8xf32>
    %87 = arith.select %85, %86, %75 : vector<2x4x8x8xi1>, vector<2x4x8x8xf32>
    %88 = vector.broadcast %cst_35 : f32 to vector<2x4x8x8xf32>
    %89 = arith.select %85, %88, %73 : vector<2x4x8x8xi1>, vector<2x4x8x8xf32>
    %90 = arith.mulf %73, %87 : vector<2x4x8x8xf32>
    %cst_39 = arith.constant dense<0xFF800000> : vector<2x4x8xf32>
    %91 = vector.multi_reduction <maximumf>, %90, %cst_39 [3] : vector<2x4x8x8xf32> to vector<2x4x8xf32>
    %92 = vector.shape_cast %91 : vector<2x4x8xf32> to vector<2x4x8x1xf32>
    %93 = vector.broadcast %92 : vector<2x4x8x1xf32> to vector<2x4x8x8xf32>
    %94 = arith.subf %90, %93 : vector<2x4x8x8xf32>
    %95 = math.exp %94 : vector<2x4x8x8xf32>
    %cst_40 = arith.constant dense<0.000000e+00> : vector<2x4x8xf32>
    %96 = vector.multi_reduction <add>, %95, %cst_40 [3] : vector<2x4x8x8xf32> to vector<2x4x8xf32>
    %97 = vector.shape_cast %96 : vector<2x4x8xf32> to vector<2x4x8x1xf32>
    %98 = tpu.reciprocal %97 {approx = true} : vector<2x4x8x1xf32> -> vector<2x4x8x1xf32>
    %99 = arith.mulf %97, %98 : vector<2x4x8x1xf32>
    %cst_41 = arith.constant 2.000000e+00 : f32
    %100 = vector.broadcast %cst_41 : f32 to vector<2x4x8x1xf32>
    %101 = arith.subf %100, %99 : vector<2x4x8x1xf32>
    %102 = arith.mulf %98, %101 : vector<2x4x8x1xf32>
    %103 = vector.broadcast %102 : vector<2x4x8x1xf32> to vector<2x4x8x8xf32>
    %104 = arith.mulf %95, %103 : vector<2x4x8x8xf32>
    %105 = vector.extract_strided_slice %37 {offsets = [0, 0], sizes = [16, 32], strides = [1, 1]} : vector<16x128xf32> to vector<16x32xf32>
    %106 = vector.extract_strided_slice %35 {offsets = [0, 0], sizes = [16, 1], strides = [1, 1]} : vector<16x4xf32> to vector<16x1xf32>
    %107 = vector.broadcast %106 : vector<16x1xf32> to vector<16x32xf32>
    %108 = arith.mulf %105, %107 : vector<16x32xf32>
    %109 = vector.shape_cast %108 : vector<16x32xf32> to vector<2x8x32xf32>
    %110 = vector.extract_strided_slice %104 {offsets = [0, 0, 0, 0], sizes = [2, 1, 8, 8], strides = [1, 1, 1, 1]} : vector<2x4x8x8xf32> to vector<2x1x8x8xf32>
    %111 = vector.shape_cast %110 : vector<2x1x8x8xf32> to vector<2x8x8xf32>
    "tpu.trace_start"() <{level = 10 : i32, message = "bij,bjf->bif"}> : () -> ()
    %cst_42 = arith.constant dense<0.000000e+00> : vector<2x8x32xf32>
    %112 = tpu.matmul %111, %109, %cst_42 {dimension_numbers = #tpu.dot_dimension_numbers<[2], [1], [1], [2], [0, 0, 0, 1, 1, 2], [0], [0]>} : vector<2x8x8xf32>, vector<2x8x32xf32>, vector<2x8x32xf32> -> vector<2x8x32xf32>
    "tpu.trace_stop"() : () -> ()
    %113 = vector.extract_strided_slice %37 {offsets = [0, 32], sizes = [16, 32], strides = [1, 1]} : vector<16x128xf32> to vector<16x32xf32>
    %114 = vector.extract_strided_slice %35 {offsets = [0, 1], sizes = [16, 1], strides = [1, 1]} : vector<16x4xf32> to vector<16x1xf32>
    %115 = vector.broadcast %114 : vector<16x1xf32> to vector<16x32xf32>
    %116 = arith.mulf %113, %115 : vector<16x32xf32>
    %117 = vector.shape_cast %116 : vector<16x32xf32> to vector<2x8x32xf32>
    %118 = vector.extract_strided_slice %104 {offsets = [0, 1, 0, 0], sizes = [2, 1, 8, 8], strides = [1, 1, 1, 1]} : vector<2x4x8x8xf32> to vector<2x1x8x8xf32>
    %119 = vector.shape_cast %118 : vector<2x1x8x8xf32> to vector<2x8x8xf32>
    "tpu.trace_start"() <{level = 10 : i32, message = "bij,bjf->bif"}> : () -> ()
    %cst_43 = arith.constant dense<0.000000e+00> : vector<2x8x32xf32>
    %120 = tpu.matmul %119, %117, %cst_43 {dimension_numbers = #tpu.dot_dimension_numbers<[2], [1], [1], [2], [0, 0, 0, 1, 1, 2], [0], [0]>} : vector<2x8x8xf32>, vector<2x8x32xf32>, vector<2x8x32xf32> -> vector<2x8x32xf32>
    "tpu.trace_stop"() : () -> ()
    %121 = arith.addf %112, %120 : vector<2x8x32xf32>
    %122 = vector.extract_strided_slice %37 {offsets = [0, 64], sizes = [16, 32], strides = [1, 1]} : vector<16x128xf32> to vector<16x32xf32>
    %123 = vector.extract_strided_slice %35 {offsets = [0, 2], sizes = [16, 1], strides = [1, 1]} : vector<16x4xf32> to vector<16x1xf32>
    %124 = vector.broadcast %123 : vector<16x1xf32> to vector<16x32xf32>
    %125 = arith.mulf %122, %124 : vector<16x32xf32>
    %126 = vector.shape_cast %125 : vector<16x32xf32> to vector<2x8x32xf32>
    %127 = vector.extract_strided_slice %104 {offsets = [0, 2, 0, 0], sizes = [2, 1, 8, 8], strides = [1, 1, 1, 1]} : vector<2x4x8x8xf32> to vector<2x1x8x8xf32>
    %128 = vector.shape_cast %127 : vector<2x1x8x8xf32> to vector<2x8x8xf32>
    "tpu.trace_start"() <{level = 10 : i32, message = "bij,bjf->bif"}> : () -> ()
    %cst_44 = arith.constant dense<0.000000e+00> : vector<2x8x32xf32>
    %129 = tpu.matmul %128, %126, %cst_44 {dimension_numbers = #tpu.dot_dimension_numbers<[2], [1], [1], [2], [0, 0, 0, 1, 1, 2], [0], [0]>} : vector<2x8x8xf32>, vector<2x8x32xf32>, vector<2x8x32xf32> -> vector<2x8x32xf32>
    "tpu.trace_stop"() : () -> ()
    %130 = arith.addf %121, %129 : vector<2x8x32xf32>
    %131 = vector.extract_strided_slice %37 {offsets = [0, 96], sizes = [16, 32], strides = [1, 1]} : vector<16x128xf32> to vector<16x32xf32>
    %132 = vector.extract_strided_slice %35 {offsets = [0, 3], sizes = [16, 1], strides = [1, 1]} : vector<16x4xf32> to vector<16x1xf32>
    %133 = vector.broadcast %132 : vector<16x1xf32> to vector<16x32xf32>
    %134 = arith.mulf %131, %133 : vector<16x32xf32>
    %135 = vector.shape_cast %134 : vector<16x32xf32> to vector<2x8x32xf32>
    %136 = vector.extract_strided_slice %104 {offsets = [0, 3, 0, 0], sizes = [2, 1, 8, 8], strides = [1, 1, 1, 1]} : vector<2x4x8x8xf32> to vector<2x1x8x8xf32>
    %137 = vector.shape_cast %136 : vector<2x1x8x8xf32> to vector<2x8x8xf32>
    "tpu.trace_start"() <{level = 10 : i32, message = "bij,bjf->bif"}> : () -> ()
    %cst_45 = arith.constant dense<0.000000e+00> : vector<2x8x32xf32>
    %138 = tpu.matmul %137, %135, %cst_45 {dimension_numbers = #tpu.dot_dimension_numbers<[2], [1], [1], [2], [0, 0, 0, 1, 1, 2], [0], [0]>} : vector<2x8x8xf32>, vector<2x8x32xf32>, vector<2x8x32xf32> -> vector<2x8x32xf32>
    "tpu.trace_stop"() : () -> ()
    %139 = arith.addf %130, %138 : vector<2x8x32xf32>
    %c0_46 = arith.constant 0 : index
    %c0_47 = arith.constant 0 : index
    %140 = vector.load %arg12[%c0_46, %c0_47] : memref<1x32xf32, #tpu.memory_space<vmem>>, vector<1x32xf32>
    %141 = vector.shape_cast %140 : vector<1x32xf32> to vector<1x1x32xf32>
    %142 = vector.broadcast %141 : vector<1x1x32xf32> to vector<2x8x32xf32>
    %143 = arith.addf %139, %142 : vector<2x8x32xf32>
    %c0_48 = arith.constant 0 : index
    %c0_49 = arith.constant 0 : index
    %c0_50 = arith.constant 0 : index
    %144 = vector.load %arg14[%c0_48, %c0_49, %c0_50] : memref<2x8x32xf32, #tpu.memory_space<vmem>>, vector<2x8x32xf32>
    tpu.vector_store %arg14[%c0_48, %c0_49, %c0_50], %143 {strides = array<i32>} : memref<2x8x32xf32, #tpu.memory_space<vmem>>, vector<2x8x32xf32>,
    return
  }
  func.func @transform_0(%arg0: i32) -> (i32, i32, i32) {
    %c0_i32 = arith.constant 0 : i32
    %c0_i32_0 = arith.constant 0 : i32
    %c0_i32_1 = arith.constant 0 : i32
    return %arg0, %c0_i32, %c0_i32_0 : i32, i32, i32
  }
  func.func @transform_1(%arg0: i32) -> (i32, i32) {
    %c0_i32 = arith.constant 0 : i32
    %c0_i32_0 = arith.constant 0 : i32
    %c0_i32_1 = arith.constant 0 : i32
    return %c0_i32, %c0_i32_0 : i32, i32
  }
  func.func @transform_2(%arg0: i32) -> (i32, i32) {
    %c0_i32 = arith.constant 0 : i32
    %c0_i32_0 = arith.constant 0 : i32
    %c0_i32_1 = arith.constant 0 : i32
    return %c0_i32, %c0_i32_0 : i32, i32
  }
  func.func @transform_3(%arg0: i32) -> (i32, i32) {
    %c0_i32 = arith.constant 0 : i32
    %c0_i32_0 = arith.constant 0 : i32
    %c0_i32_1 = arith.constant 0 : i32
    return %c0_i32, %c0_i32_0 : i32, i32
  }
  func.func @transform_4(%arg0: i32) -> (i32, i32) {
    %c0_i32 = arith.constant 0 : i32
    %c0_i32_0 = arith.constant 0 : i32
    %c0_i32_1 = arith.constant 0 : i32
    return %c0_i32, %c0_i32_0 : i32, i32
  }
  func.func @transform_5(%arg0: i32) -> (i32, i32) {
    %c0_i32 = arith.constant 0 : i32
    %c0_i32_0 = arith.constant 0 : i32
    %c0_i32_1 = arith.constant 0 : i32
    return %c0_i32, %c0_i32_0 : i32, i32
  }
  func.func @transform_6(%arg0: i32) -> (i32, i32) {
    %c0_i32 = arith.constant 0 : i32
    %c0_i32_0 = arith.constant 0 : i32
    %c0_i32_1 = arith.constant 0 : i32
    return %c0_i32, %c0_i32_0 : i32, i32
  }
  func.func @transform_7(%arg0: i32) -> (i32, i32) {
    %c0_i32 = arith.constant 0 : i32
    %c0_i32_0 = arith.constant 0 : i32
    %c0_i32_1 = arith.constant 0 : i32
    return %c0_i32, %c0_i32_0 : i32, i32
  }
  func.func @transform_8(%arg0: i32) -> (i32, i32) {
    %c0_i32 = arith.constant 0 : i32
    %c0_i32_0 = arith.constant 0 : i32
    %c0_i32_1 = arith.constant 0 : i32
    return %c0_i32, %c0_i32_0 : i32, i32
  }
  func.func @transform_9(%arg0: i32) -> (i32, i32) {
    %c0_i32 = arith.constant 0 : i32
    %c0_i32_0 = arith.constant 0 : i32
    %c0_i32_1 = arith.constant 0 : i32
    return %c0_i32, %c0_i32_0 : i32, i32
  }
  func.func @transform_10(%arg0: i32) -> (i32, i32) {
    %c0_i32 = arith.constant 0 : i32
    %c0_i32_0 = arith.constant 0 : i32
    %c0_i32_1 = arith.constant 0 : i32
    return %c0_i32, %c0_i32_0 : i32, i32
  }
  func.func @transform_11(%arg0: i32) -> (i32, i32) {
    %c0_i32 = arith.constant 0 : i32
    %c0_i32_0 = arith.constant 0 : i32
    %c0_i32_1 = arith.constant 0 : i32
    return %c0_i32, %c0_i32_0 : i32, i32
  }
  func.func @transform_12(%arg0: i32) -> i32 {
    %c0_i32 = arith.constant 0 : i32
    %c0_i32_0 = arith.constant 0 : i32
    return %c0_i32 : i32
  }
  func.func @transform_13(%arg0: i32) -> (i32, i32, i32) {
    %c0_i32 = arith.constant 0 : i32
    %c0_i32_0 = arith.constant 0 : i32
    %c0_i32_1 = arith.constant 0 : i32
    return %arg0, %c0_i32, %c0_i32_0 : i32, i32, i32
  }
}

</mosaic_0001>

<bundles_post_ra>
// kernel: tpu_custom_call.1
= control target key start
LH: loop header
LB: loop body
LE: loop exit
PB: predicated region body
PF: predicated region fallthrough
CT: control target
= control target key end

     0   :  { %s11684_s0 = inlined_call_operand.vmem [shape: f32[4,8,32], index: 0, kind: input, shape index: {}]   ;;  %s11685_s1 = inlined_call_operand.vmem [shape: f32[4,9], index: 1, kind: input, shape index: {}]   ;;  %s11686_s2 = inlined_call_operand.vmem [shape: f32[32,128], index: 2, kind: input, shape index: {}]   ;;  %s11687_s3 = inlined_call_operand.hbm [shape: f32[128,512], index: 3, kind: input, shape index: {}]   ;;  %s11688_s4 = inlined_call_operand.hbm [shape: f32[9,256], index: 4, kind: input, shape index: {}]   ;;  %s11689_s5 = inlined_call_operand.vmem [shape: f32[1,256], index: 5, kind: input, shape index: {}]   ;;  %s11690_s6 = inlined_call_operand.hbm [shape: f32[32,64], index: 6, kind: input, shape index: {}]   ;;  %s11691_s7 = inlined_call_operand.vmem [shape: f32[1,64], index: 7, kind: input, shape index: {}]   ;;  %s11692_s8 = inlined_call_operand.vmem [shape: f32[64,4], index: 8, kind: input, shape index: {}]   ;;  %s11693_s9 = inlined_call_operand.vmem [shape: f32[1,4], index: 9, kind: input, shape index: {}]   ;;  %s11694_s10 = inlined_call_operand.hbm [shape: f32[128,128], index: 10, kind: input, shape index: {}]   ;;  %s11695_s11 = inlined_call_operand.vmem [shape: f32[1,32], index: 11, kind: input, shape index: {}]   ;;  %s11696_s12 = inlined_call_operand.vmem [shape: f32[4], index: 12, kind: input, shape index: {}]   ;;  %s11697_s13 = inlined_call_operand.hbm [shape: f32[4,8,32], index: 13, kind: output, shape index: {}]  }
   0x1   :  { %11849 = sst [smem:[#allocation75_spill]] %s11687_s3 }
   0x2   :  { %11850 = sst [smem:[#allocation76_spill]] %s11688_s4 }
   0x3   :  { %11851 = sst [smem:[#allocation77_spill]] %s11697_s13 }
   0x4   :  { %18 = vsyncpa [#allocation3], 0 }
   0x5   :  { %19 = vsyncpa [#allocation7], 0 }
   0x6   :  { %20 = vsyncpa [#allocation10], 0 }
   0x7   :  { %21 = vsyncpa [#allocation5], 0 }
   0x8   :  { %22 = vsyncpa [#allocation4], 0 }
   0x9   :  { %24 = vsyncpa [#allocation4 + $0x1], 0  ;;  %s8733_s25 = smov 0   ;;  %s8735_s26 = smov 0  }
   0xa   :  { %s8737_s27 = smov 0   ;;  %s8739_s28 = smov 0  }
   0xb LB: > { %11852 = sst [smem:[#allocation18_spill]] %s8624_s25  ;;  %s8754_s29 = sadd.s32 4294967295, %s8636_s28   ;;  %s8636_s28 = sphi %s8739_s28, %s12129_s28   ;;  %s8632_s27 = sphi %s8737_s27, %s12131_s27   ;;  %s8628_s26 = sphi %s8735_s26, %s12133_s26   ;;  %s8624_s25 = sphi %s8733_s25, %s12132_s25  }
   0xc   : > { %11853 = sst [smem:[#allocation19_spill]] %s8632_s27  ;;  %s7804_s30 = sadd.s32 4294967294, %s8636_s28  }
   0xd   : > { %11854 = sst [smem:[#allocation20_spill]] %s8636_s28  ;;  %s8758_s14 = sadd.s32 1, %s8636_s28  }
   0xe   : > { %11855 = sst [smem:[#allocation21_spill]] %s8758_s14  ;;  %s315_s15 = sadd.s32 1, %s8632_s27 }
   0xf   : > { %s312_s16 = ssub.s32 %s8636_s28, %s8758_s14  ;;  %p325_p0 = scmp.ne.s32.totalorder %s8632_s27, %s8628_s26 }
  0x10   : > { %p313_p1 = scmp.eq.s32.totalorder %s312_s16, 0  ;;  %p326_p2 = scmp.eq.s32.totalorder %s8754_s29, 1 }
  0x11   : > { %p331_p3 = scmp.ne.s32.totalorder %s8628_s26, %s8624_s25  ;;  %p332_p4 = scmp.eq.s32.totalorder %s7804_s30, 1 }
  0x12   : > { %s8769_s17 = scalar_select %p313_p1, %s8632_s27, %s315_s15  }
  0x13   : > { %p8771_p5 = por %p326_p2, %p325_p0  ;;  %p8775_p6 = por %p332_p4, %p331_p3 }
  0x14   : > { %11856 = sst [smem:[#allocation22_spill]] %s8769_s17  ;;  %p7805_p7 = scmp.ge.s32.totalorder %s8636_s28, 1 }
  0x15   : > { %s11857_s18 = scalar_select %p8771_p5, 1, 0 }
  0x16   : > { %s11859_s19 = scalar_select %p8775_p6, 1, 0 }
  0x17   : > { %11858 = sst [smem:[#allocation23_spill]] %s11857_s18  ;;  %p339_p8 = scmp.lt.s32.totalorder %s8636_s28, 3 }
  0x18   : > { %11860 = sst [smem:[#allocation24_spill]] %s11859_s19  ;;  %p11702_p9 = scmp.eq.s32.totalorder %s8754_s29, 0 }
  0x19   : > { %p8782_p10 = pnand %p7805_p7, %p339_p8  ;;  %s8638_s21 = smov [#allocation6]  }
  0x1a   : > { %s370_s22 = sshll.u32 %s8638_s21, 4  ;;  %s8639_s24 = smov [#allocation2]   ;;  %s371_s22 = int_to_ptr.vmem [resolvable:$true] %s370_s22 }
  0x1b   : > { %s11861_s20 = scalar_select %p8782_p10, 1, 0 }
  0x1c   : > { %p8181_p11 = pneg %p8782_p10  ;;  %s357_s30 = sshll.u32 %s8639_s24, 4  ;;  %s8794_s30 = int_to_ptr.vmem [resolvable:$true] %s357_s30 }
  0x1d   : > { %s11863_s4 = sld [smem:[#allocation76_spill]] }
  0x1e   : > { %p8790_p12 = pnand %p11702_p9, %p8181_p11 }
  0x20   : > { %p8804_p0 = pneg %p8790_p12 }
  0x23   : > { %s8431_s17 = scalar_lea.hbm %s11863_s4, 512 }
  0x24   : > { %p8432_p13 = scmp.ne.s32.totalorder %s11863_s4, %s8431_s17  ;;  %p8438_p3 = scmp.lt.u32.totalorder %s8431_s17, %s11863_s4 }
  0x26   : > { %p8434_p1 = pnand %p8804_p0, %p8432_p13 }
  0x28   : > { %p8435_p2 = pneg %p8434_p1 }
  0x2a   : > { %p8440_p4 = pnand %p8438_p3, %p8435_p2 }
  0x2c   : > { %8443 = shalt.err (!%p8440_p4)
}
  0x2d   : > { %s8444_s15 = scalar_lea.vmem %s371_s22, 512  ;;  %p8452_p9 = scmp.lt.s32.totalorder %s371_s22, %s371_s22 }
  0x2e   : > { %p8445_p7 = scmp.ne.s32.totalorder %s371_s22, %s8444_s15  ;;  %p8453_p6 = scmp.lt.s32.totalorder %s8444_s15, %s8444_s15 }
  0x30   : > { %p8447_p8 = pnand %p8445_p7, %p8804_p0  ;;  %p8454_p5 = por %p8453_p6, %p8452_p9 }
  0x32   : > { %p8448_p11 = pneg %p8447_p8 }
  0x34   : > { %p8455_p10 = pnand %p8454_p5, %p8448_p11 }
  0x36   : > { %8458 = shalt.err (!%p8455_p10)
}
  0x37   : > { %s8640_s27 = smov 256   ;;  %s8641_s14 = smov 16  }
  0x38   : > { %8187 = dma.hbm_to_vmem [thread:$0]  (!%p8790_p12), %s11863_s4, 512, %s371_s22, [#allocation7], %s8640_s27, %s8640_s27, %s8641_s14  }
  0x39   : > { %s11865_s3 = sld [smem:[#allocation75_spill]] }
  0x3f   : > { %s8459_s25 = scalar_lea.hbm %s11865_s3, 8192 }
  0x40   : > { %p8460_p13 = scmp.ne.s32.totalorder %s11865_s3, %s8459_s25  ;;  %p8466_p9 = scmp.lt.u32.totalorder %s8459_s25, %s11865_s3 }
  0x42   : > { %p8462_p5 = pnand %p8460_p13, %p8804_p0 }
  0x44   : > { %p8463_p6 = pneg %p8462_p5 }
  0x46   : > { %p8468_p10 = pnand %p8466_p9, %p8463_p6 }
  0x48   : > { %8471 = shalt.err (!%p8468_p10)
}
  0x49   : > { %s8472_s22 = scalar_lea.vmem %s8794_s30, 8192  ;;  %p8480_p4 = scmp.lt.s32.totalorder %s8794_s30, %s8794_s30 }
  0x4a   : > { %p8473_p1 = scmp.ne.s32.totalorder %s8794_s30, %s8472_s22  ;;  %p8481_p7 = scmp.lt.s32.totalorder %s8472_s22, %s8472_s22 }
  0x4c   : > { %p8475_p2 = pnand %p8473_p1, %p8804_p0  ;;  %p8482_p8 = por %p8481_p7, %p8480_p4 }
  0x4e   : > { %p8476_p3 = pneg %p8475_p2 }
  0x50   : > { %p8483_p11 = pnand %p8482_p8, %p8476_p3 }
  0x52   : > { %8486 = shalt.err (!%p8483_p11)
}
  0x53   : > { %s8642_s13 = smov 512   ;;  %s8643_s25 = smov 32  }
  0x54   : > { %8184 = dma.hbm_to_vmem [thread:$0]  (!%p8790_p12), %s11865_s3, 8192, %s8794_s30, [#allocation3], %s8642_s13, %s8642_s13, %s8643_s25  }
  0x55   : > { %s8644_s27 = smov [#allocation8]   ;;  %s8487_s16 = scalar_lea.hbm %s11690_s6, 512 }
  0x56   : > { %s386_s14 = sshll.u32 %s8644_s27, 4  ;;  %p8488_p13 = scmp.ne.s32.totalorder %s11690_s6, %s8487_s16  ;;  %s387_s14 = int_to_ptr.vmem [resolvable:$true] %s386_s14 }
  0x57   : > { %p8494_p9 = scmp.lt.u32.totalorder %s8487_s16, %s11690_s6 }
  0x58   : > { %p8490_p5 = pnand %p8488_p13, %p8804_p0 }
  0x5a   : > { %p8491_p6 = pneg %p8490_p5 }
  0x5c   : > { %p8496_p10 = pnand %p8494_p9, %p8491_p6 }
  0x5e   : > { %8499 = shalt.err (!%p8496_p10)
}
  0x5f   : > { %s8500_s30 = scalar_lea.vmem %s387_s14, 512  ;;  %p8508_p4 = scmp.lt.s32.totalorder %s387_s14, %s387_s14 }
  0x60   : > { %p8501_p1 = scmp.ne.s32.totalorder %s387_s14, %s8500_s30  ;;  %p8509_p7 = scmp.lt.s32.totalorder %s8500_s30, %s8500_s30 }
  0x62   : > { %p8503_p2 = pnand %p8501_p1, %p8804_p0  ;;  %p8510_p8 = por %p8509_p7, %p8508_p4 }
  0x64   : > { %p8504_p3 = pneg %p8503_p2 }
  0x66   : > { %p8511_p11 = pnand %p8510_p8, %p8504_p3 }
  0x68   : > { %8514 = shalt.err (!%p8511_p11)
}
  0x69   : > { %s8645_s13 = smov 128   ;;  %s8646_s25 = smov 8  }
  0x6a   : > { %8190 = dma.hbm_to_vmem [thread:$0]  (!%p8790_p12), %s11690_s6, 512, %s387_s14, [#allocation7], %s8645_s13, %s8645_s13, %s8646_s25  }
  0x6b   : > { %s8647_s18 = smov [#allocation9]   ;;  %s425_s16 = sshll.u32 %s11696_s12, 4  ;;  %s426_s16 = int_to_ptr.vmem [resolvable:$true] %s425_s16 }
  0x6c   : > { %s408_s27 = sshll.u32 %s8647_s18, 4  ;;  %s8515_s22 = scalar_lea.hbm %s11694_s10, 2048  ;;  %s409_s27 = int_to_ptr.vmem [resolvable:$true] %s408_s27 }
  0x6d   : > { %p8516_p13 = scmp.ne.s32.totalorder %s11694_s10, %s8515_s22  ;;  %p8522_p9 = scmp.lt.u32.totalorder %s8515_s22, %s11694_s10 }
  0x6f   : > { %p8518_p5 = pnand %p8516_p13, %p8804_p0 }
  0x71   : > { %p8519_p6 = pneg %p8518_p5 }
  0x73   : > { %p8524_p10 = pnand %p8522_p9, %p8519_p6 }
  0x75   : > { %8527 = shalt.err (!%p8524_p10)
}
  0x76   : > { %s8528_s28 = scalar_lea.vmem %s409_s27, 2048  ;;  %p8536_p4 = scmp.lt.s32.totalorder %s409_s27, %s409_s27 }
  0x77   : > { %p8529_p1 = scmp.ne.s32.totalorder %s409_s27, %s8528_s28  ;;  %p8537_p7 = scmp.lt.s32.totalorder %s8528_s28, %s8528_s28 }
  0x79   : > { %p8531_p2 = pnand %p8529_p1, %p8804_p0  ;;  %p8538_p8 = por %p8537_p7, %p8536_p4 }
  0x7b   : > { %p8532_p3 = pneg %p8531_p2 }
  0x7d   : > { %p8539_p11 = pnand %p8538_p8, %p8532_p3 }
  0x7f   : > { %8542 = shalt.err (!%p8539_p11)
}
  0x80   : > { %8193 = dma.hbm_to_vmem [thread:$0]  (!%p8790_p12), %s11694_s10, 2048, %s409_s27, [#allocation10], %s8645_s13, %s8645_s13, %s8646_s25  }
  0x81   : > { %s8543_s19 = scalar_lea.vmem %s426_s16, 16  ;;  %p8551_p9 = scmp.lt.s32.totalorder %s426_s16, %s426_s16 }
  0x82   : > { %p8544_p13 = scmp.ne.s32.totalorder %s426_s16, %s8543_s19  ;;  %p8552_p10 = scmp.lt.s32.totalorder %s8543_s19, %s8543_s19 }
  0x84   : > { %p8546_p5 = pnand %p8544_p13, %p8804_p0  ;;  %p8553_p1 = por %p8552_p10, %p8551_p9 }
  0x86   : > { %p8547_p6 = pneg %p8546_p5 }
  0x88   : > { %p8554_p2 = pnand %p8553_p1, %p8547_p6 }
  0x8a   : > { %8557 = shalt.err (!%p8554_p2)
}
  0x8b   : > { %s8648_s17 = smov [#allocation11]   ;;  %p11866_p3 = scmp.ne.s32.totalorder %s11861_s20, 0 }
  0x8c   : > { %8196 = dma.vmem_to_smem (!%p8790_p12), %s426_s16, 16, %s8648_s17, [#allocation5]  }
  0x8d   : > { %447 = sbr.rel (%p11866_p3) target bundleno = 2976 (0xba0), region = 72 }
  0x94   : > { %p11867_p4 = scmp.eq.s32.totalorder %s8754_s29, 0 }
  0x96   : > { %8603 = dma.done.wait (%p11867_p4), [#allocation3], 8192   ;;  %p11868_p7 = pmov %p11867_p4 }
  0x97   : > { %p11869_p0 = pmov %p11867_p4 }
  0x98   : > { %8605 = vsyncadd (%p11868_p7), [#allocation3], 4294959104 }
  0x99   : > { %8607 = dma.done.wait (%p11869_p0), [#allocation7], 1024   ;;  %p11870_p8 = pmov %p11869_p0 }
  0x9a   : > { %p11871_p11 = pmov %p11869_p0 }
  0x9b   : > { %8609 = vsyncadd (%p11870_p8), [#allocation7], 4294966272 }
  0x9c   : > { %8611 = dma.done.wait (%p11871_p11), [#allocation10], 2048   ;;  %p11872_p12 = pmov %p11869_p0 }
  0x9d   : > { %p11873_p13 = pmov %p11869_p0 }
  0x9e   : > { %8613 = vsyncadd (%p11872_p12), [#allocation10], 4294965248 }
  0x9f   : > { %8615 = dma.done.wait (%p11873_p13), [#allocation5], 16   ;;  %p11874_p5 = pmov %p11869_p0 }
  0xa1   : > { %8617 = vsyncadd (%p11874_p5), [#allocation5], 4294967280 }
  0xa2   : > { %469 = sfence }
  0xa3   : > { %v517_v0 = vld [vmem:[%s11686_s2] sm:$0xff]  ;;  %v518_v1 = vld [vmem:[%s11686_s2 + $0x8] sm:$0xff]  ;;  %v519_v2 = vld [vmem:[%s11686_s2 + $0x10] sm:$0xff]  ;;  %s8914_s16 = sshll.u32 %s8754_s29, 1  ;;  %vm521_vm0 = vcmask 261120   ;;  %vm832_vm1 = vcmask 1040384  }
  0xa4   : > { %v8025_v3 = vpack.c.bf16 %v518_v1, %v517_v0  ;;  %v520_v4 = vld [vmem:[%s11686_s2 + $0x18] sm:$0xff]  ;;  %p509_p6 = scmp.lt.s32.totalorder %s8914_s16, 3  ;;  %v604_v8 = vld [vmem:[#allocation2 + $0x8] sm:$0xff]  ;;  %v603_v11 = vld [vmem:[#allocation2] sm:$0xff]  ;;  %vm8650_vm2 = vmmov 1   ;;  %s822_s19 = scalar_lea.vmem %s11685_s1, %s8914_s16  ;;  %vm828_vm4 = vcmask 72704  }
  0xa5   : > { %v606_v5 = vld [vmem:[#allocation2 + $0x18] sm:$0xff]  ;;  %v8029_v6 = vpack.c.bf16 %v520_v4, %v519_v2  ;;  %v608_v9 = vld [vmem:[#allocation2 + $0x28] sm:$0xff]  ;;  %v605_v12 = vld [vmem:[#allocation2 + $0x10] sm:$0xff]  ;;  %vm1062_vm5 = vcmask 523264   ;;  %s8652_s14 = smov 64   ;;  %s1939_s21 = sld [smem:[#allocation11]] }
  0xa6   : > { %v610_v7 = vld [vmem:[#allocation2 + $0x38] sm:$0xff]  ;;  %8026 = vmatprep.subr.bf16.mxu0 %v8025_v3  ;;  %s510_s22 = scalar_select %p509_p6, %s8914_s16, 3  ;;  %v8033_v10 = vpack.c.bf16 %v608_v9, %v604_v8  ;;  %v609_v13 = vld [vmem:[#allocation2 + $0x30] sm:$0xff]  ;;  %v607_v14 = vld [vmem:[#allocation2 + $0x20] sm:$0xff]  ;;  %vm2525_vm6 = vcmask 1041409   ;;  %vm2527_vm7 = vcmask 1042434  }
  0xa7   : > { %8028 = vmatpush3.bf16.msra.mxu0 %v8025_v3  ;;  %v8065_v15 = vpack.c.bf16 %v610_v7, %v606_v5  ;;  %v8035_v16 = vpack.c.bf16 %v607_v14, %v603_v11  ;;  %v614_v17 = vld [vmem:[#allocation2 + $0x58] sm:$0xff]  ;;  %v612_v18 = vld [vmem:[#allocation2 + $0x48] sm:$0xff]  ;;  %v611_v22 = vld [vmem:[#allocation2 + $0x40] sm:$0xff]  ;;  %v8067_v27 = vpack.c.bf16 %v609_v13, %v605_v12  ;;  %s7836_s13 = sld [smem:[#allocation11 + $0x2]]  ;;  %s7835_s16 = sld [smem:[#allocation11 + $0x1]]  ;;  %vm2529_vm8 = vcmask 1043459  }
  0xa8   : > { %8030 = vmatprep.subr.bf16.mxu0 %v8029_v6  ;;  %s7820_s30 = sshll.u32 %s510_s22, 3  ;;  %8034 = vmatprep.subr.bf16.mxu1 %v8033_v10  ;;  %v616_v19 = vld [vmem:[#allocation2 + $0x68] sm:$0xff]  ;;  %v618_v20 = vld [vmem:[#allocation2 + $0x78] sm:$0xff]  ;;  %v615_v23 = vld [vmem:[#allocation2 + $0x60] sm:$0xff]  ;;  %s7837_s24 = sld [smem:[#allocation11 + $0x3]]  ;;  %vm2531_vm9 = vcmask 1044484  }
  0xa9   : > { %s512_s28 = scalar_lea.vmem %s11684_s0, %s7820_s30  ;;  %v8037_v21 = vpack.c.bf16 %v616_v19, %v612_v18  ;;  %8036 = vmatpush1.bf16.msra.mxu1 %v8035_v16  ;;  %v8039_v25 = vpack.c.bf16 %v615_v23, %v611_v22  ;;  %v620_v28 = vld [vmem:[#allocation2 + $0x88] sm:$0xff]  ;;  %v8069_v30 = vpack.c.bf16 %v618_v20, %v614_v17  ;;  %v613_v31 = vld [vmem:[#allocation2 + $0x50] sm:$0xff]  ;;  %v619_v34 = vld [vmem:[#allocation2 + $0x80] sm:$0xff]  ;;  %vm2533_vm10 = vcmask 1045509   ;;  %s8657_s15 = smov 96  }
  0xaa   : > { %v8924_v24 = vld [vmem:[%s512_s28] sm:$0xff]  ;;  %v8926_v26 = vld [vmem:[%s512_s28 + $0x8] sm:$0xff]  ;;  %v617_v32 = vld [vmem:[#allocation2 + $0x70] sm:$0xff]  ;;  %vm2535_vm11 = vcmask 1046534   ;;  %vm2537_vm12 = vcmask 1047559   ;;  %vm2596_vm13 = vcmask 64512  }
  0xab   : > { %8032 = vmatpush3.bf16.msra.mxu0 %v8029_v6  ;;  %7917 = vmatprep.mubr.msk.f32.mxu0 %vm521_vm0, %v8924_v24  ;;  %v624_v29 = vld [vmem:[#allocation2 + $0xa8] sm:$0xff]  ;;  %v622_v35 = vld [vmem:[#allocation2 + $0x98] sm:$0xff]  ;;  %v623_v37 = vld [vmem:[#allocation2 + $0xa0] sm:$0xff]  ;;  %v8071_v41 = vpack.c.bf16 %v617_v32, %v613_v31  ;;  %s8659_s22 = smov 32   ;;  %s505_s30 = sand.u32 1, %s8628_s26  }
  0xac   : > { %8066 = vmatprep.subr.bf16.mxu0 %v8065_v15  ;;  %8038 = vmatprep.subr.bf16.mxu1 %v8037_v21  ;;  %v8041_v33 = vpack.c.bf16 %v624_v29, %v620_v28  ;;  %v626_v36 = vld [vmem:[#allocation2 + $0xb8] sm:$0xff]  ;;  %v8043_v38 = vpack.c.bf16 %v623_v37, %v619_v34  ;;  %v628_v39 = vld [vmem:[#allocation2 + $0xc8] sm:$0xff]  ;;  %v627_v43 = vld [vmem:[#allocation2 + $0xc0] sm:$0xff]  ;;  %s12122_s3 = sld [smem:[#allocation23_spill]]  ;;  %s7852_s17 = sshll.u32 %s8754_s29, 8 }
  0xad   : > { %8040 = vmatpush1.bf16.msra.mxu1 %v8039_v25  ;;  %v632_v40 = vld [vmem:[#allocation2 + $0xe8] sm:$0xff]  ;;  %v631_v44 = vld [vmem:[#allocation2 + $0xe0] sm:$0xff]  ;;  %v8073_v45 = vpack.c.bf16 %v626_v36, %v622_v35  ;;  %v621_v46 = vld [vmem:[#allocation2 + $0x90] sm:$0xff]  ;;  %s11643_s25 = scalar_lea.sflag [#allocation4], %s505_s30  ;;  %s8660_s27 = smov [#allocation12]  }
  0xae   : > { %7918 = vmatmul.mubr.msk.f32.vlgmr.msra.gmra.mrb[0].mxu0 %vm521_vm0, %v8926_v26  ;;  %8042 = vmatprep.subr.bf16.mxu1 %v8041_v33  ;;  %v8045_v42 = vpack.c.bf16 %v632_v40, %v628_v39  ;;  %v625_v47 = vld [vmem:[#allocation2 + $0xb0] sm:$0xff]  ;;  %v636_v48 = vld [vmem:[#allocation2 + $0x108] sm:$0xff]  ;;  %v630_v49 = vld [vmem:[#allocation2 + $0xd8] sm:$0xff]  ;;  %v8047_v52 = vpack.c.bf16 %v631_v44, %v627_v43 }
  0xaf   : > { %8068 = vmatpush1.bf16.msra.mxu0 %v8067_v27  ;;  %v634_v50 = vld [vmem:[#allocation2 + $0xf8] sm:$0xff]  ;;  %v640_v51 = vld [vmem:[#allocation2 + $0x128] sm:$0xff]  ;;  %v8075_v53 = vpack.c.bf16 %v625_v47, %v621_v46  ;;  %v629_v54 = vld [vmem:[#allocation2 + $0xd0] sm:$0xff] }
  0xb0   : > { %8070 = vmatprep.subr.bf16.mxu0 %v8069_v30  ;;  %v8049_v55 = vpack.c.bf16 %v640_v51, %v636_v48  ;;  %v635_v56 = vld [vmem:[#allocation2 + $0x100] sm:$0xff]  ;;  %v8077_v58 = vpack.c.bf16 %v634_v50, %v630_v49  ;;  %v633_v59 = vld [vmem:[#allocation2 + $0xf0] sm:$0xff]  ;;  %v644_v60 = vld [vmem:[#allocation2 + $0x148] sm:$0xff] }
  0xb1   : > { %8044 = vmatpush1.bf16.msra.mxu1 %v8043_v38  ;;  %v639_v57 = vld [vmem:[#allocation2 + $0x120] sm:$0xff]  ;;  %v648_v61 = vld [vmem:[#allocation2 + $0x168] sm:$0xff]  ;;  %v638_v62 = vld [vmem:[#allocation2 + $0x118] sm:$0xff]  ;;  %v8079_v1 = vpack.c.bf16 %v633_v59, %v629_v54 }
  0xb2   : > { %8046 = vmatprep.subr.bf16.mxu1 %v8045_v42  ;;  %v642_v63 = vld [vmem:[#allocation2 + $0x138] sm:$0xff]  ;;  %v8051_v0 = vpack.c.bf16 %v639_v57, %v635_v56  ;;  %v637_v2 = vld [vmem:[#allocation2 + $0x110] sm:$0xff]  ;;  %v8053_v3 = vpack.c.bf16 %v648_v61, %v644_v60  ;;  %v643_v4 = vld [vmem:[#allocation2 + $0x140] sm:$0xff]  ;;  %p12124_p10 = scmp.ne.s32.totalorder %s12122_s3, 0 }
  0xb3   : > { %8072 = vmatpush1.bf16.msra.mxu0 %v8071_v41  ;;  %v647_v5 = vld [vmem:[#allocation2 + $0x160] sm:$0xff]  ;;  %v8081_v6 = vpack.c.bf16 %v642_v63, %v638_v62  ;;  %v641_v7 = vld [vmem:[#allocation2 + $0x130] sm:$0xff]  ;;  %v652_v8 = vld [vmem:[#allocation2 + $0x188] sm:$0xff] }
  0xb4   : > { %8074 = vmatprep.subr.bf16.mxu0 %v8073_v45  ;;  %v656_v9 = vld [vmem:[#allocation2 + $0x1a8] sm:$0xff]  ;;  %v646_v10 = vld [vmem:[#allocation2 + $0x158] sm:$0xff]  ;;  %v8055_v12 = vpack.c.bf16 %v647_v5, %v643_v4  ;;  %v8083_v13 = vpack.c.bf16 %v641_v7, %v637_v2  ;;  %v645_v14 = vld [vmem:[#allocation2 + $0x150] sm:$0xff]  ;;  %v11710_v45 = vmov 0.0  }
  0xb5   : > { %8048 = vmatpush1.bf16.msra.mxu1 %v8047_v52  ;;  %v650_v11 = vld [vmem:[#allocation2 + $0x178] sm:$0xff]  ;;  %v8057_v15 = vpack.c.bf16 %v656_v9, %v652_v8  ;;  %v651_v16 = vld [vmem:[#allocation2 + $0x180] sm:$0xff]  ;;  %v649_v19 = vld [vmem:[#allocation2 + $0x170] sm:$0xff]  ;;  %731 = vmatprep.mubr.f32.mxu1 %v11710_v45 }
  0xb6   : > { %8050 = vmatprep.subr.bf16.mxu1 %v8049_v55  ;;  %v655_v17 = vld [vmem:[#allocation2 + $0x1a0] sm:$0xff]  ;;  %v8085_v18 = vpack.c.bf16 %v650_v11, %v646_v10  ;;  %v660_v20 = vld [vmem:[#allocation2 + $0x1c8] sm:$0xff]  ;;  %v654_v22 = vld [vmem:[#allocation2 + $0x198] sm:$0xff]  ;;  %v8087_v27 = vpack.c.bf16 %v649_v19, %v645_v14  ;;  %808 = vmatprep.mubr.f32.mxu0 %v11710_v45  ;;  %v8651_v19 = vmov 1966171168  }
  0xb7   : > { %8076 = vmatpush1.bf16.msra.mxu0 %v8075_v53  ;;  %v664_v21 = vld [vmem:[#allocation2 + $0x1e8] sm:$0xff]  ;;  %v658_v23 = vld [vmem:[#allocation2 + $0x1b8] sm:$0xff]  ;;  %v8059_v25 = vpack.c.bf16 %v655_v17, %v651_v16  ;;  %v659_v29 = vld [vmem:[#allocation2 + $0x1c0] sm:$0xff]  ;;  %v916_v17 = vlaneseq }
  0xb8   : > { %8078 = vmatprep.subr.bf16.mxu0 %v8077_v58  ;;  %v8061_v28 = vpack.c.bf16 %v664_v21, %v660_v20  ;;  %v663_v30 = vld [vmem:[#allocation2 + $0x1e0] sm:$0xff]  ;;  %v8089_v31 = vpack.c.bf16 %v658_v23, %v654_v22  ;;  %v653_v32 = vld [vmem:[#allocation2 + $0x190] sm:$0xff]  ;;  %v662_v34 = vld [vmem:[#allocation2 + $0x1d8] sm:$0xff]  ;;  %v914_v20 = vunpack.c.l.s4 %v8651_v19 }
  0xb9   : > { %8052 = vmatpush1.bf16.msra.mxu1 %v8051_v0  ;;  %v657_v33 = vld [vmem:[#allocation2 + $0x1b0] sm:$0xff]  ;;  %v666_v35 = vld [vmem:[#allocation2 + $0x1f8] sm:$0xff]  ;;  %v8063_v36 = vpack.c.bf16 %v663_v30, %v659_v29  ;;  %v959_v42 = vld [vmem:[#allocation8] sm:$0xff]  ;;  %v8957_v22 = vshrl.u32 %v916_v17, 7 }
  0xba   : > { %8054 = vmatprep.subr.bf16.mxu1 %v8053_v3  ;;  %v8091_v37 = vpack.c.bf16 %v657_v33, %v653_v32  ;;  %v8093_v38 = vpack.c.bf16 %v666_v35, %v662_v34  ;;  %v661_v39 = vld [vmem:[#allocation2 + $0x1d0] sm:$0xff]  ;;  %v960_v43 = vld [vmem:[#allocation8 + $0x8] sm:$0xff]  ;;  %v827_v47 = vld [vmem:[#allocation6 + $0x18] sm:$0x1]  ;;  %v915_v21 = vunpack.c.0.s8 %v914_v20 }
  0xbb   : > { %8080 = vmatpush1.bf16.msra.mxu0 %v8079_v1  ;;  %v665_v40 = vld [vmem:[#allocation2 + $0x1f0] sm:$0xff]  ;;  %v8103_v44 = vpack.c.bf16 %v960_v43, %v959_v42  ;;  %v825_v46 = vld [vmem:[#allocation6 + $0x8] sm:$0xff]  ;;  %vm8934_vm3 = vmpackc.low %vm832_vm1, %vm8650_vm2 }
  0xbc   : > { %8082 = vmatprep.subr.bf16.mxu0 %v8081_v6  ;;  %v8095_v41 = vpack.c.bf16 %v665_v40, %v661_v39  ;;  %v8097_v48 = vpack.c.bf16 %v827_v47, %v825_v46  ;;  %v824_v50 = vld [vmem:[#allocation6] sm:$0xff]  ;;  %v826_v51 = vld [vmem:[#allocation6 + $0x10] sm:$0x1]  ;;  %v962_v53 = vld [vmem:[#allocation8 + $0x18] sm:$0xff]  ;;  %v918_v29 = vsub.s32 %v915_v21, %v8957_v22 }
  0xbd   : > { %8056 = vmatpush1.bf16.msra.mxu1 %v8055_v12  ;;  %v961_v52 = vld [vmem:[#allocation8 + $0x10] sm:$0xff]  ;;  %v8100_v55 = vpack.c.bf16 %v826_v51, %v824_v50  ;;  %v1156_v58 = vld [vmem:[#allocation9] sm:$0xff]  ;;  %v1157_v59 = vld [vmem:[#allocation9 + $0x8] sm:$0xff] }
  0xbe   : > { %8058 = vmatprep.subr.bf16.mxu1 %v8057_v15  ;;  %v8107_v57 = vpack.c.bf16 %v962_v53, %v961_v52  ;;  %v8127_v60 = vpack.c.bf16 %v1157_v59, %v1156_v58  ;;  %v1158_v61 = vld [vmem:[#allocation9 + $0x10] sm:$0xff]  ;;  %v1159_v62 = vld [vmem:[#allocation9 + $0x18] sm:$0xff]  ;;  %v823_v63 = vld [vmem:[%s822_s19] sm:$0x3]  ;;  %v8985_v59 = vsub.s32 0, %v8957_v22 }
  0xbf   : > { %8084 = vmatpush1.bf16.msra.mxu0 %v8083_v13  ;;  %v8131_v0 = vpack.c.bf16 %v1159_v62, %v1158_v61  ;;  %v1160_v1 = vld [vmem:[#allocation9 + $0x20] sm:$0xff]  ;;  %v1161_v2 = vld [vmem:[#allocation9 + $0x28] sm:$0xff]  ;;  %v1162_v4 = vld [vmem:[#allocation9 + $0x30] sm:$0xff] }
  0xc0   : > { %8086 = vmatprep.subr.bf16.mxu0 %v8085_v18  ;;  %v8135_v3 = vpack.c.bf16 %v1161_v2, %v1160_v1  ;;  %v1163_v5 = vld [vmem:[#allocation9 + $0x38] sm:$0xff]  ;;  %v1164_v7 = vld [vmem:[#allocation9 + $0x40] sm:$0xff]  ;;  %v1165_v8 = vld [vmem:[#allocation9 + $0x48] sm:$0xff]  ;;  %v8954_v18 = vand.u32 127, %v916_v17 }
  0xc1   : > { %8060 = vmatpush1.bf16.msra.mxu1 %v8059_v25  ;;  %v8139_v6 = vpack.c.bf16 %v1163_v5, %v1162_v4  ;;  %v1166_v9 = vld [vmem:[#allocation9 + $0x50] sm:$0xff]  ;;  %v1167_v10 = vld [vmem:[#allocation9 + $0x58] sm:$0xff]  ;;  %v1169_v12 = vld [vmem:[#allocation9 + $0x68] sm:$0xff] }
  0xc2   : > { %8062 = vmatprep.subr.bf16.mxu1 %v8061_v28  ;;  %v8147_v11 = vpack.c.bf16 %v1167_v10, %v1166_v9  ;;  %v1170_v14 = vld [vmem:[#allocation9 + $0x70] sm:$0xff]  ;;  %v1171_v15 = vld [vmem:[#allocation9 + $0x78] sm:$0xff]  ;;  %11877 = vst [vmem:[#allocation25_spill] sm:$0xff] %v8954_v18  ;;  %3014 = vbcast.lane.b32.xlu0 %v8954_v18, 256  ;;  %v1047_v23 = vld [vmem:[%s11692_s8] sm:$0xff] }
  0xc3   : > { %8088 = vmatpush1.bf16.msra.mxu0 %v8087_v27  ;;  %v8155_v16 = vpack.c.bf16 %v1171_v15, %v1170_v14  ;;  %v1048_v25 = vld [vmem:[%s11692_s8 + $0x8] sm:$0xff]  ;;  %v1049_v35 = vld [vmem:[%s11692_s8 + $0x10] sm:$0xff]  ;;  %v8994_v1 = vld [vmem:[%s11691_s7] ss:$0 sm:$0xff] }
  0xc4   : > { %8090 = vmatprep.subr.bf16.mxu0 %v8089_v31  ;;  %v8111_v30 = vpack.c.bf16 %v1048_v25, %v1047_v23 }
  0xc5   : > { %8064 = vmatpush1.bf16.msra.mxu1 %v8063_v36  ;;  %v1050_v36 = vld [vmem:[%s11692_s8 + $0x18] sm:$0xff] }
  0xc6   : > { %8099 = vmatprep.subr.msk.bf16.mxu1 %vm8934_vm3, %v8097_v48 }
  0xc7   : > { %8092 = vmatpush1.bf16.msra.mxu0 %v8091_v37 }
  0xc8   : > { %8094 = vmatprep.subr.bf16.mxu0 %v8093_v38 }
  0xcb   : > { %8096 = vmatpush1.bf16.msra.mxu0 %v8095_v41  ;;  %v8115_v41 = vpack.c.bf16 %v1050_v36, %v1049_v35 }
  0xcc   : > { %8104 = vmatprep.subr.bf16.mxu0 %v8103_v44 }
 0x181   : > { %v7919_v54 = vpop.f32.mrb[0].mxu0 }
 0x182   : > { %v594_v56 = vpop.f32.mrb[1].mxu0 }
 0x183   : > { %732 = vmatmul.mubr.f32.vlgmr.msra.gmra.mrb[0].mxu1 %v594_v56  ;;  %809 = vmatmul.mubr.f32.vlgmr.msra.gmra.mrb[2].mxu0 %v594_v56 }
 0x184   : > { %8106 = vmatpush3.bf16.msra.mxu0 %v8103_v44  ;;  %737 = vmatprep.mubr.f32.mxu1 %v11710_v45 }
 0x185   : > { %814 = vmatprep.mubr.f32.mxu0 %v11710_v45  ;;  %8102 = vmatpush1.bf16.msk.msra.mxu1 %vm8934_vm3, %v8100_v55 }
 0x186   : > { %8108 = vmatprep.subr.bf16.mxu0 %v8107_v57  ;;  %8112 = vmatprep.subr.bf16.mxu1 %v8111_v30 }
 0x187   : > { %738 = vmatmul.mubr.f32.gmra.mrb[2].mxu1 %v7919_v54  ;;  %815 = vmatmul.mubr.f32.gmra.mrb[4].mxu0 %v7919_v54 }
 0x188   : > { %8110 = vmatpush3.bf16.msra.mxu0 %v8107_v57  ;;  %903 = vmatprep.mubr.f32.mxu1 %v11710_v45 }
 0x189   : > { %7928 = vmatprep.mubr.msk.f32.mxu0 %vm521_vm0, %v8924_v24  ;;  %8128 = vmatprep.subr.bf16.mxu0 %v8127_v60  ;;  %v8143_v24 = vpack.c.bf16 %v1165_v8, %v1164_v7  ;;  %v9014_v8 = vsub.s32 1, %v8957_v22 }
 0x18b   : > { %7826 = vmatmul.mubr.msk.f32.vlgmr.msra.gmra.mrb[4].mxu1 %vm828_vm4, %v823_v63  ;;  %7929 = vmatmul.mubr.msk.f32.vlgmr.msra.gmra.mrb[6].mxu0 %vm521_vm0, %v8926_v26  ;;  %v1168_v26 = vld [vmem:[#allocation9 + $0x60] sm:$0xff] }
 0x18c   : > { %8130 = vmatpush3.bf16.msra.mxu0 %v8127_v60  ;;  %7982 = vmatprep.mubr.f32.mxu0 %v594_v56  ;;  %v8151_v13 = vpack.c.bf16 %v1169_v12, %v1168_v26 }
 0x18d   : > { %8132 = vmatprep.subr.bf16.mxu0 %v8131_v0  ;;  %8114 = vmatpush3.bf16.msra.mxu1 %v8111_v30 }
 0x18e   : > { %8116 = vmatprep.subr.bf16.mxu1 %v8115_v41 }
 0x190   : > { %8134 = vmatpush3.bf16.msra.mxu0 %v8131_v0 }
 0x191   : > { %8136 = vmatprep.subr.bf16.mxu0 %v8135_v3  ;;  %8118 = vmatpush3.bf16.msra.mxu1 %v8115_v41 }
 0x194   : > { %8138 = vmatpush3.bf16.msra.mxu0 %v8135_v3  ;;  %v8999_v3 = vld [vmem:[%s11689_s5] sm:$0x3] }
 0x195   : > { %8140 = vmatprep.subr.bf16.mxu0 %v8139_v6  ;;  %v9021_v26 = vrot.slane %v8999_v3, %v8985_v59 }
 0x198   : > { %8142 = vmatpush3.bf16.msra.mxu0 %v8139_v6 }
 0x199   : > { %8144 = vmatprep.subr.bf16.mxu0 %v8143_v24 }
 0x19c   : > { %8146 = vmatpush3.bf16.msra.mxu0 %v8143_v24 }
 0x19d   : > { %8148 = vmatprep.subr.bf16.mxu0 %v8147_v11 }
 0x1a0   : > { %8150 = vmatpush3.bf16.msra.mxu0 %v8147_v11 }
 0x1a1   : > { %8152 = vmatprep.subr.bf16.mxu0 %v8151_v13 }
 0x1a4   : > { %8154 = vmatpush3.bf16.msra.mxu0 %v8151_v13 }
 0x1a5   : > { %8156 = vmatprep.subr.bf16.mxu0 %v8155_v16 }
 0x1a8   : > { %8158 = vmatpush3.bf16.msra.mxu0 %v8155_v16 }
 0x1a9   : > { %8015 = vmatprep.subr.mxu0 %v11710_v45 }
 0x1ab   : > { %7983 = vmatmul.mubr.f32.vlgmr.msra.gmra.mrb[8].mxu0 %v7919_v54 }
 0x256   : > { %v733_v27 = vpop.f32.mrb[0].mxu1  ;;  %v8965_v28 = vpop.f32.mrb[2].mxu0 }
 0x257   : > { %v735_v31 = vpop.f32.mrb[1].mxu1  ;;  %v812_v32 = vpop.f32.mrb[3].mxu0 }
 0x258   : > { %v1252_v33 = vcombine.low %v733_v27, %v735_v31  ;;  %v1253_v34 = vcombine.high %v733_v27, %v735_v31 }
 0x25a   : > { %v1260_v37 = vrot.slane %v1252_v33, %v918_v29  ;;  %v1267_v38 = vrot.slane %v1253_v34, %v918_v29  ;;  %v739_v39 = vpop.f32.mrb[2].mxu1  ;;  %v816_v40 = vpop.f32.mrb[4].mxu0 }
 0x25b   : > { %v741_v42 = vpop.f32.mrb[3].mxu1  ;;  %v818_v43 = vpop.f32.mrb[5].mxu0 }
 0x25c   : > { %v1268_v44 = vcombine.high %v1260_v37, %v1260_v37  ;;  %v1269_v46 = vcombine.high %v1267_v38, %v1267_v38  ;;  %v8974_v47 = vrot.slane %v1260_v37, %v918_v29  ;;  %v8976_v48 = vrot.slane %v1267_v38, %v918_v29 }
 0x25d   : > { %v1302_v49 = vcombine.low %v739_v39, %v741_v42  ;;  %v1303_v50 = vcombine.high %v739_v39, %v741_v42 }
 0x25e   : > { %v8978_v51 = vrot.slane %v1268_v44, %v918_v29  ;;  %v8980_v52 = vrot.slane %v1269_v46, %v918_v29  ;;  %v905_v53 = vpop.f32.mrb[4].mxu1  ;;  %v8982_v54 = vpop.f32.mrb[6].mxu0  ;;  %v9003_v4 = vcombine.high %v8974_v47, %v8974_v47  ;;  %v1299_v11 = vcombine.high %v8976_v48, %v8976_v48 }
 0x25f   : > { %v1310_v55 = vrot.slane %v1302_v49, %v918_v29  ;;  %v1317_v56 = vrot.slane %v1303_v50, %v918_v29  ;;  %v907_v57 = vpop.f32.mrb[5].mxu1  ;;  %v1036_v58 = vpop.f32.mrb[7].mxu0  ;;  %v1355_v12 = vrot.slane %v8974_v47, %v8985_v59  ;;  %v1387_v20 = vrot.slane %v8976_v48, %v8985_v59 }
 0x260   : > { %v912_v60 = vcombine.low %v905_v53, %v907_v57  ;;  %v9011_v7 = vcombine.high %v8978_v51, %v8978_v51  ;;  %v1037_v10 = vadd.f32 %v8994_v1, %v1036_v58  ;;  %v1363_v17 = vrot.slane %v8978_v51, %v8985_v59 }
 0x261   : > { %v1318_v61 = vcombine.high %v1310_v55, %v1310_v55  ;;  %v1319_v62 = vcombine.high %v1317_v56, %v1317_v56  ;;  %v8987_v63 = vrot.slane %v1310_v55, %v918_v29  ;;  %v8989_v0 = vrot.slane %v1317_v56, %v918_v29 }
 0x262   : > { %v919_v2 = vrot.slane %v912_v60, %v918_v29  ;;  %v1045_v16 = vmax.f32 %v1037_v10, 0.0  ;;  %v1371_v19 = vrot.slane %v9003_v4, %v8985_v59  ;;  %v1379_v21 = vrot.slane %v9011_v7, %v8985_v59 }
 0x263   : > { %v9005_v5 = vrot.slane %v1318_v61, %v918_v29  ;;  %v9007_v6 = vrot.slane %v1319_v62, %v918_v29  ;;  %v1403_v30 = vrot.slane %v1299_v11, %v8985_v59  ;;  %v1395_v31 = vrot.slane %v8980_v52, %v8985_v59 }
 0x264   : > { %v920_v24 = vcombine.high %v919_v2, %v919_v2  ;;  %v927_v9 = vrot.slane %v919_v2, %v918_v29  ;;  %7947 = vmatprep.mubr.msk.f32.mxu1 %vm1062_vm5, %v1045_v16  ;;  %v1359_v33 = vrot.slane %v8974_v47, %v9014_v8  ;;  %v1301_v34 = vcombine.high %v8980_v52, %v8980_v52 }
 0x265   : > { %v1391_v53 = vrot.slane %v8976_v48, %v9014_v8  ;;  %v1407_v57 = vrot.slane %v1299_v11, %v9014_v8  ;;  %v1375_v58 = vrot.slane %v9003_v4, %v9014_v8  ;;  %v1383_v60 = vrot.slane %v9011_v7, %v9014_v8 }
 0x266   : > { %v934_v13 = vrot.slane %v920_v24, %v918_v29  ;;  %v938_v14 = vrot.slane %v927_v9, %v8985_v59  ;;  %v942_v15 = vrot.slane %v927_v9, %v9014_v8  ;;  %v1411_v47 = vrot.slane %v1301_v34, %v8985_v59 }
 0x267   : > { %v1399_v48 = vrot.slane %v8980_v52, %v9014_v8 }
 0x268   : > { %v946_v23 = vrot.slane %v934_v13, %v8985_v59  ;;  %v950_v25 = vrot.slane %v934_v13, %v9014_v8  ;;  %v955_v27 = vadd.f32 %v938_v14, %v8965_v28  ;;  %v956_v29 = vadd.f32 %v942_v15, %v812_v32 }
 0x269   : > { %v9087_v14 = vrot.slane %v8999_v3, %v9014_v8  ;;  %v9095_v15 = vadd.f32 %v8982_v54, %v8994_v1  ;;  %v9107_v54 = vcombine.high %v8989_v0, %v8989_v0  ;;  %v1051_v1 = vld [vmem:[%s11692_s8 + $0x20] sm:$0xff] }
 0x26a   : > { %v9046_v35 = vadd.f32 %v946_v23, %v816_v40  ;;  %v9048_v36 = vadd.f32 %v950_v25, %v818_v43  ;;  %v1514_v37 = vadd.f32 %v1363_v17, %v955_v27  ;;  %v1512_v28 = vadd.f32 %v1355_v12, %v955_v27 }
 0x26b   : > { %v1516_v32 = vadd.f32 %v1371_v19, %v955_v27  ;;  %v1520_v38 = vadd.f32 %v1387_v20, %v955_v27  ;;  %v1518_v39 = vadd.f32 %v1379_v21, %v955_v27  ;;  %v1524_v41 = vadd.f32 %v1403_v30, %v955_v27  ;;  %v1052_v30 = vld [vmem:[%s11692_s8 + $0x28] sm:$0xff] }
 0x26c   : > { %v1546_v42 = vmax.f32 %v1514_v37, 0.0  ;;  %v1544_v44 = vmax.f32 %v1512_v28, 0.0  ;;  %v1522_v46 = vadd.f32 %v1395_v31, %v955_v27  ;;  %v1513_v49 = vadd.f32 %v1359_v33, %v956_v29  ;;  %v1053_v28 = vld [vmem:[%s11692_s8 + $0x30] sm:$0xff] }
 0x26d   : > { %v1548_v50 = vmax.f32 %v1516_v32, 0.0  ;;  %v1367_v40 = vrot.slane %v8978_v51, %v9014_v8  ;;  %v1552_v56 = vmax.f32 %v1520_v38, 0.0  ;;  %v1415_v51 = vrot.slane %v1301_v34, %v9014_v8  ;;  %v1054_v32 = vld [vmem:[%s11692_s8 + $0x38] sm:$0xff] }
 0x26e   : > { %v9056_v43 = vmul.f32 %v9021_v26, %v1546_v42  ;;  %v9059_v55 = vmul.f32 %v9021_v26, %v1544_v44  ;;  %v1550_v62 = vmax.f32 %v1518_v39, 0.0  ;;  %v1556_v2 = vmax.f32 %v1524_v41, 0.0 }
 0x26f   : > { %v9074_v61 = vmul.f32 %v9021_v26, %v1548_v50  ;;  %v1526_v4 = vadd.f32 %v1411_v47, %v955_v27  ;;  %v1521_v24 = vadd.f32 %v1391_v53, %v956_v29  ;;  %v1515_v7 = vadd.f32 %v1367_v40, %v956_v29 }
 0x270   : > { %1685 = vrot.lane.b32.xlu1 %v9056_v43, %s8652_s14  ;;  %1683 = vrot.lane.b32.xlu0 %v9059_v55, %s8652_s14  ;;  %v1525_v9 = vadd.f32 %v1407_v57, %v956_v29  ;;  %v1517_v10 = vadd.f32 %v1375_v58, %v956_v29  ;;  %v9077_v52 = vmul.f32 %v9021_v26, %v1552_v56  ;;  %v1554_v16 = vmax.f32 %v1522_v46, 0.0 }
 0x271   : > { %v9079_v11 = vadd.f32 %v1383_v60, %v956_v29  ;;  %v9081_v12 = vadd.f32 %v1399_v48, %v956_v29  ;;  %v9083_v13 = vadd.f32 %v1415_v51, %v956_v29  ;;  %v1545_v17 = vmax.f32 %v1513_v49, 0.0 }
 0x272   : > { %v1348_v19 = vcombine.high %v8987_v63, %v8987_v63  ;;  %v1558_v20 = vmax.f32 %v1526_v4, 0.0  ;;  %v1553_v21 = vmax.f32 %v1521_v24, 0.0  ;;  %v1547_v23 = vmax.f32 %v1515_v7, 0.0 }
 0x273   : > { %v9100_v3 = vmul.f32 %v9021_v26, %v1550_v62  ;;  %v9103_v25 = vmul.f32 %v9021_v26, %v1556_v2  ;;  %v1557_v27 = vmax.f32 %v1525_v9, 0.0  ;;  %v1549_v29 = vmax.f32 %v1517_v10, 0.0 }
 0x274   : > { %1687 = vrot.lane.b32.xlu1 %v9074_v61, %s8652_s14  ;;  %1691 = vrot.lane.b32.xlu0 %v9077_v52, %s8652_s14  ;;  %v1046_v31 = vmax.f32 %v9095_v15, 0.0  ;;  %v9121_v33 = vmul.f32 %v9021_v26, %v1554_v16  ;;  %v9124_v34 = vmul.f32 %v9087_v14, %v1545_v17  ;;  %v1419_v37 = vrot.slane %v8987_v63, %v8985_v59 }
 0x275   : > { %v9135_v38 = vmul.f32 %v9021_v26, %v1558_v20  ;;  %v9138_v39 = vmul.f32 %v9087_v14, %v1553_v21  ;;  %v9141_v41 = vmul.f32 %v9087_v14, %v1547_v23  ;;  %v1551_v42 = vmax.f32 %v9079_v11, 0.0 }
 0x276   : > { %v9145_v44 = vmul.f32 %v9087_v14, %v1557_v27  ;;  %v9148_v46 = vmul.f32 %v9087_v14, %v1549_v29  ;;  %v1528_v49 = vadd.f32 %v1419_v37, %v9046_v35  ;;  %v1435_v50 = vrot.slane %v1348_v19, %v8985_v59 }
 0x277   : > { %v1451_v47 = vrot.slane %v8989_v0, %v8985_v59  ;;  %v8119_v53 = vpack.c.bf16 %v1052_v30, %v1051_v1  ;;  %v1467_v40 = vrot.slane %v9107_v54, %v8985_v59  ;;  %v8123_v56 = vpack.c.bf16 %v1054_v32, %v1053_v28 }
 0x278   : > { %1689 = vrot.lane.b32.xlu1 %v9100_v3, %s8652_s14  ;;  %1695 = vrot.lane.b32.xlu0 %v9103_v25, %s8652_s14  ;;  %v1560_v57 = vmax.f32 %v1528_v49, 0.0  ;;  %v1532_v58 = vadd.f32 %v1435_v50, %v9046_v35  ;;  %v1427_v60 = vrot.slane %v9005_v5, %v8985_v59  ;;  %v1423_v48 = vrot.slane %v8987_v63, %v9014_v8 }
 0x279   : > { %v1536_v51 = vadd.f32 %v1451_v47, %v9046_v35  ;;  %8120 = vmatprep.subr.bf16.mxu1 %v8119_v53  ;;  %v1540_v62 = vadd.f32 %v1467_v40, %v9046_v35  ;;  %v1350_v2 = vcombine.high %v9005_v5, %v9005_v5  ;;  %v1439_v4 = vrot.slane %v1348_v19, %v9014_v8 }
 0x27a   : > { %v9173_v7 = vmul.f32 %v9021_v26, %v1560_v57  ;;  %v1564_v9 = vmax.f32 %v1532_v58, 0.0  ;;  %8122 = vmatpush3.bf16.msra.mxu1 %v8119_v53  ;;  %v1530_v10 = vadd.f32 %v1427_v60, %v9046_v35  ;;  %v1529_v63 = vadd.f32 %v1423_v48, %v9048_v36 }
 0x27b   : > { %v1568_v17 = vmax.f32 %v1536_v51, 0.0  ;;  %v1572_v20 = vmax.f32 %v1540_v62, 0.0  ;;  %8124 = vmatprep.subr.bf16.mxu1 %v8123_v56  ;;  %v1443_v21 = vrot.slane %v1350_v2, %v8985_v59  ;;  %v1533_v19 = vadd.f32 %v1439_v4, %v9048_v36 }
 0x27c   : > { %1693 = vrot.lane.b32.xlu1 %v9121_v33, %s8652_s14  ;;  %1843 = vrot.lane.b32.xlu0 %v9124_v34, %s8652_s14  ;;  %v9186_v23 = vmul.f32 %v9021_v26, %v1564_v9  ;;  %v1562_v27 = vmax.f32 %v1530_v10, 0.0  ;;  %v1561_v29 = vmax.f32 %v1529_v63, 0.0  ;;  %v1459_v1 = vrot.slane %v9007_v6, %v8985_v59 }
 0x27d   : > { %v9191_v30 = vmul.f32 %v9021_v26, %v1568_v17  ;;  %v9194_v37 = vmul.f32 %v9021_v26, %v1572_v20  ;;  %v1534_v28 = vadd.f32 %v1443_v21, %v9046_v35  ;;  %v1565_v32 = vmax.f32 %v1533_v19, 0.0 }
 0x27e   : > { %v9170_v24 = vpop.f32.mrb[8].mxu0  ;;  %8126 = vmatpush3.bf16.msra.mxu1 %v8123_v56  ;;  %v9198_v49 = vmul.f32 %v9021_v26, %v1562_v27  ;;  %v9201_v50 = vmul.f32 %v9087_v14, %v1561_v29  ;;  %v1538_v47 = vadd.f32 %v1459_v1, %v9046_v35  ;;  %v1455_v53 = vrot.slane %v8989_v0, %v9014_v8 }
 0x27f   : > { %11878 = vst [vmem:[#allocation26_spill] sm:$0xff] %v9170_v24  ;;  %v9177_v16 = vpop.f32.mrb[9].mxu0  ;;  %v1566_v40 = vmax.f32 %v1534_v28, 0.0  ;;  %v9207_v57 = vmul.f32 %v9087_v14, %v1565_v32  ;;  %v1351_v58 = vcombine.high %v9007_v6, %v9007_v6  ;;  %v1471_v56 = vrot.slane %v9107_v54, %v9014_v8  ;;  %7985 = vmatprep.subr.mxu1 %v11710_v45 }
 0x280   : > { %11879 = vst [vmem:[#allocation27_spill] sm:$0xff] %v9177_v16  ;;  %1697 = vrot.lane.b32.xlu1 %v9135_v38, %s8652_s14  ;;  %1851 = vrot.lane.b32.xlu0 %v9138_v39, %s8652_s14  ;;  %v1570_v60 = vmax.f32 %v1538_v47, 0.0  ;;  %v1537_v0 = vadd.f32 %v1455_v53, %v9048_v36  ;;  %v1431_v48 = vrot.slane %v9005_v5, %v9014_v8  ;;  %v1555_v32 = vmax.f32 %v9081_v12, 0.0 }
 0x281   : > { %v1447_v51 = vrot.slane %v1350_v2, %v9014_v8  ;;  %7948 = vmatmul.mubr.msk.f32.vlgmr.msra.gmra.mrb[6].mxu1 %vm1062_vm5, %v1046_v31  ;;  %v9226_v54 = vmul.f32 %v9021_v26, %v1566_v40  ;;  %v1475_v62 = vrot.slane %v1351_v58, %v8985_v59  ;;  %v1541_v4 = vadd.f32 %v1471_v56, %v9048_v36 }
 0x282   : > { %v1463_v9 = vrot.slane %v9007_v6, %v9014_v8  ;;  %v9233_v10 = vmul.f32 %v9021_v26, %v1570_v60  ;;  %v1569_v5 = vmax.f32 %v1537_v0, 0.0  ;;  %v1531_v2 = vadd.f32 %v1431_v48, %v9048_v36 }
 0x283   : > { %v1535_v15 = vadd.f32 %v1447_v51, %v9048_v36  ;;  %v1542_v31 = vadd.f32 %v1475_v62, %v9046_v35  ;;  %v1573_v63 = vmax.f32 %v1541_v4, 0.0  ;;  %v1479_v20 = vrot.slane %v1351_v58, %v9014_v8 }
 0x284   : > { %1845 = vrot.lane.b32.xlu1 %v9141_v41, %s8652_s14  ;;  %1855 = vrot.lane.b32.xlu0 %v9145_v44, %s8652_s14  ;;  %v1539_v17 = vadd.f32 %v1463_v9, %v9048_v36  ;;  %v9243_v6 = vmul.f32 %v9087_v14, %v1569_v5  ;;  %v1563_v21 = vmax.f32 %v1531_v2, 0.0  ;;  %v1594_v28 = vmul.f32 %v9087_v14, %v1551_v42 }
 0x285   : > { %v1567_v19 = vmax.f32 %v1535_v15, 0.0  ;;  %v1574_v27 = vmax.f32 %v1542_v31, 0.0  ;;  %v9246_v29 = vmul.f32 %v9087_v14, %v1573_v63  ;;  %v1543_v35 = vadd.f32 %v1479_v20, %v9048_v36 }
 0x286   : > { %v1571_v1 = vmax.f32 %v1539_v17, 0.0  ;;  %v9254_v47 = vmul.f32 %v9087_v14, %v1563_v21  ;;  %v1598_v11 = vmul.f32 %v9087_v14, %v1555_v32  ;;  %v1559_v12 = vmax.f32 %v9083_v13, 0.0 }
 0x287   : > { %v9257_v53 = vmul.f32 %v9087_v14, %v1567_v19  ;;  %v9260_v40 = vmul.f32 %v9021_v26, %v1574_v27  ;;  %v1575_v56 = vmax.f32 %v1543_v35, 0.0  ;;  %v1619_v26 = vsel %vm1062_vm5, %v9059_v55, 0.0 }
 0x288   : > { %1847 = vrot.lane.b32.xlu1 %v9148_v46, %s8652_s14  ;;  %v9263_v58 = vmul.f32 %v9087_v14, %v1571_v1  ;;  %v1602_v42 = vmul.f32 %v9087_v14, %v1559_v12  ;;  %v1622_v60 = vsel %vm1062_vm5, %v9056_v43, 0.0  ;;  %v1631_v0 = vsel %vm1062_vm5, %v9077_v52, 0.0 }
 0x289   : > { %v9267_v36 = vmul.f32 %v9087_v14, %v1575_v56  ;;  %v1637_v13 = vsel %vm1062_vm5, %v9103_v25, 0.0  ;;  %v1779_v14 = vsel %vm1062_vm5, %v9124_v34, 0.0  ;;  %v1785_v55 = vsel %vm1062_vm5, %v9148_v46, 0.0 }
 0x28a   : > { %v1625_v43 = vsel %vm1062_vm5, %v9074_v61, 0.0  ;;  %v1791_v52 = vsel %vm1062_vm5, %v9138_v39, 0.0  ;;  %v1628_v25 = vsel %vm1062_vm5, %v9100_v3, 0.0  ;;  %v1797_v34 = vsel %vm1062_vm5, %v9145_v44, 0.0 }
 0x28b   : > { %v1634_v46 = vsel %vm1062_vm5, %v9121_v33, 0.0  ;;  %v1640_v61 = vsel %vm1062_vm5, %v9135_v38, 0.0  ;;  %v1782_v39 = vsel %vm1062_vm5, %v9141_v41, 0.0  ;;  %v1788_v48 = vsel %vm1062_vm5, %v1594_v28, 0.0  ;;  %v9337_v38 = vpop.permute.xlu0 %3014 }
 0x28c   : > { %1849 = vrot.lane.b32.xlu1 %v1594_v28, %s8652_s14  ;;  %v1794_v3 = vsel %vm1062_vm5, %v1598_v11, 0.0  ;;  %v1800_v44 = vsel %vm1062_vm5, %v1602_v42, 0.0  ;;  %v11712_v33 = vmov 0   ;;  %v1643_v62 = vsel %vm1062_vm5, %v9173_v7, 0.0 }
 0x28d   : > { %8268 = vset.pattern.permute.xlu0 %v11712_v33  ;;  %8269 = vset.pattern.permute.xlu1 %v11712_v33  ;;  %v1649_v9 = vsel %vm1062_vm5, %v9186_v23, 0.0  ;;  %v1655_v15 = vsel %vm1062_vm5, %v9191_v30, 0.0  ;;  %v1661_v63 = vsel %vm1062_vm5, %v9194_v37, 0.0  ;;  %v1652_v27 = vsel %vm1062_vm5, %v9226_v54, 0.0 }
 0x28e   : > { %v1821_v1 = vsel %vm1062_vm5, %v9246_v29, 0.0  ;;  %v9618_v45 = vstv %s7837_s24 }
 0x290   : > { %1853 = vrot.lane.b32.xlu1 %v1598_v11, %s8652_s14 }
 0x294   : > { %1857 = vrot.lane.b32.xlu1 %v1602_v42, %s8652_s14  ;;  %v1812_v42 = vsel %vm1062_vm5, %v9257_v53, 0.0 }
 0x2a3   : > { %1620 = vadd.xlane.f32.xlu0 %v1619_v26 }
 0x2a7   : > { %1623 = vadd.xlane.f32.xlu0 %v1622_v60 }
 0x2ab   : > { %1632 = vadd.xlane.f32.xlu0 %v1631_v0 }
 0x2af   : > { %1638 = vadd.xlane.f32.xlu0 %v1637_v13 }
 0x2b3   : > { %1780 = vadd.xlane.f32.xlu0 %v1779_v14  ;;  %v1824_v14 = vsel %vm1062_vm5, %v9267_v36, 0.0 }
 0x2b7   : > { %1786 = vadd.xlane.f32.xlu0 %v1785_v55 }
 0x2b8   : > { %1626 = vadd.xlane.f32.xlu1 %v1625_v43 }
 0x2bb   : > { %1792 = vadd.xlane.f32.xlu0 %v1791_v52 }
 0x2bc   : > { %1629 = vadd.xlane.f32.xlu1 %v1628_v25 }
 0x2bf   : > { %1798 = vadd.xlane.f32.xlu0 %v1797_v34 }
 0x2c0   : > { %1635 = vadd.xlane.f32.xlu1 %v1634_v46 }
 0x2c4   : > { %1641 = vadd.xlane.f32.xlu1 %v1640_v61 }
 0x2c8   : > { %1783 = vadd.xlane.f32.xlu1 %v1782_v39 }
 0x2cc   : > { %1789 = vadd.xlane.f32.xlu1 %v1788_v48 }
 0x2d0   : > { %1795 = vadd.xlane.f32.xlu1 %v1794_v3 }
 0x2d4   : > { %1801 = vadd.xlane.f32.xlu1 %v1800_v44 }
 0x2d5   : > { %1699 = vrot.lane.b32.xlu0 %v9173_v7, %s8652_s14  ;;  %v1803_v7 = vsel %vm1062_vm5, %v9201_v50, 0.0 }
 0x2d9   : > { %1703 = vrot.lane.b32.xlu0 %v9186_v23, %s8652_s14  ;;  %v1809_v23 = vsel %vm1062_vm5, %v9207_v57, 0.0 }
 0x2dd   : > { %1707 = vrot.lane.b32.xlu0 %v9191_v30, %s8652_s14  ;;  %v1646_v30 = vsel %vm1062_vm5, %v9198_v49, 0.0 }
 0x2e1   : > { %1711 = vrot.lane.b32.xlu0 %v9194_v37, %s8652_s14  ;;  %v1815_v37 = vsel %vm1062_vm5, %v9243_v6, 0.0 }
 0x2e2   : > { %v9339_v41 = vpop.permute.xlu1 %1685  ;;  %v1684_v51 = vpop.permute.xlu0 %1683 }
 0x2e3   : > { %v1731_v28 = vsel %vm1062_vm5, %v1684_v51, 0.0  ;;  %v1734_v52 = vsel %vm1062_vm5, %v9339_v41, 0.0 }
 0x2e5   : > { %1701 = vrot.lane.b32.xlu1 %v9198_v49, %s8652_s14  ;;  %1859 = vrot.lane.b32.xlu0 %v9201_v50, %s8652_s14 }
 0x2e6   : > { %v1688_v4 = vpop.permute.xlu1 %1687  ;;  %v1692_v5 = vpop.permute.xlu0 %1691 }
 0x2e7   : > { %v1743_v26 = vsel %vm1062_vm5, %v1692_v5, 0.0 }
 0x2e9   : > { %1705 = vrot.lane.b32.xlu1 %v9226_v54, %s8652_s14  ;;  %1863 = vrot.lane.b32.xlu0 %v9207_v57, %s8652_s14  ;;  %v1658_v57 = vsel %vm1062_vm5, %v9233_v10, 0.0  ;;  %v1664_v54 = vsel %vm1062_vm5, %v9260_v40, 0.0 }
 0x2ea   : > { %v1690_v2 = vpop.permute.xlu1 %1689  ;;  %v1696_v31 = vpop.permute.xlu0 %1695 }
 0x2eb   : > { %v1740_v11 = vsel %vm1062_vm5, %v1690_v2, 0.0  ;;  %v1749_v0 = vsel %vm1062_vm5, %v1696_v31, 0.0 }
 0x2ed   : > { %1709 = vrot.lane.b32.xlu1 %v9233_v10, %s8652_s14  ;;  %1867 = vrot.lane.b32.xlu0 %v9243_v6, %s8652_s14  ;;  %v1737_v6 = vsel %vm1062_vm5, %v1688_v4, 0.0 }
 0x2ee   : > { %v1694_v17 = vpop.permute.xlu1 %1693  ;;  %v1844_v20 = vpop.permute.xlu0 %1843 }
 0x2ef   : > { %v1891_v55 = vsel %vm1062_vm5, %v1844_v20, 0.0 }
 0x2f1   : > { %1713 = vrot.lane.b32.xlu1 %v9260_v40, %s8652_s14  ;;  %1871 = vrot.lane.b32.xlu0 %v9246_v29, %s8652_s14  ;;  %v1806_v29 = vsel %vm1062_vm5, %v9254_v47, 0.0 }
 0x2f2   : > { %v1698_v21 = vpop.permute.xlu1 %1697  ;;  %v1852_v19 = vpop.permute.xlu0 %1851 }
 0x2f3   : > { %v1752_v48 = vsel %vm1062_vm5, %v1698_v21, 0.0  ;;  %v1903_v44 = vsel %vm1062_vm5, %v1852_v19, 0.0 }
 0x2f5   : > { %1861 = vrot.lane.b32.xlu1 %v9254_v47, %s8652_s14  ;;  %v1818_v47 = vsel %vm1062_vm5, %v9263_v58, 0.0 }
 0x2f6   : > { %v1846_v50 = vpop.permute.xlu1 %1845  ;;  %v1856_v35 = vpop.permute.xlu0 %1855 }
 0x2f7   : > { %v1894_v51 = vsel %vm1062_vm5, %v1846_v50, 0.0  ;;  %v1909_v4 = vsel %vm1062_vm5, %v1856_v35, 0.0 }
 0x2f9   : > { %1865 = vrot.lane.b32.xlu1 %v9257_v53, %s8652_s14 }
 0x2fa   : > { %v1848_v49 = vpop.permute.xlu1 %1847 }
 0x2fb   : > { %v1897_v25 = vsel %vm1062_vm5, %v1848_v49, 0.0 }
 0x2fd   : > { %1869 = vrot.lane.b32.xlu1 %v9263_v58, %s8652_s14 }
 0x2fe   : > { %v1850_v10 = vpop.permute.xlu1 %1849 }
 0x2ff   : > { %v1900_v61 = vsel %vm1062_vm5, %v1850_v10, 0.0 }
 0x301   : > { %1873 = vrot.lane.b32.xlu1 %v9267_v36, %s8652_s14  ;;  %v1746_v36 = vsel %vm1062_vm5, %v1694_v17, 0.0 }
 0x302   : > { %v1854_v40 = vpop.permute.xlu1 %1853 }
 0x303   : > { %v1906_v5 = vsel %vm1062_vm5, %v1854_v40, 0.0 }
 0x306   : > { %v1858_v53 = vpop.permute.xlu1 %1857 }
 0x310   : > { %1644 = vadd.xlane.f32.xlu0 %v1643_v62 }
 0x314   : > { %1650 = vadd.xlane.f32.xlu0 %v1649_v9 }
 0x318   : > { %1656 = vadd.xlane.f32.xlu0 %v1655_v15 }
 0x31c   : > { %1662 = vadd.xlane.f32.xlu0 %v1661_v63  ;;  %v1912_v63 = vsel %vm1062_vm5, %v1858_v53, 0.0 }
 0x320   : > { %1804 = vadd.xlane.f32.xlu0 %v1803_v7 }
 0x324   : > { %1810 = vadd.xlane.f32.xlu0 %v1809_v23 }
 0x325   : > { %1647 = vadd.xlane.f32.xlu1 %v1646_v30 }
 0x328   : > { %1816 = vadd.xlane.f32.xlu0 %v1815_v37 }
 0x329   : > { %1653 = vadd.xlane.f32.xlu1 %v1652_v27 }
 0x32c   : > { %1822 = vadd.xlane.f32.xlu0 %v1821_v1 }
 0x32d   : > { %1659 = vadd.xlane.f32.xlu1 %v1658_v57 }
 0x330   : > { %v9364_v32 = vpop.xlane.xlu0 %1620  ;;  %1732 = vadd.xlane.f32.xlu0 %v1731_v28 }
 0x331   : > { %1665 = vadd.xlane.f32.xlu1 %v1664_v54 }
 0x334   : > { %v9369_v56 = vpop.xlane.xlu0 %1623  ;;  %1738 = vadd.xlane.f32.xlu0 %v1737_v6 }
 0x335   : > { %1807 = vadd.xlane.f32.xlu1 %v1806_v29 }
 0x338   : > { %v9374_v12 = vpop.xlane.xlu0 %1632  ;;  %1741 = vadd.xlane.f32.xlu0 %v1740_v11 }
 0x339   : > { %1813 = vadd.xlane.f32.xlu1 %v1812_v42 }
 0x33c   : > { %v9379_v60 = vpop.xlane.xlu0 %1638  ;;  %1744 = vadd.xlane.f32.xlu0 %v1743_v26 }
 0x33d   : > { %1819 = vadd.xlane.f32.xlu1 %v1818_v47 }
 0x340   : > { %v9384_v13 = vpop.xlane.xlu0 %1780  ;;  %1750 = vadd.xlane.f32.xlu0 %v1749_v0 }
 0x341   : > { %1825 = vadd.xlane.f32.xlu1 %v1824_v14 }
 0x344   : > { %v9389_v43 = vpop.xlane.xlu0 %1786  ;;  %1892 = vadd.xlane.f32.xlu0 %v1891_v55 }
 0x345   : > { %v9393_v58 = vpop.xlane.xlu1 %1626  ;;  %1735 = vadd.xlane.f32.xlu1 %v1734_v52 }
 0x348   : > { %v9396_v34 = vpop.xlane.xlu0 %1792  ;;  %1898 = vadd.xlane.f32.xlu0 %v1897_v25 }
 0x349   : > { %v9399_v46 = vpop.xlane.xlu1 %1629  ;;  %1747 = vadd.xlane.f32.xlu1 %v1746_v36 }
 0x34c   : > { %v9402_v39 = vpop.xlane.xlu0 %1798  ;;  %1901 = vadd.xlane.f32.xlu0 %v1900_v61 }
 0x34d   : > { %v9405_v3 = vpop.xlane.xlu1 %1635  ;;  %1753 = vadd.xlane.f32.xlu1 %v1752_v48 }
 0x350   : > { %v1700_v41 = vpop.permute.xlu0 %1699  ;;  %1904 = vadd.xlane.f32.xlu0 %v1903_v44  ;;  %v9434_v44 = vstv %s1939_s21  ;;  %s12123_s21 = sld [smem:[#allocation77_spill]] }
 0x351   : > { %v9409_v62 = vpop.xlane.xlu1 %1641  ;;  %1895 = vadd.xlane.f32.xlu1 %v1894_v51  ;;  %v1755_v15 = vsel %vm1062_vm5, %v1700_v41, 0.0  ;;  %v9438_v41 = vadd.f32 %v9434_v44, %v9364_v32  ;;  %v9441_v51 = vstv %s7836_s13 }
 0x354   : > { %v1704_v9 = vpop.permute.xlu0 %1703  ;;  %1910 = vadd.xlane.f32.xlu0 %v1909_v4  ;;  %v9415_v17 = vpop.f32.mrb[6].mxu1 }
 0x355   : > { %v1784_v2 = vpop.xlane.xlu1 %1783  ;;  %1907 = vadd.xlane.f32.xlu1 %v1906_v5  ;;  %v9417_v20 = vpop.f32.mrb[7].mxu1  ;;  %v1761_v21 = vsel %vm1062_vm5, %v1704_v9, 0.0  ;;  %v9452_v5 = vadd.f32 %v9434_v44, %v9369_v56  ;;  %v9470_v56 = vadd.f32 %v9434_v44, %v9399_v46 }
 0x356   : > { %v9444_v4 = vadd.f32 %v9441_v51, %v1784_v2  ;;  %v9461_v2 = vadd.f32 %v9434_v44, %v9393_v58  ;;  %v9476_v58 = vadd.f32 %v9434_v44, %v9374_v12  ;;  %v9491_v12 = vadd.f32 %v9434_v44, %v9409_v62  ;;  %s11638_s13 = scalar_lea.hbm %s12123_s21, %s7852_s17 }
 0x357   : > { %v9505_v62 = vadd.f32 %v9441_v51, %v9389_v43 }
 0x358   : > { %v1708_v31 = vpop.permute.xlu0 %1707  ;;  %1756 = vadd.xlane.f32.xlu0 %v1755_v15 }
 0x359   : > { %v1790_v7 = vpop.xlane.xlu1 %1789  ;;  %1913 = vadd.xlane.f32.xlu1 %v1912_v63  ;;  %v1767_v19 = vsel %vm1062_vm5, %v1708_v31, 0.0 }
 0x35a   : > { %v9448_v9 = vadd.f32 %v9441_v51, %v1790_v7  ;;  %v9481_v7 = vadd.f32 %v9434_v44, %v9405_v3  ;;  %v7830_v3 = vld [vmem:[%s11693_s9] ss:$0 sm:$0xff] }
 0x35c   : > { %v1712_v23 = vpop.permute.xlu0 %1711  ;;  %1762 = vadd.xlane.f32.xlu0 %v1761_v21  ;;  %v9486_v21 = vadd.f32 %v9434_v44, %v9379_v60  ;;  %v1141_v60 = vadd.f32 %v9415_v17, %v7830_v3 }
 0x35d   : > { %v1796_v30 = vpop.xlane.xlu1 %1795  ;;  %v1773_v50 = vsel %vm1062_vm5, %v1712_v23, 0.0 }
 0x35e   : > { %v9456_v32 = vadd.f32 %v9441_v51, %v1796_v30 }
 0x360   : > { %v1860_v37 = vpop.permute.xlu0 %1859  ;;  %1768 = vadd.xlane.f32.xlu0 %v1767_v19  ;;  %v9499_v19 = vadd.f32 %v9441_v51, %v9384_v13 }
 0x361   : > { %v1802_v27 = vpop.xlane.xlu1 %1801  ;;  %v1915_v49 = vsel %vm1062_vm5, %v1860_v37, 0.0 }
 0x362   : > { %v9465_v15 = vadd.f32 %v9441_v51, %v1802_v27 }
 0x364   : > { %v1864_v1 = vpop.permute.xlu0 %1863  ;;  %1774 = vadd.xlane.f32.xlu0 %v1773_v50 }
 0x365   : > { %v1702_v35 = vpop.permute.xlu1 %1701  ;;  %v1921_v29 = vsel %vm1062_vm5, %v1864_v1, 0.0  ;;  %v7834_v1 = vmul.f32 -1.442695, %v1141_v60 }
 0x366   : > { %v1758_v57 = vsel %vm1062_vm5, %v1702_v35, 0.0  ;;  %v9514_v35 = vadd.f32 %v9441_v51, %v9396_v34 }
 0x367   : > { %1759 = vadd.xlane.f32.xlu1 %v1758_v57  ;;  %8279 = vpow2.f32 %v7834_v1 }
 0x368   : > { %1916 = vadd.xlane.f32.xlu0 %v1915_v49  ;;  %v1868_v54 = vpop.permute.xlu0 %1867  ;;  %v9523_v49 = vadd.f32 %v9441_v51, %v9402_v39 }
 0x369   : > { %v1706_v28 = vpop.permute.xlu1 %1705  ;;  %v1927_v42 = vsel %vm1062_vm5, %v1868_v54, 0.0 }
 0x36a   : > { %v1764_v6 = vsel %vm1062_vm5, %v1706_v28, 0.0 }
 0x36b   : > { %1765 = vadd.xlane.f32.xlu1 %v1764_v6 }
 0x36c   : > { %1922 = vadd.xlane.f32.xlu0 %v1921_v29  ;;  %v1872_v40 = vpop.permute.xlu0 %1871 }
 0x36d   : > { %v1710_v10 = vpop.permute.xlu1 %1709  ;;  %v1933_v0 = vsel %vm1062_vm5, %v1872_v40, 0.0 }
 0x36e   : > { %v1770_v11 = vsel %vm1062_vm5, %v1710_v10, 0.0 }
 0x36f   : > { %1771 = vadd.xlane.f32.xlu1 %v1770_v11 }
 0x370   : > { %1928 = vadd.xlane.f32.xlu0 %v1927_v42 }
 0x371   : > { %v1714_v26 = vpop.permute.xlu1 %1713  ;;  %v8280_v11 = vpop.eup %8279 }
 0x372   : > { %v1776_v47 = vsel %vm1062_vm5, %v1714_v26, 0.0 }
 0x373   : > { %1777 = vadd.xlane.f32.xlu1 %v1776_v47  ;;  %v1151_v47 = vadd.f32 1.0, %v8280_v11 }
 0x374   : > { %1934 = vadd.xlane.f32.xlu0 %v1933_v0 }
 0x375   : > { %v1862_v14 = vpop.permute.xlu1 %1861  ;;  %8281 = vrcp.f32 %v1151_v47 }
 0x376   : > { %v1918_v53 = vsel %vm1062_vm5, %v1862_v14, 0.0 }
 0x377   : > { %1919 = vadd.xlane.f32.xlu1 %v1918_v53 }
 0x379   : > { %v1866_v55 = vpop.permute.xlu1 %1865 }
 0x37a   : > { %v1924_v52 = vsel %vm1062_vm5, %v1866_v55, 0.0 }
 0x37b   : > { %1925 = vadd.xlane.f32.xlu1 %v1924_v52 }
 0x37d   : > { %v1870_v25 = vpop.permute.xlu1 %1869 }
 0x37e   : > { %v1930_v36 = vsel %vm1062_vm5, %v1870_v25, 0.0 }
 0x37f   : > { %1931 = vadd.xlane.f32.xlu1 %v1930_v36 }
 0x381   : > { %v1874_v61 = vpop.permute.xlu1 %1873 }
 0x382   : > { %v1936_v48 = vsel %vm1062_vm5, %v1874_v61, 0.0 }
 0x383   : > { %1937 = vadd.xlane.f32.xlu1 %v1936_v48  ;;  %v1136_v48 = vadd.f32 %v7830_v3, %v9417_v20 }
 0x38a   : > { %2078 = vperm.xlu0 %8268, %v9438_v41  }
 0x38e   : > { %2129 = vperm.xlu0 %8268, %v9444_v4  }
 0x392   : > { %2135 = vperm.xlu0 %8268, %v9448_v9  }
 0x394   : > { %2081 = vperm.xlu1 %8269, %v9452_v5  }
 0x396   : > { %2141 = vperm.xlu0 %8268, %v9456_v32  }
 0x398   : > { %2084 = vperm.xlu1 %8269, %v9461_v2  }
 0x39a   : > { %2147 = vperm.xlu0 %8268, %v9465_v15  }
 0x39c   : > { %2087 = vperm.xlu1 %8269, %v9470_v56  }
 0x39d   : > { %v1645_v31 = vpop.xlane.xlu0 %1644 }
 0x39e   : > { %v9533_v6 = vadd.f32 %v9434_v44, %v1645_v31 }
 0x3a0   : > { %2090 = vperm.xlu1 %8269, %v9476_v58  }
 0x3a1   : > { %v1651_v63 = vpop.xlane.xlu0 %1650 }
 0x3a2   : > { %v9543_v42 = vadd.f32 %v9434_v44, %v1651_v63 }
 0x3a4   : > { %2093 = vperm.xlu1 %8269, %v9481_v7  }
 0x3a5   : > { %v1657_v46 = vpop.xlane.xlu0 %1656 }
 0x3a6   : > { %v9551_v14 = vadd.f32 %v9434_v44, %v1657_v46 }
 0x3a8   : > { %2096 = vperm.xlu1 %8269, %v9486_v21  }
 0x3a9   : > { %v1663_v23 = vpop.xlane.xlu0 %1662 }
 0x3aa   : > { %v9561_v25 = vadd.f32 %v9434_v44, %v1663_v23 }
 0x3ac   : > { %2099 = vperm.xlu1 %8269, %v9491_v12  }
 0x3ad   : > { %v1805_v30 = vpop.xlane.xlu0 %1804 }
 0x3ae   : > { %v9572_v63 = vadd.f32 %v9441_v51, %v1805_v30  ;;  %v8654_v30 = vmov 1  }
 0x3b0   : > { %2126 = vperm.xlu1 %8269, %v9499_v19   ;;  %11883 = vst [vmem:[#allocation31_spill] sm:$0xff] %v9572_v63 }
 0x3b1   : > { %v1811_v37 = vpop.xlane.xlu0 %1810 }
 0x3b2   : > { %v1648_v27 = vpop.xlane.xlu1 %1647  ;;  %v9582_v23 = vadd.f32 %v9441_v51, %v1811_v37 }
 0x3b3   : > { %v9508_v50 = vadd.f32 %v9434_v44, %v1648_v27  ;;  %v8282_v27 = vpop.eup %8281 }
 0x3b4   : > { %2132 = vperm.xlu1 %8269, %v9505_v62   ;;  %11885 = vst [vmem:[#allocation33_spill] sm:$0xff] %v9582_v23 }
 0x3b5   : > { %2177 = vperm.xlu0 %8268, %v9508_v50   ;;  %v1817_v13 = vpop.xlane.xlu0 %1816 }
 0x3b6   : > { %v1654_v17 = vpop.xlane.xlu1 %1653 }
 0x3b7   : > { %v9517_v57 = vadd.f32 %v9434_v44, %v1654_v17  ;;  %v9588_v17 = vadd.f32 %v9441_v51, %v1817_v13 }
 0x3b8   : > { %2138 = vperm.xlu1 %8269, %v9514_v35  }
 0x3b9   : > { %2183 = vperm.xlu0 %8268, %v9517_v57   ;;  %v1823_v43 = vpop.xlane.xlu0 %1822  ;;  %11886 = vst [vmem:[#allocation34_spill] sm:$0xff] %v9588_v17 }
 0x3ba   : > { %v1660_v28 = vpop.xlane.xlu1 %1659 }
 0x3bb   : > { %v9526_v54 = vadd.f32 %v9434_v44, %v1660_v28  ;;  %v9590_v28 = vstv %s7835_s16  ;;  %s8562_s16 = sshll.u32 %s8660_s27, 4  ;;  %s8563_s16 = int_to_ptr.vmem [resolvable:$false] %s8562_s16 }
 0x3bc   : > { %2144 = vperm.xlu1 %8269, %v9523_v49   ;;  %s8564_s24 = scalar_lea.vmem %s8563_s16, 512 }
 0x3bd   : > { %2189 = vperm.xlu0 %8268, %v9526_v54   ;;  %v9530_v34 = vpop.xlane.xlu0 %1732 }
 0x3be   : > { %v1666_v29 = vpop.xlane.xlu1 %1665 }
 0x3bf   : > { %v9536_v10 = vadd.f32 %v9434_v44, %v1666_v29  ;;  %v7833_v44 = vmul.f32 -1.442695, %v1136_v48  ;;  %v8655_v48 = vmov 2  }
 0x3c0   : > { %2174 = vperm.xlu1 %8269, %v9533_v6  }
 0x3c1   : > { %2195 = vperm.xlu0 %8268, %v9536_v10   ;;  %v9540_v39 = vpop.xlane.xlu0 %1738  ;;  %8283 = vpow2.f32 %v7833_v44 }
 0x3c2   : > { %v1808_v40 = vpop.xlane.xlu1 %1807 }
 0x3c3   : > { %v9546_v26 = vadd.f32 %v9441_v51, %v1808_v40  ;;  %v9597_v40 = vadd.f32 %v9441_v51, %v1823_v43 }
 0x3c4   : > { %2180 = vperm.xlu1 %8269, %v9543_v42  }
 0x3c5   : > { %11880 = vst [vmem:[#allocation28_spill] sm:$0xff] %v9546_v26  ;;  %2225 = vperm.xlu0 %8268, %v9546_v26   ;;  %v1742_v0 = vpop.xlane.xlu0 %1741  ;;  %11888 = vst [vmem:[#allocation36_spill] sm:$0xff] %v9597_v40 }
 0x3c6   : > { %v1814_v53 = vpop.xlane.xlu1 %1813  ;;  %v9603_v13 = vadd.f32 %v9590_v28, %v1742_v0 }
 0x3c7   : > { %v9554_v55 = vadd.f32 %v9441_v51, %v1814_v53 }
 0x3c8   : > { %2186 = vperm.xlu1 %8269, %v9551_v14   ;;  %11889 = vst [vmem:[#allocation37_spill] sm:$0xff] %v9603_v13 }
 0x3c9   : > { %11881 = vst [vmem:[#allocation29_spill] sm:$0xff] %v9554_v55  ;;  %2231 = vperm.xlu0 %8268, %v9554_v55   ;;  %v9558_v52 = vpop.xlane.xlu0 %1744 }
 0x3ca   : > { %v1820_v36 = vpop.xlane.xlu1 %1819 }
 0x3cb   : > { %v9564_v61 = vadd.f32 %v9441_v51, %v1820_v36  ;;  %v8284_v47 = vpop.eup %8283 }
 0x3cc   : > { %2192 = vperm.xlu1 %8269, %v9561_v25  }
 0x3cd   : > { %11882 = vst [vmem:[#allocation30_spill] sm:$0xff] %v9564_v61  ;;  %2237 = vperm.xlu0 %8268, %v9564_v61   ;;  %v9569_v31 = vpop.xlane.xlu0 %1750 }
 0x3ce   : > { %v1826_v46 = vpop.xlane.xlu1 %1825 }
 0x3cf   : > { %v9575_v60 = vadd.f32 %v9441_v51, %v1826_v46  ;;  %v1150_v51 = vadd.f32 1.0, %v8284_v47 }
 0x3d0   : > { %2222 = vperm.xlu1 %8269, %v9572_v63  }
 0x3d1   : > { %11884 = vst [vmem:[#allocation32_spill] sm:$0xff] %v9575_v60  ;;  %2243 = vperm.xlu0 %8268, %v9575_v60   ;;  %v9579_v20 = vpop.xlane.xlu0 %1892  ;;  %8285 = vrcp.f32 %v1150_v51 }
 0x3d2   : > { %v1736_v3 = vpop.xlane.xlu1 %1735 }
 0x3d3   : > { %v9594_v37 = vadd.f32 %v9590_v28, %v1736_v3  ;;  %v8656_v3 = vmov 3  }
 0x3d4   : > { %2228 = vperm.xlu1 %8269, %v9582_v23  }
 0x3d5   : > { %8270 = vset.pattern.permute.xlu0 %v8654_v30  ;;  %v9585_v1 = vpop.xlane.xlu0 %1898  ;;  %11887 = vst [vmem:[#allocation35_spill] sm:$0xff] %v9594_v37 }
 0x3d6   : > { %6465 = vperm.xlu0 %8270, %v8282_v27   ;;  %v1748_v29 = vpop.xlane.xlu1 %1747 }
 0x3d7   : > { %v9609_v43 = vadd.f32 %v9590_v28, %v1748_v29 }
 0x3d8   : > { %2234 = vperm.xlu1 %8269, %v9588_v17  }
 0x3d9   : > { %v1902_v11 = vpop.xlane.xlu0 %1901  ;;  %11890 = vst [vmem:[#allocation38_spill] sm:$0xff] %v9609_v43 }
 0x3da   : > { %8278 = vset.pattern.permute.xlu0 %v11712_v33  ;;  %v1754_v53 = vpop.xlane.xlu1 %1753 }
 0x3db   : > { %2105 = vperm.xlu0 %8278, %v9594_v37   ;;  %v9615_v0 = vadd.f32 %v9590_v28, %v1754_v53  ;;  %v9628_v53 = vadd.f32 %v9618_v45, %v1902_v11  ;;  %v8286_v51 = vpop.eup %8285 }
 0x3dc   : > { %2240 = vperm.xlu1 %8269, %v9597_v40  }
 0x3dd   : > { %v9605_v36 = vpop.xlane.xlu0 %1904  ;;  %11891 = vst [vmem:[#allocation39_spill] sm:$0xff] %v9615_v0  ;;  %11894 = vst [vmem:[#allocation41_spill] sm:$0xff] %v9628_v53 }
 0x3de   : > { %v1896_v46 = vpop.xlane.xlu1 %1895 }
 0x3df   : > { %2111 = vperm.xlu0 %8278, %v9603_v13   ;;  %v9621_v29 = vadd.f32 %v9618_v45, %v1896_v46 }
 0x3e0   : > { %8271 = vset.pattern.permute.xlu1 %v8655_v48 }
 0x3e1   : > { %7055 = vperm.xlu1 %8271, %v8282_v27   ;;  %v9612_v44 = vpop.xlane.xlu0 %1910  ;;  %11892 = vst [vmem:[#allocation40_spill] sm:$0xff] %v9621_v29 }
 0x3e2   : > { %v1908_v47 = vpop.xlane.xlu1 %1907 }
 0x3e3   : > { %2117 = vperm.xlu0 %8278, %v9609_v43   ;;  %v11893_v43 = vmov 0   ;;  %v9634_v46 = vadd.f32 %v9618_v45, %v1908_v47 }
 0x3e5   : > { %8272 = vset.pattern.permute.xlu1 %v8656_v3  ;;  %v9623_v33 = vpop.xlane.xlu0 %1756  ;;  %11895 = vst [vmem:[#allocation42_spill] sm:$0xff] %v9634_v46 }
 0x3e6   : > { %7361 = vperm.xlu1 %8272, %v8282_v27  }
 0x3e7   : > { %2123 = vperm.xlu0 %8278, %v9615_v0   ;;  %v1914_v0 = vpop.xlane.xlu1 %1913 }
 0x3e9   : > { %v9631_v13 = vpop.xlane.xlu0 %1762 }
 0x3ea   : > { %8273 = vset.pattern.permute.xlu1 %v11893_v43 }
 0x3eb   : > { %6455 = vperm.xlu1 %8273, %v8282_v27   ;;  %2153 = vperm.xlu0 %8278, %v9621_v29   ;;  %v9638_v27 = vadd.f32 %v9618_v45, %v1914_v0  ;;  %v9701_v29 = vadd.f32 %v9618_v45, %v9585_v1  ;;  %v9721_v1 = vadd.f32 %v9618_v45, %v9612_v44 }
 0x3ed   : > { %11896 = vst [vmem:[#allocation43_spill] sm:$0xff] %v9638_v27  ;;  %v9640_v11 = vpop.xlane.xlu0 %1768  ;;  %11909 = vst [vmem:[#allocation56_spill] sm:$0xff] %v9701_v29 }
 0x3ee   : > { %11912 = vst [vmem:[#allocation59_spill] sm:$0xff] %v9721_v1 }
 0x3ef   : > { %8274 = vset.pattern.permute.xlu1 %v8654_v30  ;;  %2159 = vperm.xlu0 %8278, %v9628_v53  }
 0x3f0   : > { %6461 = vperm.xlu1 %8274, %v8286_v51  }
 0x3f1   : > { %v1775_v47 = vpop.xlane.xlu0 %1774 }
 0x3f3   : > { %2165 = vperm.xlu0 %8278, %v9634_v46  }
 0x3f4   : > { %v1760_v37 = vpop.xlane.xlu1 %1759  ;;  %8275 = vset.pattern.permute.xlu1 %v8655_v48 }
 0x3f5   : > { %7051 = vperm.xlu1 %8275, %v8286_v51   ;;  %v9644_v53 = vadd.f32 %v9590_v28, %v1760_v37 }
 0x3f7   : > { %2171 = vperm.xlu0 %8278, %v9638_v27   ;;  %11897 = vst [vmem:[#allocation44_spill] sm:$0xff] %v9644_v53  ;;  %v9654_v27 = vadd.f32 %v9590_v28, %v9530_v34 }
 0x3f8   : > { %v1766_v30 = vpop.xlane.xlu1 %1765 }
 0x3f9   : > { %8276 = vset.pattern.permute.xlu1 %v8656_v3  ;;  %v9648_v48 = vadd.f32 %v9590_v28, %v1766_v30  ;;  %11899 = vst [vmem:[#allocation46_spill] sm:$0xff] %v9654_v27  ;;  %v1917_v3 = vpop.xlane.xlu0 %1916 }
 0x3fa   : > { %7357 = vperm.xlu1 %8276, %v8286_v51   ;;  %v9756_v60 = vadd.f32 %v9618_v45, %v1917_v3 }
 0x3fb   : > { %2201 = vperm.xlu0 %8278, %v9644_v53   ;;  %11898 = vst [vmem:[#allocation45_spill] sm:$0xff] %v9648_v48 }
 0x3fc   : > { %v1772_v46 = vpop.xlane.xlu1 %1771  ;;  %11917 = vst [vmem:[#allocation64_spill] sm:$0xff] %v9756_v60 }
 0x3fd   : > { %v9657_v37 = vadd.f32 %v9590_v28, %v1772_v46  ;;  %v1923_v34 = vpop.xlane.xlu0 %1922 }
 0x3fe   : > { %8277 = vset.pattern.permute.xlu1 %v11893_v43  ;;  %v9663_v43 = vadd.f32 %v9590_v28, %v9540_v39 }
 0x3ff   : > { %6450 = vperm.xlu1 %8277, %v8286_v51   ;;  %2207 = vperm.xlu0 %8278, %v9648_v48   ;;  %11900 = vst [vmem:[#allocation47_spill] sm:$0xff] %v9657_v37  ;;  %v9672_v48 = vadd.f32 %v9590_v28, %v9558_v52 }
 0x400   : > { %v1778_v0 = vpop.xlane.xlu1 %1777  ;;  %11901 = vst [vmem:[#allocation48_spill] sm:$0xff] %v9663_v43 }
 0x401   : > { %v9666_v51 = vadd.f32 %v9590_v28, %v1778_v0  ;;  %11903 = vst [vmem:[#allocation50_spill] sm:$0xff] %v9672_v48  ;;  %v9681_v0 = vadd.f32 %v9590_v28, %v9569_v31  ;;  %v1929_v53 = vpop.xlane.xlu0 %1928 }
 0x403   : > { %2102 = vperm.xlu1 %8277, %v9654_v27   ;;  %2213 = vperm.xlu0 %8278, %v9657_v37   ;;  %11902 = vst [vmem:[#allocation49_spill] sm:$0xff] %v9666_v51  ;;  %11905 = vst [vmem:[#allocation52_spill] sm:$0xff] %v9681_v0 }
 0x404   : > { %v1920_v30 = vpop.xlane.xlu1 %1919 }
 0x405   : > { %v9675_v37 = vadd.f32 %v9618_v45, %v1920_v30  ;;  %v9690_v30 = vadd.f32 %v9618_v45, %v9579_v20  ;;  %v1935_v31 = vpop.xlane.xlu0 %1934 }
 0x407   : > { %2108 = vperm.xlu1 %8277, %v9663_v43   ;;  %2219 = vperm.xlu0 %8278, %v9666_v51   ;;  %11904 = vst [vmem:[#allocation51_spill] sm:$0xff] %v9675_v37  ;;  %11907 = vst [vmem:[#allocation54_spill] sm:$0xff] %v9690_v30 }
 0x408   : > { %v1926_v46 = vpop.xlane.xlu1 %1925 }
 0x409   : > { %v9684_v51 = vadd.f32 %v9618_v45, %v1926_v46  ;;  %v9708_v20 = vpop.permute.xlu0 %2078 }
 0x40b   : > { %2114 = vperm.xlu1 %8277, %v9672_v48   ;;  %2249 = vperm.xlu0 %8278, %v9675_v37   ;;  %11906 = vst [vmem:[#allocation53_spill] sm:$0xff] %v9684_v51 }
 0x40c   : > { %v1932_v39 = vpop.xlane.xlu1 %1931 }
 0x40d   : > { %v9693_v37 = vadd.f32 %v9618_v45, %v1932_v39 }
 0x40f   : > { %2120 = vperm.xlu1 %8277, %v9681_v0   ;;  %2255 = vperm.xlu0 %8278, %v9684_v51   ;;  %11908 = vst [vmem:[#allocation55_spill] sm:$0xff] %v9693_v37 }
 0x410   : > { %v1938_v52 = vpop.xlane.xlu1 %1937 }
 0x411   : > { %v9704_v51 = vadd.f32 %v9618_v45, %v1938_v52  ;;  %v2130_v52 = vpop.permute.xlu0 %2129 }
 0x413   : > { %2150 = vperm.xlu1 %8277, %v9690_v30   ;;  %2261 = vperm.xlu0 %8278, %v9693_v37   ;;  %11910 = vst [vmem:[#allocation57_spill] sm:$0xff] %v9704_v51  ;;  %v9714_v37 = vadd.f32 %v9618_v45, %v9605_v36 }
 0x414   : > { %v9697_v46 = vpop.permute.xlu1 %2081 }
 0x415   : > { %11911 = vst [vmem:[#allocation58_spill] sm:$0xff] %v9714_v37  ;;  %v2136_v36 = vpop.permute.xlu0 %2135 }
 0x417   : > { %2156 = vperm.xlu1 %8277, %v9701_v29   ;;  %2267 = vperm.xlu0 %8278, %v9704_v51   ;;  %v9728_v29 = vadd.f32 %v9590_v28, %v9623_v33 }
 0x418   : > { %v9710_v39 = vpop.permute.xlu1 %2084 }
 0x419   : > { %11913 = vst [vmem:[#allocation60_spill] sm:$0xff] %v9728_v29  ;;  %v2142_v48 = vpop.permute.xlu0 %2141 }
 0x41b   : > { %2162 = vperm.xlu1 %8277, %v9714_v37   ;;  %v9735_v37 = vadd.f32 %v9590_v28, %v9631_v13  ;;  %v9753_v13 = vsub.s32 %v8954_v18, %v8957_v22 }
 0x41c   : > { %v9717_v30 = vpop.permute.xlu1 %2087 }
 0x41d   : > { %11914 = vst [vmem:[#allocation61_spill] sm:$0xff] %v9735_v37 }
 0x41f   : > { %2168 = vperm.xlu1 %8277, %v9721_v1   ;;  %v9742_v1 = vadd.f32 %v9590_v28, %v9640_v11 }
 0x420   : > { %v9724_v51 = vpop.permute.xlu1 %2090 }
 0x421   : > { %11915 = vst [vmem:[#allocation62_spill] sm:$0xff] %v9742_v1 }
 0x423   : > { %2198 = vperm.xlu1 %8277, %v9728_v29   ;;  %v9748_v29 = vadd.f32 %v9590_v28, %v1775_v47  ;;  %v9762_v47 = vadd.f32 %v9618_v45, %v1923_v34 }
 0x424   : > { %v9731_v0 = vpop.permute.xlu1 %2093 }
 0x425   : > { %11916 = vst [vmem:[#allocation63_spill] sm:$0xff] %v9748_v29  ;;  %11918 = vst [vmem:[#allocation65_spill] sm:$0xff] %v9762_v47 }
 0x427   : > { %2204 = vperm.xlu1 %8277, %v9735_v37   ;;  %v2148_v37 = vpop.permute.xlu0 %2147 }
 0x428   : > { %v9738_v44 = vpop.permute.xlu1 %2096 }
 0x42b   : > { %2210 = vperm.xlu1 %8277, %v9742_v1   ;;  %v2340_v1 = vrot.slane %v2130_v52, %v9753_v13  ;;  %v9770_v52 = vadd.f32 %v9618_v45, %v1929_v53 }
 0x42c   : > { %v9745_v33 = vpop.permute.xlu1 %2099 }
 0x42d   : > { %11919 = vst [vmem:[#allocation66_spill] sm:$0xff] %v9770_v52 }
 0x42f   : > { %2216 = vperm.xlu1 %8277, %v9748_v29  }
 0x430   : > { %v2127_v43 = vpop.permute.xlu1 %2126 }
 0x431   : > { %v2336_v11 = vrot.slane %v2127_v43, %v9753_v13  ;;  %v2348_v43 = vrot.slane %v2136_v36, %v9753_v13  ;;  %v9778_v36 = vadd.f32 %v9618_v45, %v1935_v31 }
 0x433   : > { %2246 = vperm.xlu1 %8277, %v9756_v60   ;;  %v2546_v29 = vsel %vm2525_vm6, %v2340_v1, %v2336_v11  ;;  %11920 = vst [vmem:[#allocation67_spill] sm:$0xff] %v9778_v36  ;;  %v2364_v11 = vrot.slane %v2148_v37, %v9753_v13 }
 0x434   : > { %v2133_v27 = vpop.permute.xlu1 %2132  ;;  %v2178_v28 = vpop.permute.xlu0 %2177 }
 0x435   : > { %v2344_v18 = vrot.slane %v2133_v27, %v9753_v13  ;;  %v2404_v37 = vrot.slane %v2178_v28, %v9753_v13 }
 0x437   : > { %v2547_v3 = vsel %vm2527_vm7, %v2344_v18, %v2546_v29  ;;  %2252 = vperm.xlu1 %8277, %v9762_v47   ;;  %v2356_v18 = vrot.slane %v2142_v48, %v9753_v13 }
 0x438   : > { %v2139_v60 = vpop.permute.xlu1 %2138  ;;  %v2184_v61 = vpop.permute.xlu0 %2183  ;;  %v2548_v27 = vsel %vm2529_vm8, %v2348_v43, %v2547_v3 }
 0x439   : > { %v2352_v34 = vrot.slane %v2139_v60, %v9753_v13 }
 0x43b   : > { %v2549_v40 = vsel %vm2531_vm9, %v2352_v34, %v2548_v27  ;;  %2258 = vperm.xlu1 %8277, %v9770_v52  }
 0x43c   : > { %v2145_v29 = vpop.permute.xlu1 %2144  ;;  %v2190_v1 = vpop.permute.xlu0 %2189  ;;  %v2550_v60 = vsel %vm2533_vm10, %v2356_v18, %v2549_v40 }
 0x43d   : > { %v2360_v53 = vrot.slane %v2145_v29, %v9753_v13  ;;  %v2420_v28 = vrot.slane %v2190_v1, %v9753_v13 }
 0x43f   : > { %2264 = vperm.xlu1 %8277, %v9778_v36   ;;  %v2551_v3 = vsel %vm2535_vm11, %v2360_v53, %v2550_v60  ;;  %v2412_v60 = vrot.slane %v2184_v61, %v9753_v13 }
 0x440   : > { %v2175_v43 = vpop.permute.xlu1 %2174  ;;  %v2196_v48 = vpop.permute.xlu0 %2195  ;;  %v2552_v34 = vsel %vm2537_vm12, %v2364_v11, %v2551_v3 }
 0x441   : > { %v2603_v45 = vsel %vm2596_vm13, %v2552_v34, -inf  ;;  %v2400_v31 = vrot.slane %v2175_v43, %v9753_v13  ;;  %v2428_v52 = vrot.slane %v2196_v48, %v9753_v13 }
 0x442   : > { %2604 = vmax.xlane.f32.xlu0 %v2603_v45 }
 0x443   : > { %v2560_v29 = vsel %vm2525_vm6, %v2404_v37, %v2400_v31 }
 0x444   : > { %v2181_v27 = vpop.permute.xlu1 %2180  ;;  %v2226_v18 = vpop.permute.xlu0 %2225 }
 0x445   : > { %v2408_v40 = vrot.slane %v2181_v27, %v9753_v13  ;;  %v2468_v1 = vrot.slane %v2226_v18, %v9753_v13 }
 0x447   : > { %v2561_v53 = vsel %vm2527_vm7, %v2408_v40, %v2560_v29 }
 0x448   : > { %v2187_v36 = vpop.permute.xlu1 %2186  ;;  %v2562_v3 = vsel %vm2529_vm8, %v2412_v60, %v2561_v53  ;;  %v2232_v34 = vpop.permute.xlu0 %2231 }
 0x449   : > { %v2416_v11 = vrot.slane %v2187_v36, %v9753_v13 }
 0x44b   : > { %v2563_v43 = vsel %vm2531_vm9, %v2416_v11, %v2562_v3  ;;  %v2276_v11 = vrot.slane %v9697_v46, %v9753_v13  ;;  %v2280_v3 = vrot.slane %v9710_v39, %v9753_v13  ;;  %v2476_v46 = vrot.slane %v2232_v34, %v9753_v13 }
 0x44c   : > { %v2193_v45 = vpop.permute.xlu1 %2192  ;;  %v2564_v31 = vsel %vm2533_vm10, %v2420_v28, %v2563_v43  ;;  %v2238_v36 = vpop.permute.xlu0 %2237  ;;  %v2284_v28 = vrot.slane %v9717_v30, %v9753_v13  ;;  %v2292_v39 = vrot.slane %v9731_v0, %v9753_v13  ;;  %v2296_v30 = vrot.slane %v9738_v44, %v9753_v13 }
 0x44d   : > { %v2424_v27 = vrot.slane %v2193_v45, %v9753_v13  ;;  %v2484_v0 = vrot.slane %v2238_v36, %v9753_v13 }
 0x44f   : > { %v2565_v37 = vsel %vm2535_vm11, %v2424_v27, %v2564_v31  ;;  %v2288_v27 = vrot.slane %v9724_v51, %v9753_v13  ;;  %v2300_v51 = vrot.slane %v9745_v33, %v9753_v13 }
 0x450   : > { %v2223_v61 = vpop.permute.xlu1 %2222  ;;  %v2566_v40 = vsel %vm2537_vm12, %v2428_v52, %v2565_v37  ;;  %v2272_v52 = vrot.slane %v9708_v20, %v9753_v13  ;;  %v2244_v45 = vpop.permute.xlu0 %2243 }
 0x451   : > { %v2609_v29 = vsel %vm2596_vm13, %v2566_v40, -inf  ;;  %v2464_v53 = vrot.slane %v2223_v61, %v9753_v13  ;;  %v2492_v44 = vrot.slane %v2244_v45, %v9753_v13 }
 0x452   : > { %2610 = vmax.xlane.f32.xlu0 %v2609_v29  ;;  %v2526_v37 = vsel %vm2525_vm6, %v2276_v11, %v2272_v52 }
 0x453   : > { %v2574_v43 = vsel %vm2525_vm6, %v2468_v1, %v2464_v53  ;;  %v2528_v20 = vsel %vm2527_vm7, %v2280_v3, %v2526_v37 }
 0x454   : > { %v2229_v60 = vpop.permute.xlu1 %2228  ;;  %v2530_v29 = vsel %vm2529_vm8, %v2284_v28, %v2528_v20 }
 0x455   : > { %v2472_v48 = vrot.slane %v2229_v60, %v9753_v13  ;;  %v2532_v53 = vsel %vm2531_vm9, %v2288_v27, %v2530_v29  ;;  %v6466_v11 = vpop.permute.xlu0 %6465 }
 0x456   : > { %v2534_v60 = vsel %vm2533_vm10, %v2292_v39, %v2532_v53 }
 0x457   : > { %v2575_v18 = vsel %vm2527_vm7, %v2472_v48, %v2574_v43  ;;  %v2536_v43 = vsel %vm2535_vm11, %v2296_v30, %v2534_v60 }
 0x458   : > { %v2235_v31 = vpop.permute.xlu1 %2234  ;;  %v2576_v40 = vsel %vm2529_vm8, %v2476_v46, %v2575_v18  ;;  %v2538_v52 = vsel %vm2537_vm12, %v2300_v51, %v2536_v43 }
 0x459   : > { %v2480_v61 = vrot.slane %v2235_v31, %v9753_v13  ;;  %v2597_v27 = vsel %vm2596_vm13, %v2538_v52, -inf }
 0x45a   : > { %v2106_v46 = vpop.permute.xlu0 %2105 }
 0x45b   : > { %v2577_v34 = vsel %vm2531_vm9, %v2480_v61, %v2576_v40  ;;  %v6469_v40 = vmul.f32 %v9170_v24, %v6466_v11  ;;  %v2308_v11 = vrot.slane %v2106_v46, %v9753_v13  ;;  %v11939_v24 = vld [vmem:[#allocation54_spill] sm:$0xff] }
 0x45c   : > { %v2241_v1 = vpop.permute.xlu1 %2240  ;;  %v2578_v3 = vsel %vm2533_vm10, %v2484_v0, %v2577_v34 }
 0x45d   : > { %v2488_v48 = vrot.slane %v2241_v1, %v9753_v13 }
 0x45e   : > { %v2112_v31 = vpop.permute.xlu0 %2111 }
 0x45f   : > { %v2579_v33 = vsel %vm2535_vm11, %v2488_v48, %v2578_v3 }
 0x460   : > { %v9840_v28 = vpop.permute.xlu1 %7055  ;;  %v2580_v36 = vsel %vm2537_vm12, %v2492_v44, %v2579_v33 }
 0x461   : > { %11921 = vst [vmem:[#allocation68_spill] sm:$0xff] %v9840_v28  ;;  %v2615_v18 = vsel %vm2596_vm13, %v2580_v36, -inf  ;;  %v11941_v28 = vld [vmem:[#allocation56_spill] sm:$0xff] }
 0x462   : > { %2616 = vmax.xlane.f32.xlu0 %v2615_v18  ;;  %v2118_v39 = vpop.permute.xlu0 %2117  ;;  %v2316_v18 = vrot.slane %v2112_v31, %v9753_v13 }
 0x463   : > { %2598 = vmax.xlane.f32.xlu1 %v2597_v27 }
 0x465   : > { %v9845_v45 = vpop.permute.xlu1 %7361 }
 0x466   : > { %11922 = vst [vmem:[#allocation69_spill] sm:$0xff] %v9845_v45  ;;  %v2124_v30 = vpop.permute.xlu0 %2123  ;;  %v11938_v45 = vld [vmem:[#allocation38_spill] sm:$0xff] }
 0x467   : > { %v2332_v31 = vrot.slane %v2124_v30, %v9753_v13 }
 0x46a   : > { %v9847_v37 = vpop.permute.xlu1 %6455  ;;  %v2154_v34 = vpop.permute.xlu0 %2153 }
 0x46b   : > { %11923 = vst [vmem:[#allocation70_spill] sm:$0xff] %v9847_v37 }
 0x46e   : > { %v2160_v0 = vpop.permute.xlu0 %2159 }
 0x46f   : > { %v6462_v61 = vpop.permute.xlu1 %6461 }
 0x470   : > { %v6468_v51 = vmul.f32 %v6462_v61, %v9177_v16  ;;  %v11937_v16 = vld [vmem:[#allocation52_spill] sm:$0xff] }
 0x472   : > { %v2166_v48 = vpop.permute.xlu0 %2165 }
 0x474   : > { %v9849_v20 = vpop.permute.xlu1 %7051 }
 0x475   : > { %11924 = vst [vmem:[#allocation71_spill] sm:$0xff] %v9849_v20  ;;  %v11936_v20 = vld [vmem:[#allocation37_spill] sm:$0xff] }
 0x476   : > { %v2172_v27 = vpop.permute.xlu0 %2171 }
 0x478   : > { %6689 = vrot.lane.b32.xlu0 %v6469_v40, %s8657_s15 }
 0x479   : > { %v9852_v29 = vpop.permute.xlu1 %7357 }
 0x47a   : > { %11925 = vst [vmem:[#allocation72_spill] sm:$0xff] %v9852_v29  ;;  %v2202_v37 = vpop.permute.xlu0 %2201 }
 0x47c   : > { %6542 = vrot.lane.b32.xlu0 %v6468_v51, %s8657_s15 }
 0x47e   : > { %v9855_v53 = vpop.permute.xlu1 %6450 }
 0x47f   : > { %11926 = vst [vmem:[#allocation73_spill] sm:$0xff] %v9855_v53  ;;  %v11934_v53 = vld [vmem:[#allocation35_spill] sm:$0xff] }
 0x482   : > { %v2103_v1 = vpop.permute.xlu1 %2102 }
 0x483   : > { %v2304_v44 = vrot.slane %v2103_v1, %v9753_v13 }
 0x485   : > { %v2539_v33 = vsel %vm2525_vm6, %v2308_v11, %v2304_v44 }
 0x486   : > { %v2109_v60 = vpop.permute.xlu1 %2108 }
 0x487   : > { %v2312_v3 = vrot.slane %v2109_v60, %v9753_v13  ;;  %v2324_v60 = vrot.slane %v2118_v39, %v9753_v13  ;;  %v2208_v39 = vpop.permute.xlu0 %2207 }
 0x489   : > { %v2540_v52 = vsel %vm2527_vm7, %v2312_v3, %v2539_v33 }
 0x48a   : > { %v2115_v43 = vpop.permute.xlu1 %2114  ;;  %v2541_v40 = vsel %vm2529_vm8, %v2316_v18, %v2540_v52 }
 0x48b   : > { %v2320_v36 = vrot.slane %v2115_v43, %v9753_v13  ;;  %v2372_v43 = vrot.slane %v2154_v34, %v9753_v13 }
 0x48d   : > { %v2542_v51 = vsel %vm2531_vm9, %v2320_v36, %v2541_v40  ;;  %v2380_v40 = vrot.slane %v2160_v0, %v9753_v13 }
 0x48e   : > { %v2121_v61 = vpop.permute.xlu1 %2120  ;;  %v2543_v44 = vsel %vm2533_vm10, %v2324_v60, %v2542_v51 }
 0x48f   : > { %v2328_v1 = vrot.slane %v2121_v61, %v9753_v13 }
 0x491   : > { %v2544_v11 = vsel %vm2535_vm11, %v2328_v1, %v2543_v44 }
 0x492   : > { %v2151_v46 = vpop.permute.xlu1 %2150  ;;  %v2545_v36 = vsel %vm2537_vm12, %v2332_v31, %v2544_v11  ;;  %v2214_v11 = vpop.permute.xlu0 %2213  ;;  %v2396_v31 = vrot.slane %v2172_v27, %v9753_v13 }
 0x493   : > { %v2368_v3 = vrot.slane %v2151_v46, %v9753_v13  ;;  %v2600_v60 = vsel %vm2596_vm13, %v2545_v36, -inf  ;;  %v2388_v46 = vrot.slane %v2166_v48, %v9753_v13  ;;  %v2436_v48 = vrot.slane %v2202_v37, %v9753_v13 }
 0x495   : > { %v2553_v18 = vsel %vm2525_vm6, %v2372_v43, %v2368_v3 }
 0x496   : > { %v2157_v33 = vpop.permute.xlu1 %2156 }
 0x497   : > { %v2376_v52 = vrot.slane %v2157_v33, %v9753_v13 }
 0x499   : > { %v2554_v61 = vsel %vm2527_vm7, %v2376_v52, %v2553_v18 }
 0x49a   : > { %v2163_v51 = vpop.permute.xlu1 %2162  ;;  %v2555_v30 = vsel %vm2529_vm8, %v2380_v40, %v2554_v61  ;;  %v2220_v61 = vpop.permute.xlu0 %2219 }
 0x49b   : > { %v2384_v1 = vrot.slane %v2163_v51, %v9753_v13  ;;  %2601 = vmax.xlane.f32.xlu0 %v2600_v60 }
 0x49d   : > { %v2556_v34 = vsel %vm2531_vm9, %v2384_v1, %v2555_v30  ;;  %v2444_v1 = vrot.slane %v2208_v39, %v9753_v13 }
 0x49e   : > { %v2169_v44 = vpop.permute.xlu1 %2168  ;;  %v2557_v0 = vsel %vm2533_vm10, %v2388_v46, %v2556_v34  ;;  %v2250_v34 = vpop.permute.xlu0 %2249 }
 0x49f   : > { %v2392_v3 = vrot.slane %v2169_v44, %v9753_v13 }
 0x4a1   : > { %v2558_v43 = vsel %vm2535_vm11, %v2392_v3, %v2557_v0 }
 0x4a2   : > { %v2199_v33 = vpop.permute.xlu1 %2198  ;;  %v2559_v52 = vsel %vm2537_vm12, %v2396_v31, %v2558_v43  ;;  %v2452_v31 = vrot.slane %v2214_v11, %v9753_v13  ;;  %v2460_v43 = vrot.slane %v2220_v61, %v9753_v13  ;;  %v2500_v11 = vrot.slane %v2250_v34, %v9753_v13 }
 0x4a3   : > { %v2606_v36 = vsel %vm2596_vm13, %v2559_v52, -inf  ;;  %v2432_v18 = vrot.slane %v2199_v33, %v9753_v13  ;;  %v2256_v52 = vpop.permute.xlu0 %2255 }
 0x4a4   : > { %2607 = vmax.xlane.f32.xlu1 %v2606_v36 }
 0x4a5   : > { %v2567_v27 = vsel %vm2525_vm6, %v2436_v48, %v2432_v18 }
 0x4a6   : > { %v2205_v40 = vpop.permute.xlu1 %2204 }
 0x4a7   : > { %v2440_v51 = vrot.slane %v2205_v40, %v9753_v13 }
 0x4a9   : > { %v2568_v60 = vsel %vm2527_vm7, %v2440_v51, %v2567_v27  ;;  %v2262_v27 = vpop.permute.xlu0 %2261 }
 0x4aa   : > { %v2211_v30 = vpop.permute.xlu1 %2210  ;;  %v2569_v44 = vsel %vm2529_vm8, %v2444_v1, %v2568_v60  ;;  %v2516_v34 = vrot.slane %v2262_v27, %v9753_v13 }
 0x4ab   : > { %v2448_v46 = vrot.slane %v2211_v30, %v9753_v13  ;;  %v2508_v30 = vrot.slane %v2256_v52, %v9753_v13 }
 0x4ad   : > { %v2570_v3 = vsel %vm2531_vm9, %v2448_v46, %v2569_v44 }
 0x4ae   : > { %v2217_v37 = vpop.permute.xlu1 %2216  ;;  %v2571_v33 = vsel %vm2533_vm10, %v2452_v31, %v2570_v3  ;;  %v2268_v31 = vpop.permute.xlu0 %2267 }
 0x4af   : > { %v2456_v0 = vrot.slane %v2217_v37, %v9753_v13 }
 0x4b1   : > { %v2572_v39 = vsel %vm2535_vm11, %v2456_v0, %v2571_v33  ;;  %v2524_v33 = vrot.slane %v2268_v31, %v9753_v13 }
 0x4b2   : > { %v2247_v36 = vpop.permute.xlu1 %2246  ;;  %v2573_v18 = vsel %vm2537_vm12, %v2460_v43, %v2572_v39 }
 0x4b3   : > { %v2612_v48 = vsel %vm2596_vm13, %v2573_v18, -inf  ;;  %v2496_v40 = vrot.slane %v2247_v36, %v9753_v13 }
 0x4b4   : > { %2613 = vmax.xlane.f32.xlu1 %v2612_v48 }
 0x4b5   : > { %v2581_v61 = vsel %vm2525_vm6, %v2500_v11, %v2496_v40  ;;  %v9926_v11 = vsub.s32 2, %v8957_v22 }
 0x4b6   : > { %v2253_v51 = vpop.permute.xlu1 %2252 }
 0x4b7   : > { %v2504_v60 = vrot.slane %v2253_v51, %v9753_v13  ;;  %v9929_v51 = vsub.s32 4, %v8957_v22 }
 0x4b9   : > { %v2582_v1 = vsel %vm2527_vm7, %v2504_v60, %v2581_v61 }
 0x4ba   : > { %v2259_v46 = vpop.permute.xlu1 %2258  ;;  %v2583_v3 = vsel %vm2529_vm8, %v2508_v30, %v2582_v1 }
 0x4bb   : > { %v2512_v44 = vrot.slane %v2259_v46, %v9753_v13 }
 0x4bd   : > { %v2584_v37 = vsel %vm2531_vm9, %v2512_v44, %v2583_v3  ;;  %v9938_v44 = vsub.s32 6, %v8957_v22  ;;  %v9941_v3 = vsub.s32 3, %v8957_v22 }
 0x4be   : > { %v2265_v0 = vpop.permute.xlu1 %2264  ;;  %v2585_v39 = vsel %vm2533_vm10, %v2516_v34, %v2584_v37 }
 0x4bf   : > { %v2520_v43 = vrot.slane %v2265_v0, %v9753_v13 }
 0x4c1   : > { %v2586_v36 = vsel %vm2535_vm11, %v2520_v43, %v2585_v39 }
 0x4c2   : > { %v2587_v52 = vsel %vm2537_vm12, %v2524_v33, %v2586_v36  ;;  %v9954_v33 = vsub.s32 5, %v8957_v22 }
 0x4c3   : > { %v2618_v18 = vsel %vm2596_vm13, %v2587_v52, -inf }
 0x4c4   : > { %2619 = vmax.xlane.f32.xlu1 %v2618_v18 }
 0x4cf   : > { %v9921_v48 = vpop.xlane.xlu0 %2604 }
 0x4d0   : > { %v2696_v18 = vrot.slane %v9921_v48, %v8985_v59 }
 0x4df   : > { %v9923_v40 = vpop.xlane.xlu0 %2610 }
 0x4ef   : > { %v9931_v27 = vpop.xlane.xlu0 %2616 }
 0x4f0   : > { %v2599_v60 = vpop.xlane.xlu1 %2598 }
 0x4f1   : > { %v2640_v61 = vrot.slane %v2599_v60, %v9926_v11  ;;  %v2632_v1 = vrot.slane %v2599_v60, %v8985_v59  ;;  %v2648_v30 = vrot.slane %v2599_v60, %v9929_v51  ;;  %v2636_v46 = vrot.slane %v2599_v60, %v9014_v8 }
 0x4f2   : > { %v2656_v0 = vrot.slane %v2599_v60, %v9938_v44  ;;  %v2644_v43 = vrot.slane %v2599_v60, %v9941_v3 }
 0x4f3   : > { %v9943_v31 = vpop.permute.xlu0 %6689  ;;  %vm2951_vm14 = vcmp.eq.f32.partialorder %v9461_v2, %v2640_v61  ;;  %vm2949_vm15 = vcmp.eq.f32.partialorder %v9438_v41, %v2632_v1  ;;  %vm2953_vm1 = vcmp.eq.f32.partialorder %v9476_v58, %v2648_v30  ;;  %vm2950_vm2 = vcmp.eq.f32.partialorder %v9452_v5, %v2636_v46 }
 0x4f4   : > { %11927 = vst [vmem:[#allocation74_spill] sm:$0xff] %v9943_v31  ;;  %v3018_v37 = vsel %vm2951_vm14, %v9337_v38, 8  ;;  %v3016_v34 = vsel %vm2949_vm15, %v9337_v38, 8  ;;  %v3020_v36 = vsel %vm2953_vm1, %v9337_v38, 8  ;;  %v3017_v52 = vsel %vm2950_vm2, %v9337_v38, 8  ;;  %v11935_v31 = vld [vmem:[#allocation50_spill] sm:$0xff] }
 0x4f5   : > { %3087 = vperm.xlu0 %8278, %v3018_v37   ;;  %3081 = vperm.xlu1 %8277, %v3016_v34   ;;  %vm2955_vm3 = vcmp.eq.f32.partialorder %v9486_v21, %v2656_v0  ;;  %vm2952_vm4 = vcmp.eq.f32.partialorder %v9470_v56, %v2644_v43  ;;  %v2652_v61 = vrot.slane %v2599_v60, %v9954_v33  ;;  %v11928_v1 = vmov 0.0  }
 0x4f6   : > { %v9965_v30 = vsub.s32 7, %v8957_v22  ;;  %v3022_v46 = vsel %vm2955_vm3, %v9337_v38, 8  ;;  %v3019_v37 = vsel %vm2952_vm4, %v9337_v38, 8  ;;  %v2704_v34 = vrot.slane %v9921_v48, %v9926_v11 }
 0x4f7   : > { %v6543_v39 = vpop.permute.xlu0 %6542  ;;  %vm2954_vm5 = vcmp.eq.f32.partialorder %v9481_v7, %v2652_v61  ;;  %vm2965_vm14 = vcmp.eq.f32.partialorder %v9499_v19, %v2696_v18  ;;  %v2708_v18 = vrot.slane %v9921_v48, %v9941_v3  ;;  %v2720_v61 = vrot.slane %v9921_v48, %v9938_v44 }
 0x4f8   : > { %7986 = vmatpush3.msra.mxu1 %v6543_v39  ;;  %v2660_v0 = vrot.slane %v2599_v60, %v9965_v30  ;;  %v3021_v43 = vsel %vm2954_vm5, %v9337_v38, 8  ;;  %v3032_v22 = vsel %vm2965_vm14, %v9337_v38, 8  ;;  %v2700_v39 = vrot.slane %v9921_v48, %v9014_v8 }
 0x4f9   : > { %3093 = vperm.xlu0 %8278, %v3020_v36   ;;  %3084 = vperm.xlu1 %8277, %v3017_v52   ;;  %vm2967_vm1 = vcmp.eq.f32.partialorder %v9505_v62, %v2704_v34  ;;  %v2712_v36 = vrot.slane %v9921_v48, %v9929_v51  ;;  %v2716_v34 = vrot.slane %v9921_v48, %v9954_v33 }
 0x4fa   : > { %7990 = vmatprep.subr.mxu1 %v11928_v1  ;;  %vm2956_vm15 = vcmp.eq.f32.partialorder %v9491_v12, %v2660_v0  ;;  %v3034_v60 = vsel %vm2967_vm1, %v9337_v38, 8  ;;  %vm2966_vm2 = vcmp.eq.f32.partialorder %v9444_v4, %v2700_v39  ;;  %vm2968_vm4 = vcmp.eq.f32.partialorder %v9448_v9, %v2708_v18 }
 0x4fb   : > { %v3023_v52 = vsel %vm2956_vm15, %v9337_v38, 8  ;;  %vm2969_vm3 = vcmp.eq.f32.partialorder %v9514_v35, %v2712_v36  ;;  %vm2971_vm5 = vcmp.eq.f32.partialorder %v9523_v49, %v2720_v61  ;;  %v2760_v0 = vrot.slane %v9923_v40, %v8985_v59 }
 0x4fc   : > { %v2724_v39 = vrot.slane %v9921_v48, %v9965_v30  ;;  %vm2970_vm14 = vcmp.eq.f32.partialorder %v9456_v32, %v2716_v34  ;;  %v2768_v36 = vrot.slane %v9923_v40, %v9926_v11  ;;  %v2764_v48 = vrot.slane %v9923_v40, %v9014_v8 }
 0x4fd   : > { %3099 = vperm.xlu0 %8278, %v3022_v46   ;;  %3090 = vperm.xlu1 %8277, %v3019_v37   ;;  %v3033_v46 = vsel %vm2966_vm2, %v9337_v38, 8  ;;  %v3036_v37 = vsel %vm2969_vm3, %v9337_v38, 8  ;;  %vm2981_vm15 = vcmp.eq.f32.partialorder %v9533_v6, %v2760_v0  ;;  %v2776_v18 = vrot.slane %v9923_v40, %v9929_v51 }
 0x4fe   : > { %vm2972_vm1 = vcmp.eq.f32.partialorder %v9465_v15, %v2724_v39  ;;  %vm2983_vm2 = vcmp.eq.f32.partialorder %v9543_v42, %v2768_v36  ;;  %vm2982_vm3 = vcmp.eq.f32.partialorder %v9508_v50, %v2764_v48  ;;  %v2784_v34 = vrot.slane %v9923_v40, %v9938_v44 }
 0x4ff   : > { %v3039_v61 = vsel %vm2972_vm1, %v9337_v38, 8  ;;  %v3049_v0 = vsel %vm2982_vm3, %v9337_v38, 8  ;;  %v2824_v39 = vrot.slane %v9931_v27, %v8985_v59  ;;  %v2832_v48 = vrot.slane %v9931_v27, %v9926_v11 }
 0x501   : > { %3096 = vperm.xlu1 %8277, %v3021_v43   ;;  %3129 = vperm.xlu0 %8278, %v3032_v22   ;;  %v3035_v43 = vsel %vm2968_vm4, %v9337_v38, 8  ;;  %v3038_v22 = vsel %vm2971_vm5, %v9337_v38, 8  ;;  %vm2985_vm4 = vcmp.eq.f32.partialorder %v9551_v14, %v2776_v18  ;;  %vm2997_vm1 = vcmp.eq.f32.partialorder %v9572_v63, %v2824_v39 }
 0x502   : > { %vm2999_vm3 = vcmp.eq.f32.partialorder %v9582_v23, %v2832_v48 }
 0x505   : > { %3102 = vperm.xlu1 %8277, %v3023_v52   ;;  %3135 = vperm.xlu0 %8278, %v3034_v60   ;;  %v3037_v52 = vsel %vm2970_vm14, %v9337_v38, 8  ;;  %v3048_v60 = vsel %vm2981_vm15, %v9337_v38, 8  ;;  %vm2987_vm14 = vcmp.eq.f32.partialorder %v9561_v25, %v2784_v34  ;;  %v3066_v34 = vsel %vm2999_vm3, %v9337_v38, 8 }
 0x509   : > { %3132 = vperm.xlu1 %8277, %v3033_v46   ;;  %3141 = vperm.xlu0 %8278, %v3036_v37   ;;  %v3050_v46 = vsel %vm2983_vm2, %v9337_v38, 8  ;;  %v2772_v37 = vrot.slane %v9923_v40, %v9941_v3 }
 0x50b   : > { %vm2984_vm5 = vcmp.eq.f32.partialorder %v9517_v57, %v2772_v37 }
 0x50c   : > { %v3051_v36 = vsel %vm2984_vm5, %v9337_v38, 8 }
 0x50d   : > { %3138 = vperm.xlu1 %8277, %v3035_v43   ;;  %3147 = vperm.xlu0 %8278, %v3038_v22   ;;  %v3052_v43 = vsel %vm2985_vm4, %v9337_v38, 8  ;;  %v2780_v22 = vrot.slane %v9923_v40, %v9954_v33 }
 0x50f   : > { %vm2986_vm15 = vcmp.eq.f32.partialorder %v9526_v54, %v2780_v22 }
 0x510   : > { %v3053_v18 = vsel %vm2986_vm15, %v9337_v38, 8 }
 0x511   : > { %3144 = vperm.xlu1 %8277, %v3037_v52   ;;  %3177 = vperm.xlu0 %8278, %v3048_v60   ;;  %v3054_v52 = vsel %vm2987_vm14, %v9337_v38, 8  ;;  %v2788_v60 = vrot.slane %v9923_v40, %v9965_v30  ;;  %v2840_v40 = vrot.slane %v9931_v27, %v9929_v51 }
 0x513   : > { %vm2988_vm2 = vcmp.eq.f32.partialorder %v9536_v10, %v2788_v60  ;;  %vm3001_vm5 = vcmp.eq.f32.partialorder %v9588_v17, %v2840_v40  ;;  %v11929_v60 = vld [vmem:[#allocation36_spill] sm:$0xff]  ;;  %v11930_v40 = vld [vmem:[#allocation30_spill] sm:$0xff] }
 0x514   : > { %v3055_v37 = vsel %vm2988_vm2, %v9337_v38, 8 }
 0x515   : > { %3150 = vperm.xlu1 %8277, %v3039_v61   ;;  %3183 = vperm.xlu0 %8278, %v3050_v46   ;;  %v3064_v61 = vsel %vm2997_vm1, %v9337_v38, 8  ;;  %v2828_v46 = vrot.slane %v9931_v27, %v9014_v8 }
 0x517   : > { %vm2998_vm4 = vcmp.eq.f32.partialorder %v9546_v26, %v2828_v46  ;;  %v2852_v46 = vrot.slane %v9931_v27, %v9965_v30 }
 0x518   : > { %v3065_v39 = vsel %vm2998_vm4, %v9337_v38, 8 }
 0x519   : > { %3180 = vperm.xlu1 %8277, %v3049_v0   ;;  %3189 = vperm.xlu0 %8278, %v3052_v43   ;;  %v2836_v0 = vrot.slane %v9931_v27, %v9941_v3  ;;  %v2848_v43 = vrot.slane %v9931_v27, %v9938_v44 }
 0x51b   : > { %vm3000_vm14 = vcmp.eq.f32.partialorder %v9554_v55, %v2836_v0  ;;  %vm3003_vm15 = vcmp.eq.f32.partialorder %v11929_v60, %v2848_v43 }
 0x51d   : > { %3186 = vperm.xlu1 %8277, %v3051_v36   ;;  %3195 = vperm.xlu0 %8278, %v3054_v52   ;;  %v3068_v36 = vsel %vm3001_vm5, %v9337_v38, 8  ;;  %v2844_v52 = vrot.slane %v9931_v27, %v9954_v33 }
 0x51f   : > { %vm3002_vm1 = vcmp.eq.f32.partialorder %v11930_v40, %v2844_v52 }
 0x520   : > { %v3069_v0 = vsel %vm3002_vm1, %v9337_v38, 8 }
 0x521   : > { %3192 = vperm.xlu1 %8277, %v3053_v18   ;;  %3225 = vperm.xlu0 %8278, %v3064_v61   ;;  %v3067_v18 = vsel %vm3000_vm14, %v9337_v38, 8  ;;  %v3070_v61 = vsel %vm3003_vm15, %v9337_v38, 8 }
 0x525   : > { %3198 = vperm.xlu1 %8277, %v3055_v37   ;;  %3231 = vperm.xlu0 %8278, %v3066_v34   ;;  %v11931_v37 = vld [vmem:[#allocation46_spill] sm:$0xff] }
 0x528   : > { %v2602_v22 = vpop.xlane.xlu0 %2601 }
 0x529   : > { %3228 = vperm.xlu1 %8277, %v3065_v39   ;;  %3237 = vperm.xlu0 %8278, %v3068_v36   ;;  %v2664_v48 = vrot.slane %v2602_v22, %v8985_v59  ;;  %v2672_v34 = vrot.slane %v2602_v22, %v9926_v11  ;;  %v11932_v39 = vld [vmem:[#allocation32_spill] sm:$0xff]  ;;  %v2668_v27 = vrot.slane %v2602_v22, %v9014_v8 }
 0x52a   : > { %vm3004_vm3 = vcmp.eq.f32.partialorder %v11932_v39, %v2852_v46  ;;  %v11933_v36 = vld [vmem:[#allocation48_spill] sm:$0xff]  ;;  %v2688_v46 = vrot.slane %v2602_v22, %v9938_v44  ;;  %v2684_v29 = vrot.slane %v2602_v22, %v9954_v33 }
 0x52b   : > { %vm2957_vm2 = vcmp.eq.f32.partialorder %v11931_v37, %v2664_v48  ;;  %vm2959_vm4 = vcmp.eq.f32.partialorder %v11933_v36, %v2672_v34  ;;  %v3071_v52 = vsel %vm3004_vm3, %v9337_v38, 8  ;;  %vm2958_vm5 = vcmp.eq.f32.partialorder %v11934_v53, %v2668_v27 }
 0x52c   : > { %v3024_v43 = vsel %vm2957_vm2, %v9337_v38, 8  ;;  %v3026_v48 = vsel %vm2959_vm4, %v9337_v38, 8  ;;  %v3025_v34 = vsel %vm2958_vm5, %v9337_v38, 8  ;;  %vm2963_vm1 = vcmp.eq.f32.partialorder %v11937_v16, %v2688_v46  ;;  %v11943_v16 = vld [vmem:[#allocation58_spill] sm:$0xff] }
 0x52d   : > { %3234 = vperm.xlu1 %8277, %v3067_v18   ;;  %3243 = vperm.xlu0 %8278, %v3070_v61   ;;  %v2680_v18 = vrot.slane %v2602_v22, %v9929_v51  ;;  %v2676_v61 = vrot.slane %v2602_v22, %v9941_v3  ;;  %vm2962_vm2 = vcmp.eq.f32.partialorder %v11938_v45, %v2684_v29  ;;  %v11945_v45 = vld [vmem:[#allocation59_spill] sm:$0xff] }
 0x52f   : > { %vm2961_vm14 = vcmp.eq.f32.partialorder %v11935_v31, %v2680_v18  ;;  %vm2960_vm15 = vcmp.eq.f32.partialorder %v11936_v20, %v2676_v61  ;;  %v3030_v18 = vsel %vm2963_vm1, %v9337_v38, 8  ;;  %v3029_v61 = vsel %vm2962_vm2, %v9337_v38, 8 }
 0x530   : > { %v3027_v27 = vsel %vm2960_vm15, %v9337_v38, 8 }
 0x531   : > { %3240 = vperm.xlu1 %8277, %v3069_v0   ;;  %3105 = vperm.xlu0 %8278, %v3024_v43   ;;  %v2608_v0 = vpop.xlane.xlu1 %2607  ;;  %v3028_v43 = vsel %vm2961_vm14, %v9337_v38, 8 }
 0x535   : > { %3246 = vperm.xlu1 %8277, %v3071_v52   ;;  %3111 = vperm.xlu0 %8278, %v3026_v48   ;;  %v2728_v52 = vrot.slane %v2608_v0, %v8985_v59  ;;  %v2692_v48 = vrot.slane %v2602_v22, %v9965_v30  ;;  %v2732_v22 = vrot.slane %v2608_v0, %v9014_v8 }
 0x537   : > { %vm2973_vm3 = vcmp.eq.f32.partialorder %v11939_v24, %v2728_v52  ;;  %v11942_v24 = vld [vmem:[#allocation40_spill] sm:$0xff] }
 0x538   : > { %v3040_v46 = vsel %vm2973_vm3, %v9337_v38, 8  ;;  %vm2974_vm14 = vcmp.eq.f32.partialorder %v11942_v24, %v2732_v22  ;;  %v11947_v24 = vld [vmem:[#allocation60_spill] sm:$0xff] }
 0x539   : > { %3108 = vperm.xlu1 %8277, %v3025_v34   ;;  %3117 = vperm.xlu0 %8278, %v3028_v43   ;;  %v2736_v34 = vrot.slane %v2608_v0, %v9926_v11  ;;  %v11940_v43 = vld [vmem:[#allocation39_spill] sm:$0xff] }
 0x53a   : > { %vm2964_vm4 = vcmp.eq.f32.partialorder %v11940_v43, %v2692_v48  ;;  %v2752_v48 = vrot.slane %v2608_v0, %v9938_v44  ;;  %v11944_v43 = vld [vmem:[#allocation41_spill] sm:$0xff] }
 0x53b   : > { %vm2975_vm5 = vcmp.eq.f32.partialorder %v11941_v28, %v2736_v34  ;;  %v3031_v29 = vsel %vm2964_vm4, %v9337_v38, 8  ;;  %v3041_v34 = vsel %vm2974_vm14, %v9337_v38, 8  ;;  %v2748_v28 = vrot.slane %v2608_v0, %v9954_v33 }
 0x53c   : > { %v3042_v52 = vsel %vm2975_vm5, %v9337_v38, 8  ;;  %vm2979_vm2 = vcmp.eq.f32.partialorder %v11945_v45, %v2752_v48  ;;  %v11949_v45 = vld [vmem:[#allocation61_spill] sm:$0xff] }
 0x53d   : > { %3114 = vperm.xlu1 %8277, %v3027_v27   ;;  %3123 = vperm.xlu0 %8278, %v3030_v18   ;;  %v2744_v27 = vrot.slane %v2608_v0, %v9929_v51  ;;  %v2740_v18 = vrot.slane %v2608_v0, %v9941_v3 }
 0x53f   : > { %vm2977_vm15 = vcmp.eq.f32.partialorder %v11943_v16, %v2744_v27  ;;  %vm2976_vm1 = vcmp.eq.f32.partialorder %v11944_v43, %v2740_v18  ;;  %v3046_v27 = vsel %vm2979_vm2, %v9337_v38, 8  ;;  %v11946_v16 = vld [vmem:[#allocation42_spill] sm:$0xff]  ;;  %v11953_v43 = vld [vmem:[#allocation63_spill] sm:$0xff] }
 0x540   : > { %v3043_v22 = vsel %vm2976_vm1, %v9337_v38, 8  ;;  %vm2978_vm3 = vcmp.eq.f32.partialorder %v11946_v16, %v2748_v28  ;;  %v11951_v16 = vld [vmem:[#allocation62_spill] sm:$0xff] }
 0x541   : > { %3120 = vperm.xlu1 %8277, %v3029_v61   ;;  %3153 = vperm.xlu0 %8278, %v3040_v46   ;;  %v2614_v61 = vpop.xlane.xlu1 %2613  ;;  %v3044_v46 = vsel %vm2977_vm15, %v9337_v38, 8  ;;  %v3045_v18 = vsel %vm2978_vm3, %v9337_v38, 8 }
 0x545   : > { %3126 = vperm.xlu1 %8277, %v3031_v29   ;;  %3159 = vperm.xlu0 %8278, %v3042_v52   ;;  %v2792_v29 = vrot.slane %v2614_v61, %v8985_v59  ;;  %v2756_v52 = vrot.slane %v2608_v0, %v9965_v30  ;;  %v2796_v0 = vrot.slane %v2614_v61, %v9014_v8 }
 0x547   : > { %vm2989_vm4 = vcmp.eq.f32.partialorder %v11947_v24, %v2792_v29  ;;  %v11950_v24 = vld [vmem:[#allocation44_spill] sm:$0xff] }
 0x548   : > { %v3056_v48 = vsel %vm2989_vm4, %v9337_v38, 8  ;;  %vm2990_vm15 = vcmp.eq.f32.partialorder %v11950_v24, %v2796_v0  ;;  %v11955_v24 = vld [vmem:[#allocation64_spill] sm:$0xff] }
 0x549   : > { %3156 = vperm.xlu1 %8277, %v3041_v34   ;;  %3165 = vperm.xlu0 %8278, %v3044_v46   ;;  %v2800_v34 = vrot.slane %v2614_v61, %v9926_v11  ;;  %v11948_v46 = vld [vmem:[#allocation43_spill] sm:$0xff] }
 0x54a   : > { %vm2980_vm5 = vcmp.eq.f32.partialorder %v11948_v46, %v2756_v52  ;;  %v2816_v52 = vrot.slane %v2614_v61, %v9938_v44  ;;  %v11952_v46 = vld [vmem:[#allocation45_spill] sm:$0xff] }
 0x54b   : > { %vm2991_vm14 = vcmp.eq.f32.partialorder %v11949_v45, %v2800_v34  ;;  %v3047_v28 = vsel %vm2980_vm5, %v9337_v38, 8  ;;  %v3057_v34 = vsel %vm2990_vm15, %v9337_v38, 8  ;;  %v2812_v45 = vrot.slane %v2614_v61, %v9954_v33 }
 0x54c   : > { %v3058_v29 = vsel %vm2991_vm14, %v9337_v38, 8  ;;  %vm2995_vm3 = vcmp.eq.f32.partialorder %v11953_v43, %v2816_v52  ;;  %v11958_v43 = vld [vmem:[#allocation66_spill] sm:$0xff] }
 0x54d   : > { %3162 = vperm.xlu1 %8277, %v3043_v22   ;;  %3171 = vperm.xlu0 %8278, %v3046_v27   ;;  %v2808_v22 = vrot.slane %v2614_v61, %v9929_v51  ;;  %v2804_v27 = vrot.slane %v2614_v61, %v9941_v3 }
 0x54f   : > { %vm2993_vm1 = vcmp.eq.f32.partialorder %v11951_v16, %v2808_v22  ;;  %vm2992_vm2 = vcmp.eq.f32.partialorder %v11952_v46, %v2804_v27  ;;  %v3062_v22 = vsel %vm2995_vm3, %v9337_v38, 8  ;;  %v11954_v16 = vld [vmem:[#allocation47_spill] sm:$0xff] }
 0x550   : > { %v3059_v0 = vsel %vm2992_vm2, %v9337_v38, 8  ;;  %vm2994_vm4 = vcmp.eq.f32.partialorder %v11954_v16, %v2812_v45 }
 0x551   : > { %3168 = vperm.xlu1 %8277, %v3045_v18   ;;  %3201 = vperm.xlu0 %8278, %v3056_v48   ;;  %v2620_v18 = vpop.xlane.xlu1 %2619  ;;  %v3060_v48 = vsel %vm2993_vm1, %v9337_v38, 8  ;;  %v3061_v27 = vsel %vm2994_vm4, %v9337_v38, 8 }
 0x555   : > { %3174 = vperm.xlu1 %8277, %v3047_v28   ;;  %3207 = vperm.xlu0 %8278, %v3058_v29   ;;  %v2856_v28 = vrot.slane %v2620_v18, %v8985_v59  ;;  %v2820_v29 = vrot.slane %v2614_v61, %v9965_v30  ;;  %v2860_v61 = vrot.slane %v2620_v18, %v9014_v8 }
 0x557   : > { %vm3005_vm5 = vcmp.eq.f32.partialorder %v11955_v24, %v2856_v28  ;;  %v11957_v24 = vld [vmem:[#allocation51_spill] sm:$0xff] }
 0x558   : > { %v3072_v52 = vsel %vm3005_vm5, %v9337_v38, 8  ;;  %vm3006_vm1 = vcmp.eq.f32.partialorder %v11957_v24, %v2860_v61 }
 0x559   : > { %3204 = vperm.xlu1 %8277, %v3057_v34   ;;  %3213 = vperm.xlu0 %8278, %v3060_v48   ;;  %v2864_v34 = vrot.slane %v2620_v18, %v9926_v11  ;;  %v11956_v48 = vld [vmem:[#allocation49_spill] sm:$0xff] }
 0x55a   : > { %vm2996_vm14 = vcmp.eq.f32.partialorder %v11956_v48, %v2820_v29  ;;  %v2880_v29 = vrot.slane %v2620_v18, %v9938_v44  ;;  %v2876_v48 = vrot.slane %v2620_v18, %v9954_v33 }
 0x55b   : > { %vm3007_vm15 = vcmp.eq.f32.partialorder %v9762_v47, %v2864_v34  ;;  %v3063_v45 = vsel %vm2996_vm14, %v9337_v38, 8  ;;  %v3073_v34 = vsel %vm3006_vm1, %v9337_v38, 8  ;;  %v11960_v47 = vld [vmem:[#allocation67_spill] sm:$0xff] }
 0x55c   : > { %v3074_v28 = vsel %vm3007_vm15, %v9337_v38, 8  ;;  %vm3011_vm4 = vcmp.eq.f32.partialorder %v11960_v47, %v2880_v29 }
 0x55d   : > { %3210 = vperm.xlu1 %8277, %v3059_v0   ;;  %3219 = vperm.xlu0 %8278, %v3062_v22   ;;  %v2872_v0 = vrot.slane %v2620_v18, %v9929_v51  ;;  %v2868_v22 = vrot.slane %v2620_v18, %v9941_v3  ;;  %v3078_v61 = vsel %vm3011_vm4, %v9337_v38, 8 }
 0x55f   : > { %vm3009_vm2 = vcmp.eq.f32.partialorder %v11958_v43, %v2872_v0  ;;  %v11961_v0 = vld [vmem:[#allocation55_spill] sm:$0xff] }
 0x560   : > { %vm3010_vm5 = vcmp.eq.f32.partialorder %v11961_v0, %v2876_v48 }
 0x561   : > { %3216 = vperm.xlu1 %8277, %v3061_v27   ;;  %3249 = vperm.xlu0 %8278, %v3072_v52   ;;  %v3076_v27 = vsel %vm3009_vm2, %v9337_v38, 8  ;;  %v11959_v52 = vld [vmem:[#allocation53_spill] sm:$0xff]  ;;  %v3077_v43 = vsel %vm3010_vm5, %v9337_v38, 8 }
 0x562   : > { %vm3008_vm3 = vcmp.eq.f32.partialorder %v11959_v52, %v2868_v22 }
 0x565   : > { %3222 = vperm.xlu1 %8277, %v3063_v45   ;;  %3255 = vperm.xlu0 %8278, %v3074_v28   ;;  %v3075_v45 = vsel %vm3008_vm3, %v9337_v38, 8  ;;  %v2884_v28 = vrot.slane %v2620_v18, %v9965_v30 }
 0x569   : > { %3252 = vperm.xlu1 %8277, %v3073_v34   ;;  %3261 = vperm.xlu0 %8278, %v3076_v27   ;;  %v11962_v34 = vld [vmem:[#allocation57_spill] sm:$0xff] }
 0x56a   : > { %vm3012_vm14 = vcmp.eq.f32.partialorder %v11962_v34, %v2884_v28 }
 0x56b   : > { %v3079_v29 = vsel %vm3012_vm14, %v9337_v38, 8 }
 0x56d   : > { %3258 = vperm.xlu1 %8277, %v3075_v45   ;;  %3267 = vperm.xlu0 %8278, %v3078_v61  }
 0x571   : > { %3264 = vperm.xlu1 %8277, %v3077_v43  }
 0x574   : > { %v3082_v22 = vpop.permute.xlu1 %3081  ;;  %v3088_v27 = vpop.permute.xlu0 %3087 }
 0x575   : > { %3270 = vperm.xlu1 %8277, %v3079_v29   ;;  %v3275_v24 = vrot.slane %v3082_v22, %v9753_v13  ;;  %v3283_v18 = vrot.slane %v3088_v27, %v9753_v13 }
 0x578   : > { %v3085_v47 = vpop.permute.xlu1 %3084  ;;  %v3094_v52 = vpop.permute.xlu0 %3093 }
 0x579   : > { %v3279_v45 = vrot.slane %v3085_v47, %v9753_v13  ;;  %v3291_v38 = vrot.slane %v3094_v52, %v9753_v13 }
 0x57b   : > { %v3528_v48 = vsel %vm2525_vm6, %v3279_v45, %v3275_v24 }
 0x57c   : > { %v3091_v61 = vpop.permute.xlu1 %3090  ;;  %v3100_v0 = vpop.permute.xlu0 %3099  ;;  %v3529_v28 = vsel %vm2527_vm7, %v3283_v18, %v3528_v48 }
 0x57d   : > { %v3287_v43 = vrot.slane %v3091_v61, %v9753_v13  ;;  %v3299_v27 = vrot.slane %v3100_v0, %v9753_v13 }
 0x57f   : > { %v3530_v34 = vsel %vm2529_vm8, %v3287_v43, %v3529_v28 }
 0x580   : > { %v3097_v29 = vpop.permute.xlu1 %3096  ;;  %v3130_v16 = vpop.permute.xlu0 %3129  ;;  %v3531_v47 = vsel %vm2531_vm9, %v3291_v38, %v3530_v34 }
 0x581   : > { %v3295_v22 = vrot.slane %v3097_v29, %v9753_v13  ;;  %v3339_v29 = vrot.slane %v3130_v16, %v9753_v13 }
 0x583   : > { %v3532_v24 = vsel %vm2533_vm10, %v3295_v22, %v3531_v47 }
 0x584   : > { %v3103_v45 = vpop.permute.xlu1 %3102  ;;  %v3136_v46 = vpop.permute.xlu0 %3135  ;;  %v3533_v48 = vsel %vm2535_vm11, %v3299_v27, %v3532_v24 }
 0x585   : > { %v3303_v61 = vrot.slane %v3103_v45, %v9753_v13  ;;  %v3347_v47 = vrot.slane %v3136_v46, %v9753_v13 }
 0x587   : > { %v3534_v18 = vsel %vm2537_vm12, %v3303_v61, %v3533_v48 }
 0x588   : > { %v3133_v43 = vpop.permute.xlu1 %3132  ;;  %v3142_v52 = vpop.permute.xlu0 %3141  ;;  %v10180_v28 = vsel %vm2596_vm13, %v3534_v18, 2147483647 }
 0x589   : > { %v3343_v34 = vrot.slane %v3133_v43, %v9753_v13  ;;  %v3586_v38 = vshra.s32 %v10180_v28, 16  ;;  %v3355_v48 = vrot.slane %v3142_v52, %v9753_v13 }
 0x58b   : > { %v3542_v0 = vsel %vm2525_vm6, %v3343_v34, %v3339_v29  ;;  %v10186_v22 = vcvt.s32.f32 %v3586_v38 }
 0x58c   : > { %v3139_v24 = vpop.permute.xlu1 %3138  ;;  %v3148_v27 = vpop.permute.xlu0 %3147  ;;  %v3543_v61 = vsel %vm2527_vm7, %v3347_v47, %v3542_v0 }
 0x58d   : > { %v3351_v45 = vrot.slane %v3139_v24, %v9753_v13  ;;  %3589 = vmin.xlane.f32.xlu0 %v10186_v22  ;;  %v3363_v38 = vrot.slane %v3148_v27, %v9753_v13 }
 0x58f   : > { %v3544_v16 = vsel %vm2529_vm8, %v3351_v45, %v3543_v61 }
 0x590   : > { %v3145_v18 = vpop.permute.xlu1 %3144  ;;  %v3178_v43 = vpop.permute.xlu0 %3177  ;;  %v3545_v34 = vsel %vm2531_vm9, %v3355_v48, %v3544_v16 }
 0x591   : > { %v3359_v29 = vrot.slane %v3145_v18, %v9753_v13  ;;  %v3403_v18 = vrot.slane %v3178_v43, %v9753_v13 }
 0x593   : > { %v3546_v46 = vsel %vm2533_vm10, %v3359_v29, %v3545_v34 }
 0x594   : > { %v3151_v31 = vpop.permute.xlu1 %3150  ;;  %v3184_v24 = vpop.permute.xlu0 %3183  ;;  %v3547_v0 = vsel %vm2535_vm11, %v3363_v38, %v3546_v46 }
 0x595   : > { %v3367_v20 = vrot.slane %v3151_v31, %v9753_v13  ;;  %v3411_v31 = vrot.slane %v3184_v24, %v9753_v13 }
 0x597   : > { %v3548_v47 = vsel %vm2537_vm12, %v3367_v20, %v3547_v0 }
 0x598   : > { %v3181_v45 = vpop.permute.xlu1 %3180  ;;  %v3190_v52 = vpop.permute.xlu0 %3189  ;;  %v10202_v61 = vsel %vm2596_vm13, %v3548_v47, 2147483647 }
 0x599   : > { %v3407_v16 = vrot.slane %v3181_v45, %v9753_v13  ;;  %v3616_v48 = vshra.s32 %v10202_v61, 16  ;;  %v3419_v0 = vrot.slane %v3190_v52, %v9753_v13 }
 0x59b   : > { %v3556_v27 = vsel %vm2525_vm6, %v3407_v16, %v3403_v18  ;;  %v10208_v29 = vcvt.s32.f32 %v3616_v48 }
 0x59c   : > { %v3187_v34 = vpop.permute.xlu1 %3186  ;;  %v3196_v46 = vpop.permute.xlu0 %3195  ;;  %v3557_v38 = vsel %vm2527_vm7, %v3411_v31, %v3556_v27 }
 0x59d   : > { %v3415_v20 = vrot.slane %v3187_v34, %v9753_v13  ;;  %3619 = vmin.xlane.f32.xlu1 %v10208_v29  ;;  %v3427_v48 = vrot.slane %v3196_v46, %v9753_v13 }
 0x59f   : > { %v3558_v43 = vsel %vm2529_vm8, %v3415_v20, %v3557_v38 }
 0x5a0   : > { %v3193_v47 = vpop.permute.xlu1 %3192  ;;  %v3226_v45 = vpop.permute.xlu0 %3225  ;;  %v3559_v16 = vsel %vm2531_vm9, %v3419_v0, %v3558_v43 }
 0x5a1   : > { %v3423_v18 = vrot.slane %v3193_v47, %v9753_v13  ;;  %v3467_v47 = vrot.slane %v3226_v45, %v9753_v13 }
 0x5a3   : > { %v3560_v24 = vsel %vm2533_vm10, %v3423_v18, %v3559_v16 }
 0x5a4   : > { %v3199_v36 = vpop.permute.xlu1 %3198  ;;  %v3232_v34 = vpop.permute.xlu0 %3231  ;;  %v3561_v27 = vsel %vm2535_vm11, %v3427_v48, %v3560_v24 }
 0x5a5   : > { %v3431_v53 = vrot.slane %v3199_v36, %v9753_v13  ;;  %v3475_v36 = vrot.slane %v3232_v34, %v9753_v13 }
 0x5a7   : > { %v3562_v31 = vsel %vm2537_vm12, %v3431_v53, %v3561_v27 }
 0x5a8   : > { %v3229_v20 = vpop.permute.xlu1 %3228  ;;  %v3238_v52 = vpop.permute.xlu0 %3237  ;;  %v10224_v38 = vsel %vm2596_vm13, %v3562_v31, 2147483647 }
 0x5a9   : > { %v3471_v43 = vrot.slane %v3229_v20, %v9753_v13  ;;  %v3646_v0 = vshra.s32 %v10224_v38, 16  ;;  %v3483_v27 = vrot.slane %v3238_v52, %v9753_v13 }
 0x5ab   : > { %v3570_v46 = vsel %vm2525_vm6, %v3471_v43, %v3467_v47  ;;  %v10230_v18 = vcvt.s32.f32 %v3646_v0 }
 0x5ac   : > { %v3235_v16 = vpop.permute.xlu1 %3234  ;;  %v3244_v24 = vpop.permute.xlu0 %3243  ;;  %v3571_v48 = vsel %vm2527_vm7, %v3475_v36, %v3570_v46 }
 0x5ad   : > { %v3479_v53 = vrot.slane %v3235_v16, %v9753_v13  ;;  %3649 = vmin.xlane.f32.xlu1 %v10230_v18  ;;  %v3491_v0 = vrot.slane %v3244_v24, %v9753_v13 }
 0x5af   : > { %v3572_v45 = vsel %vm2529_vm8, %v3479_v53, %v3571_v48 }
 0x5b0   : > { %v3241_v31 = vpop.permute.xlu1 %3240  ;;  %v3106_v20 = vpop.permute.xlu0 %3105  ;;  %v3573_v43 = vsel %vm2531_vm9, %v3483_v27, %v3572_v45 }
 0x5b1   : > { %v3487_v47 = vrot.slane %v3241_v31, %v9753_v13  ;;  %v3307_v31 = vrot.slane %v3106_v20, %v9753_v13 }
 0x5b3   : > { %v3574_v34 = vsel %vm2533_vm10, %v3487_v47, %v3573_v43 }
 0x5b4   : > { %v3247_v37 = vpop.permute.xlu1 %3246  ;;  %v3112_v16 = vpop.permute.xlu0 %3111  ;;  %v3575_v46 = vsel %vm2535_vm11, %v3491_v0, %v3574_v34 }
 0x5b5   : > { %v3495_v39 = vrot.slane %v3247_v37, %v9753_v13  ;;  %v3315_v37 = vrot.slane %v3112_v16, %v9753_v13 }
 0x5b7   : > { %v3576_v36 = vsel %vm2537_vm12, %v3495_v39, %v3575_v46 }
 0x5b8   : > { %v3109_v53 = vpop.permute.xlu1 %3108  ;;  %v3118_v52 = vpop.permute.xlu0 %3117  ;;  %v10246_v48 = vsel %vm2596_vm13, %v3576_v36, 2147483647 }
 0x5b9   : > { %v3311_v45 = vrot.slane %v3109_v53, %v9753_v13  ;;  %v3676_v27 = vshra.s32 %v10246_v48, 16  ;;  %v3323_v46 = vrot.slane %v3118_v52, %v9753_v13 }
 0x5bb   : > { %v3535_v24 = vsel %vm2525_vm6, %v3311_v45, %v3307_v31  ;;  %v10252_v47 = vcvt.s32.f32 %v3676_v27 }
 0x5bc   : > { %v3115_v43 = vpop.permute.xlu1 %3114  ;;  %v3124_v34 = vpop.permute.xlu0 %3123  ;;  %v3536_v0 = vsel %vm2527_vm7, %v3315_v37, %v3535_v24 }
 0x5bd   : > { %v3319_v39 = vrot.slane %v3115_v43, %v9753_v13  ;;  %3679 = vmin.xlane.f32.xlu1 %v10252_v47  ;;  %v3331_v27 = vrot.slane %v3124_v34, %v9753_v13 }
 0x5bf   : > { %v3537_v20 = vsel %vm2529_vm8, %v3319_v39, %v3536_v0 }
 0x5c0   : > { %v3121_v36 = vpop.permute.xlu1 %3120  ;;  %v3154_v53 = vpop.permute.xlu0 %3153  ;;  %v3538_v45 = vsel %vm2531_vm9, %v3323_v46, %v3537_v20 }
 0x5c1   : > { %v3327_v31 = vrot.slane %v3121_v36, %v9753_v13  ;;  %v3371_v36 = vrot.slane %v3154_v53, %v9753_v13 }
 0x5c3   : > { %v3539_v16 = vsel %vm2533_vm10, %v3327_v31, %v3538_v45 }
 0x5c4   : > { %v3127_v60 = vpop.permute.xlu1 %3126  ;;  %v3160_v43 = vpop.permute.xlu0 %3159  ;;  %v3540_v24 = vsel %vm2535_vm11, %v3331_v27, %v3539_v16 }
 0x5c5   : > { %v3335_v40 = vrot.slane %v3127_v60, %v9753_v13  ;;  %v3379_v60 = vrot.slane %v3160_v43, %v9753_v13 }
 0x5c7   : > { %v3541_v37 = vsel %vm2537_vm12, %v3335_v40, %v3540_v24 }
 0x5c8   : > { %v3157_v39 = vpop.permute.xlu1 %3156  ;;  %v3166_v52 = vpop.permute.xlu0 %3165  ;;  %v10268_v0 = vsel %vm2596_vm13, %v3541_v37, 2147483647 }
 0x5c9   : > { %v3375_v20 = vrot.slane %v3157_v39, %v9753_v13  ;;  %v3601_v46 = vshra.s32 %v10268_v0, 16  ;;  %v3387_v24 = vrot.slane %v3166_v52, %v9753_v13 }
 0x5cb   : > { %v3549_v34 = vsel %vm2525_vm6, %v3375_v20, %v3371_v36  ;;  %v10274_v31 = vcvt.s32.f32 %v3601_v46 }
 0x5cc   : > { %v3163_v45 = vpop.permute.xlu1 %3162  ;;  %v3172_v16 = vpop.permute.xlu0 %3171  ;;  %v3550_v27 = vsel %vm2527_vm7, %v3379_v60, %v3549_v34 }
 0x5cd   : > { %v3383_v40 = vrot.slane %v3163_v45, %v9753_v13  ;;  %3604 = vmin.xlane.f32.xlu0 %v10274_v31  ;;  %v3395_v46 = vrot.slane %v3172_v16, %v9753_v13 }
 0x5cf   : > { %v3551_v53 = vsel %vm2529_vm8, %v3383_v40, %v3550_v27 }
 0x5d0   : > { %v3169_v37 = vpop.permute.xlu1 %3168  ;;  %v3202_v39 = vpop.permute.xlu0 %3201  ;;  %v3552_v20 = vsel %vm2531_vm9, %v3387_v24, %v3551_v53 }
 0x5d1   : > { %v3391_v36 = vrot.slane %v3169_v37, %v9753_v13  ;;  %v3435_v37 = vrot.slane %v3202_v39, %v9753_v13 }
 0x5d3   : > { %v3553_v43 = vsel %vm2533_vm10, %v3391_v36, %v3552_v20 }
 0x5d4   : > { %v3175_v17 = vpop.permute.xlu1 %3174  ;;  %v3208_v45 = vpop.permute.xlu0 %3207  ;;  %v3554_v34 = vsel %vm2535_vm11, %v3395_v46, %v3553_v43 }
 0x5d5   : > { %v3399_v55 = vrot.slane %v3175_v17, %v9753_v13  ;;  %v3443_v17 = vrot.slane %v3208_v45, %v9753_v13 }
 0x5d7   : > { %v3555_v60 = vsel %vm2537_vm12, %v3399_v55, %v3554_v34 }
 0x5d8   : > { %v3205_v40 = vpop.permute.xlu1 %3204  ;;  %v3214_v52 = vpop.permute.xlu0 %3213  ;;  %v10290_v27 = vsel %vm2596_vm13, %v3555_v60, 2147483647 }
 0x5d9   : > { %v3439_v53 = vrot.slane %v3205_v40, %v9753_v13  ;;  %v3631_v24 = vshra.s32 %v10290_v27, 16  ;;  %v3451_v34 = vrot.slane %v3214_v52, %v9753_v13 }
 0x5db   : > { %v3563_v16 = vsel %vm2525_vm6, %v3439_v53, %v3435_v37  ;;  %v10296_v36 = vcvt.s32.f32 %v3631_v24 }
 0x5dc   : > { %v3211_v20 = vpop.permute.xlu1 %3210  ;;  %v3220_v43 = vpop.permute.xlu0 %3219  ;;  %v3564_v46 = vsel %vm2527_vm7, %v3443_v17, %v3563_v16 }
 0x5dd   : > { %v3447_v55 = vrot.slane %v3211_v20, %v9753_v13  ;;  %3634 = vmin.xlane.f32.xlu1 %v10296_v36  ;;  %v3459_v24 = vrot.slane %v3220_v43, %v9753_v13 }
 0x5df   : > { %v3565_v39 = vsel %vm2529_vm8, %v3447_v55, %v3564_v46 }
 0x5e0   : > { %v3217_v60 = vpop.permute.xlu1 %3216  ;;  %v3250_v40 = vpop.permute.xlu0 %3249  ;;  %v3566_v53 = vsel %vm2531_vm9, %v3451_v34, %v3565_v39 }
 0x5e1   : > { %v3455_v37 = vrot.slane %v3217_v60, %v9753_v13  ;;  %v3499_v46 = vrot.slane %v3250_v40, %v9753_v13 }
 0x5e3   : > { %v3567_v45 = vsel %vm2533_vm10, %v3455_v37, %v3566_v53 }
 0x5e4   : > { %v3223_v23 = vpop.permute.xlu1 %3222  ;;  %v3256_v26 = vpop.permute.xlu0 %3255  ;;  %v3568_v16 = vsel %vm2535_vm11, %v3459_v24, %v3567_v45 }
 0x5e5   : > { %v3463_v20 = vrot.slane %v3223_v23, %v9753_v13  ;;  %v3507_v23 = vrot.slane %v3256_v26, %v9753_v13 }
 0x5e7   : > { %v3569_v17 = vsel %vm2537_vm12, %v3463_v20, %v3568_v16 }
 0x5e8   : > { %v3253_v55 = vpop.permute.xlu1 %3252  ;;  %v10312_v52 = vsel %vm2596_vm13, %v3569_v17, 2147483647  ;;  %v3262_v60 = vpop.permute.xlu0 %3261 }
 0x5e9   : > { %v3503_v39 = vrot.slane %v3253_v55, %v9753_v13  ;;  %v3661_v34 = vshra.s32 %v10312_v52, 16  ;;  %v3515_v20 = vrot.slane %v3262_v60, %v9753_v13 }
 0x5eb   : > { %v3577_v43 = vsel %vm2525_vm6, %v3503_v39, %v3499_v46  ;;  %v10318_v37 = vcvt.s32.f32 %v3661_v34 }
 0x5ec   : > { %v3259_v53 = vpop.permute.xlu1 %3258  ;;  %v3578_v24 = vsel %vm2527_vm7, %v3507_v23, %v3577_v43  ;;  %v3268_v17 = vpop.permute.xlu0 %3267 }
 0x5ed   : > { %v3511_v45 = vrot.slane %v3259_v53, %v9753_v13  ;;  %3664 = vmin.xlane.f32.xlu1 %v10318_v37  ;;  %v3523_v26 = vrot.slane %v3268_v17, %v9753_v13  ;;  %v3615_v17 = vand.u32 65535, %v10202_v61 }
 0x5ef   : > { %v3579_v40 = vsel %vm2529_vm8, %v3511_v45, %v3578_v24  ;;  %v3585_v24 = vand.u32 65535, %v10180_v28 }
 0x5f0   : > { %v3265_v16 = vpop.permute.xlu1 %3264  ;;  %v3580_v46 = vsel %vm2531_vm9, %v3515_v20, %v3579_v40 }
 0x5f1   : > { %v3519_v55 = vrot.slane %v3265_v16, %v9753_v13  ;;  %v3587_v40 = vcvt.s32.f32 %v3585_v24 }
 0x5f3   : > { %v3581_v39 = vsel %vm2533_vm10, %v3519_v55, %v3580_v46  ;;  %v3617_v46 = vcvt.s32.f32 %v3615_v17 }
 0x5f4   : > { %v3271_v34 = vpop.permute.xlu1 %3270  ;;  %v3582_v63 = vsel %vm2535_vm11, %v3523_v26, %v3581_v39  ;;  %v3645_v39 = vand.u32 65535, %v10224_v38  ;;  %v3600_v38 = vand.u32 65535, %v10268_v0  ;;  %v3660_v0 = vand.u32 65535, %v10312_v52 }
 0x5f5   : > { %v3527_v53 = vrot.slane %v3271_v34, %v9753_v13 }
 0x5f6   : > { %v3647_v34 = vcvt.s32.f32 %v3645_v39  ;;  %v3662_v17 = vcvt.s32.f32 %v3660_v0 }
 0x5f7   : > { %v3583_v43 = vsel %vm2537_vm12, %v3527_v53, %v3582_v63 }
 0x5f8   : > { %v3689_v23 = vsel %vm2596_vm13, %v3583_v43, 2147483647 }
 0x5f9   : > { %v3691_v60 = vshra.s32 %v3689_v23, 16 }
 0x5fb   : > { %v3693_v45 = vcvt.s32.f32 %v3691_v60  ;;  %v3602_v60 = vcvt.s32.f32 %v3600_v38 }
 0x5fd   : > { %3694 = vmin.xlane.f32.xlu1 %v3693_v45 }
 0x61a   : > { %v3590_v16 = vpop.xlane.xlu0 %3589 }
 0x61b   : > { %vm3591_vm15 = vcmp.eq.f32.partialorder %v10186_v22, %v3590_v16  ;;  %v3675_v22 = vand.u32 65535, %v10246_v48  ;;  %v3630_v48 = vand.u32 65535, %v10290_v27 }
 0x61c   : > { %v3592_v20 = vsel %vm3591_vm15, %v3587_v40, inf }
 0x61d   : > { %3593 = vmin.xlane.f32.xlu1 %v3592_v20  ;;  %v3677_v61 = vcvt.s32.f32 %v3675_v22  ;;  %v3632_v40 = vcvt.s32.f32 %v3630_v48 }
 0x62a   : > { %v3620_v55 = vpop.xlane.xlu1 %3619 }
 0x62b   : > { %vm3621_vm1 = vcmp.eq.f32.partialorder %v10208_v29, %v3620_v55 }
 0x62c   : > { %v3622_v63 = vsel %vm3621_vm1, %v3617_v46, inf  ;;  %v3690_v46 = vand.u32 65535, %v3689_v23 }
 0x62d   : > { %3623 = vmin.xlane.f32.xlu0 %v3622_v63 }
 0x62e   : > { %v3692_v63 = vcvt.s32.f32 %v3690_v46 }
 0x63a   : > { %v10339_v26 = vpop.xlane.xlu1 %3649 }
 0x63b   : > { %vm3651_vm2 = vcmp.eq.f32.partialorder %v10230_v18, %v10339_v26 }
 0x63c   : > { %v3652_v28 = vsel %vm3651_vm2, %v3647_v34, inf }
 0x63d   : > { %3653 = vmin.xlane.f32.xlu0 %v3652_v28 }
 0x64a   : > { %v10344_v53 = vpop.xlane.xlu1 %3679 }
 0x64b   : > { %vm3681_vm3 = vcmp.eq.f32.partialorder %v10252_v47, %v10344_v53 }
 0x64c   : > { %v3682_v29 = vsel %vm3681_vm3, %v3677_v61, inf  ;;  %v11963_v61 = vld [vmem:[#allocation25_spill] sm:$0xff] }
 0x64d   : > { %3683 = vmin.xlane.f32.xlu0 %v3682_v29 }
 0x65a   : > { %v10349_v43 = vpop.xlane.xlu0 %3604 }
 0x65b   : > { %vm3606_vm4 = vcmp.eq.f32.partialorder %v10274_v31, %v10349_v43 }
 0x65c   : > { %v3607_v18 = vsel %vm3606_vm4, %v3602_v60, inf  ;;  %v3626_v60 = vcvt.f32.s32 %v3620_v55 }
 0x65d   : > { %3608 = vmin.xlane.f32.xlu0 %v3607_v18 }
 0x66a   : > { %v10354_v24 = vpop.xlane.xlu1 %3634 }
 0x66b   : > { %vm3636_vm5 = vcmp.eq.f32.partialorder %v10296_v36, %v10354_v24  ;;  %v3596_v36 = vcvt.f32.s32 %v3590_v16 }
 0x66c   : > { %v3637_v47 = vsel %vm3636_vm5, %v3632_v40, inf  ;;  %v3627_v40 = vshll.u32 %v3626_v60, 16 }
 0x66d   : > { %3638 = vmin.xlane.f32.xlu0 %v3637_v47  ;;  %v3597_v28 = vshll.u32 %v3596_v36, 16  ;;  %v3656_v36 = vcvt.f32.s32 %v10339_v26 }
 0x67a   : > { %v10359_v20 = vpop.xlane.xlu1 %3664 }
 0x67b   : > { %vm3666_vm14 = vcmp.eq.f32.partialorder %v10318_v37, %v10359_v20 }
 0x67c   : > { %v3667_v31 = vsel %vm3666_vm14, %v3662_v17, inf }
 0x67d   : > { %3668 = vmin.xlane.f32.xlu0 %v3667_v31 }
 0x68a   : > { %v10363_v27 = vpop.xlane.xlu1 %3694 }
 0x68b   : > { %vm3696_vm15 = vcmp.eq.f32.partialorder %v3693_v45, %v10363_v27 }
 0x68c   : > { %v3697_v39 = vsel %vm3696_vm15, %v3692_v63, inf }
 0x68d   : > { %3698 = vmin.xlane.f32.xlu0 %v3697_v39 }
 0x6aa   : > { %v3594_v34 = vpop.xlane.xlu1 %3593 }
 0x6ab   : > { %v3595_v52 = vcvt.f32.s32 %v3594_v34 }
 0x6ad   : > { %v3598_v22 = vadd.s32 %v3597_v28, %v3595_v52 }
 0x6af   : > { %vm3704_vm1 = vcmp.eq.s32.totalorder %v11963_v61, %v3598_v22  ;;  %v3657_v22 = vshll.u32 %v3656_v36, 16 }
 0x6b0   : > { %v3712_v29 = vsel %vm3704_vm1, 1.0, %v11928_v1 }
 0x6b1   : > { %v3731_v37 = vrot.slane %v3712_v29, %v8985_v59  ;;  %v3738_v23 = vrot.slane %v3712_v29, %v9014_v8  ;;  %v3745_v38 = vrot.slane %v3712_v29, %v9926_v11  ;;  %v3759_v45 = vrot.slane %v3712_v29, %v9929_v51 }
 0x6b2   : > { %v3752_v16 = vrot.slane %v3712_v29, %v9941_v3  ;;  %v3773_v18 = vrot.slane %v3712_v29, %v9938_v44  ;;  %v3766_v17 = vrot.slane %v3712_v29, %v9954_v33  ;;  %v3780_v55 = vrot.slane %v3712_v29, %v9965_v30 }
 0x6b3   : > { %3733 = vbcast.lane.b32.xlu1 %v3731_v37, 256  ;;  %3740 = vbcast.lane.b32.xlu0 %v3738_v23, 256 }
 0x6b7   : > { %3747 = vbcast.lane.b32.xlu1 %v3745_v38, 256  ;;  %3761 = vbcast.lane.b32.xlu0 %v3759_v45, 256 }
 0x6ba   : > { %v3624_v48 = vpop.xlane.xlu0 %3623 }
 0x6bb   : > { %v3625_v47 = vcvt.f32.s32 %v3624_v48  ;;  %3754 = vbcast.lane.b32.xlu1 %v3752_v16, 256  ;;  %3775 = vbcast.lane.b32.xlu0 %v3773_v18, 256  ;;  %v3686_v48 = vcvt.f32.s32 %v10344_v53 }
 0x6bd   : > { %v3628_v0 = vadd.s32 %v3627_v40, %v3625_v47 }
 0x6bf   : > { %vm3706_vm2 = vcmp.eq.s32.totalorder %v11963_v61, %v3628_v0  ;;  %3768 = vbcast.lane.b32.xlu1 %v3766_v17, 256  ;;  %v3687_v17 = vshll.u32 %v3686_v48, 16 }
 0x6c0   : > { %v3714_v31 = vsel %vm3706_vm2, 1.0, %v11928_v1  ;;  %vm8658_vm2 = vmmov 0  }
 0x6c1   : > { %v3843_v46 = vrot.slane %v3714_v31, %v8985_v59  ;;  %v3850_v63 = vrot.slane %v3714_v31, %v9014_v8  ;;  %v3857_v39 = vrot.slane %v3714_v31, %v9926_v11  ;;  %v3864_v34 = vrot.slane %v3714_v31, %v9941_v3 }
 0x6c2   : > { %v3871_v28 = vrot.slane %v3714_v31, %v9929_v51  ;;  %v3878_v23 = vrot.slane %v3714_v31, %v9954_v33  ;;  %v3885_v38 = vrot.slane %v3714_v31, %v9938_v44  ;;  %v3892_v45 = vrot.slane %v3714_v31, %v9965_v30 }
 0x6c3   : > { %3782 = vbcast.lane.b32.xlu1 %v3780_v55, 256  ;;  %3845 = vbcast.lane.b32.xlu0 %v3843_v46, 256 }
 0x6c7   : > { %3852 = vbcast.lane.b32.xlu1 %v3850_v63, 256  ;;  %3859 = vbcast.lane.b32.xlu0 %v3857_v39, 256 }
 0x6ca   : > { %v3654_v52 = vpop.xlane.xlu0 %3653 }
 0x6cb   : > { %v3655_v37 = vcvt.f32.s32 %v3654_v52  ;;  %3866 = vbcast.lane.b32.xlu1 %v3864_v34, 256  ;;  %3873 = vbcast.lane.b32.xlu0 %v3871_v28, 256  ;;  %v3611_v52 = vcvt.f32.s32 %v10349_v43 }
 0x6cd   : > { %v3658_v29 = vadd.s32 %v3657_v22, %v3655_v37 }
 0x6cf   : > { %vm3708_vm3 = vcmp.eq.s32.totalorder %v11963_v61, %v3658_v29  ;;  %3880 = vbcast.lane.b32.xlu1 %v3878_v23, 256  ;;  %3887 = vbcast.lane.b32.xlu0 %v3885_v38, 256  ;;  %v3612_v23 = vshll.u32 %v3611_v52, 16 }
 0x6d0   : > { %v3716_v26 = vsel %vm3708_vm3, 1.0, %v11928_v1 }
 0x6d1   : > { %v3955_v60 = vrot.slane %v3716_v26, %v8985_v59  ;;  %v3962_v16 = vrot.slane %v3716_v26, %v9014_v8  ;;  %v3969_v18 = vrot.slane %v3716_v26, %v9926_v11  ;;  %v3976_v40 = vrot.slane %v3716_v26, %v9941_v3 }
 0x6d2   : > { %v3983_v47 = vrot.slane %v3716_v26, %v9929_v51  ;;  %v3990_v46 = vrot.slane %v3716_v26, %v9954_v33  ;;  %v3997_v63 = vrot.slane %v3716_v26, %v9938_v44  ;;  %v4004_v39 = vrot.slane %v3716_v26, %v9965_v30 }
 0x6d3   : > { %3894 = vbcast.lane.b32.xlu1 %v3892_v45, 256  ;;  %3957 = vbcast.lane.b32.xlu0 %v3955_v60, 256 }
 0x6d7   : > { %3964 = vbcast.lane.b32.xlu1 %v3962_v16, 256  ;;  %3971 = vbcast.lane.b32.xlu0 %v3969_v18, 256 }
 0x6da   : > { %v3684_v0 = vpop.xlane.xlu0 %3683 }
 0x6db   : > { %v3685_v55 = vcvt.f32.s32 %v3684_v0  ;;  %3978 = vbcast.lane.b32.xlu1 %v3976_v40, 256  ;;  %3985 = vbcast.lane.b32.xlu0 %v3983_v47, 256  ;;  %v3641_v47 = vcvt.f32.s32 %v10354_v24 }
 0x6dd   : > { %v3688_v31 = vadd.s32 %v3687_v17, %v3685_v55 }
 0x6df   : > { %vm3710_vm4 = vcmp.eq.s32.totalorder %v11963_v61, %v3688_v31  ;;  %3992 = vbcast.lane.b32.xlu1 %v3990_v46, 256  ;;  %3999 = vbcast.lane.b32.xlu0 %v3997_v63, 256  ;;  %v3642_v31 = vshll.u32 %v3641_v47, 16  ;;  %v3701_v47 = vcvt.f32.s32 %v10363_v27 }
 0x6e0   : > { %v3718_v53 = vsel %vm3710_vm4, 1.0, %v11928_v1 }
 0x6e1   : > { %v4067_v36 = vrot.slane %v3718_v53, %v8985_v59  ;;  %v4074_v34 = vrot.slane %v3718_v53, %v9014_v8  ;;  %v4081_v28 = vrot.slane %v3718_v53, %v9926_v11  ;;  %v4088_v22 = vrot.slane %v3718_v53, %v9941_v3 }
 0x6e2   : > { %v4095_v37 = vrot.slane %v3718_v53, %v9929_v51  ;;  %v4102_v45 = vrot.slane %v3718_v53, %v9954_v33  ;;  %v4109_v60 = vrot.slane %v3718_v53, %v9938_v44  ;;  %v4116_v16 = vrot.slane %v3718_v53, %v9965_v30 }
 0x6e3   : > { %4006 = vbcast.lane.b32.xlu1 %v4004_v39, 256  ;;  %4069 = vbcast.lane.b32.xlu0 %v4067_v36, 256 }
 0x6e7   : > { %4076 = vbcast.lane.b32.xlu1 %v4074_v34, 256  ;;  %4083 = vbcast.lane.b32.xlu0 %v4081_v28, 256 }
 0x6ea   : > { %v3609_v29 = vpop.xlane.xlu0 %3608 }
 0x6eb   : > { %v3610_v38 = vcvt.f32.s32 %v3609_v29  ;;  %4090 = vbcast.lane.b32.xlu1 %v4088_v22, 256  ;;  %4097 = vbcast.lane.b32.xlu0 %v4095_v37, 256  ;;  %v3671_v22 = vcvt.f32.s32 %v10359_v20 }
 0x6ed   : > { %v3613_v26 = vadd.s32 %v3612_v23, %v3610_v38  ;;  %v3672_v38 = vshll.u32 %v3671_v22, 16 }
 0x6ef   : > { %vm3705_vm5 = vcmp.eq.s32.totalorder %v11963_v61, %v3613_v26  ;;  %4104 = vbcast.lane.b32.xlu1 %v4102_v45, 256  ;;  %4111 = vbcast.lane.b32.xlu0 %v4109_v60, 256 }
 0x6f0   : > { %v3713_v43 = vsel %vm3705_vm5, 1.0, %v11928_v1 }
 0x6f1   : > { %v3787_v18 = vrot.slane %v3713_v43, %v8985_v59  ;;  %v3794_v48 = vrot.slane %v3713_v43, %v9014_v8  ;;  %v3801_v40 = vrot.slane %v3713_v43, %v9926_v11  ;;  %v3808_v0 = vrot.slane %v3713_v43, %v9941_v3 }
 0x6f2   : > { %v3815_v17 = vrot.slane %v3713_v43, %v9929_v51  ;;  %v3822_v53 = vrot.slane %v3713_v43, %v9954_v33  ;;  %v3829_v39 = vrot.slane %v3713_v43, %v9938_v44  ;;  %v3836_v36 = vrot.slane %v3713_v43, %v9965_v30 }
 0x6f3   : > { %4118 = vbcast.lane.b32.xlu1 %v4116_v16, 256  ;;  %3789 = vbcast.lane.b32.xlu0 %v3787_v18, 256 }
 0x6f7   : > { %3796 = vbcast.lane.b32.xlu1 %v3794_v48, 256  ;;  %3803 = vbcast.lane.b32.xlu0 %v3801_v40, 256 }
 0x6fa   : > { %v3639_v55 = vpop.xlane.xlu0 %3638 }
 0x6fb   : > { %v3640_v46 = vcvt.f32.s32 %v3639_v55  ;;  %3810 = vbcast.lane.b32.xlu1 %v3808_v0, 256  ;;  %3817 = vbcast.lane.b32.xlu0 %v3815_v17, 256 }
 0x6fd   : > { %v3643_v63 = vadd.s32 %v3642_v31, %v3640_v46  ;;  %v3702_v31 = vshll.u32 %v3701_v47, 16 }
 0x6ff   : > { %vm3707_vm14 = vcmp.eq.s32.totalorder %v11963_v61, %v3643_v63  ;;  %3824 = vbcast.lane.b32.xlu1 %v3822_v53, 256  ;;  %3831 = vbcast.lane.b32.xlu0 %v3829_v39, 256 }
 0x700   : > { %v3715_v24 = vsel %vm3707_vm14, 1.0, %v11928_v1 }
 0x701   : > { %v3899_v34 = vrot.slane %v3715_v24, %v8985_v59  ;;  %v3906_v28 = vrot.slane %v3715_v24, %v9014_v8  ;;  %v3913_v52 = vrot.slane %v3715_v24, %v9926_v11  ;;  %v3920_v37 = vrot.slane %v3715_v24, %v9941_v3 }
 0x702   : > { %v3927_v29 = vrot.slane %v3715_v24, %v9929_v51  ;;  %v3934_v60 = vrot.slane %v3715_v24, %v9954_v33  ;;  %v3941_v43 = vrot.slane %v3715_v24, %v9938_v44  ;;  %v3948_v16 = vrot.slane %v3715_v24, %v9965_v30 }
 0x703   : > { %3838 = vbcast.lane.b32.xlu1 %v3836_v36, 256  ;;  %3901 = vbcast.lane.b32.xlu0 %v3899_v34, 256 }
 0x707   : > { %3908 = vbcast.lane.b32.xlu1 %v3906_v28, 256  ;;  %3915 = vbcast.lane.b32.xlu0 %v3913_v52, 256 }
 0x70a   : > { %v3669_v23 = vpop.xlane.xlu0 %3668 }
 0x70b   : > { %v3670_v26 = vcvt.f32.s32 %v3669_v23  ;;  %3922 = vbcast.lane.b32.xlu1 %v3920_v37, 256  ;;  %3929 = vbcast.lane.b32.xlu0 %v3927_v29, 256 }
 0x70d   : > { %v3673_v45 = vadd.s32 %v3672_v38, %v3670_v26 }
 0x70f   : > { %vm3709_vm15 = vcmp.eq.s32.totalorder %v11963_v61, %v3673_v45  ;;  %3936 = vbcast.lane.b32.xlu1 %v3934_v60, 256  ;;  %3943 = vbcast.lane.b32.xlu0 %v3941_v43, 256 }
 0x710   : > { %v3717_v20 = vsel %vm3709_vm15, 1.0, %v11928_v1 }
 0x711   : > { %v4011_v18 = vrot.slane %v3717_v20, %v8985_v59  ;;  %v4018_v48 = vrot.slane %v3717_v20, %v9014_v8  ;;  %v4025_v40 = vrot.slane %v3717_v20, %v9926_v11  ;;  %v4032_v0 = vrot.slane %v3717_v20, %v9941_v3 }
 0x712   : > { %v4039_v17 = vrot.slane %v3717_v20, %v9929_v51  ;;  %v4046_v53 = vrot.slane %v3717_v20, %v9954_v33  ;;  %v4053_v39 = vrot.slane %v3717_v20, %v9938_v44  ;;  %v4060_v24 = vrot.slane %v3717_v20, %v9965_v30 }
 0x713   : > { %3950 = vbcast.lane.b32.xlu1 %v3948_v16, 256  ;;  %4013 = vbcast.lane.b32.xlu0 %v4011_v18, 256 }
 0x717   : > { %4020 = vbcast.lane.b32.xlu1 %v4018_v48, 256  ;;  %4027 = vbcast.lane.b32.xlu0 %v4025_v40, 256 }
 0x71a   : > { %v3699_v55 = vpop.xlane.xlu0 %3698 }
 0x71b   : > { %v3700_v46 = vcvt.f32.s32 %v3699_v55  ;;  %4034 = vbcast.lane.b32.xlu1 %v4032_v0, 256  ;;  %4041 = vbcast.lane.b32.xlu0 %v4039_v17, 256 }
 0x71d   : > { %v3703_v63 = vadd.s32 %v3702_v31, %v3700_v46 }
 0x71f   : > { %vm3711_vm1 = vcmp.eq.s32.totalorder %v11963_v61, %v3703_v63  ;;  %4048 = vbcast.lane.b32.xlu1 %v4046_v53, 256  ;;  %4055 = vbcast.lane.b32.xlu0 %v4053_v39, 256 }
 0x720   : > { %v3719_v27 = vsel %vm3711_vm1, 1.0, %v11928_v1 }
 0x721   : > { %v4123_v36 = vrot.slane %v3719_v27, %v8985_v59  ;;  %v4130_v52 = vrot.slane %v3719_v27, %v9014_v8  ;;  %v4137_v22 = vrot.slane %v3719_v27, %v9926_v11  ;;  %v4144_v61 = vrot.slane %v3719_v27, %v9941_v3 }
 0x722   : > { %v4151_v29 = vrot.slane %v3719_v27, %v9929_v51  ;;  %v4158_v26 = vrot.slane %v3719_v27, %v9954_v33  ;;  %v4165_v45 = vrot.slane %v3719_v27, %v9938_v44  ;;  %v4172_v16 = vrot.slane %v3719_v27, %v9965_v30 }
 0x723   : > { %4062 = vbcast.lane.b32.xlu1 %v4060_v24, 256  ;;  %4125 = vbcast.lane.b32.xlu0 %v4123_v36, 256 }
 0x725   : > { %v3734_v34 = vpop.permute.xlu1 %3733  ;;  %v3741_v28 = vpop.permute.xlu0 %3740 }
 0x726   : > { %v10452_v60 = vmul.f32 %v3734_v34, %v9438_v41  ;;  %v10457_v18 = vmul.f32 %v3741_v28, %v9452_v5 }
 0x727   : > { %4132 = vbcast.lane.b32.xlu1 %v4130_v52, 256  ;;  %4139 = vbcast.lane.b32.xlu0 %v4137_v22, 256 }
 0x729   : > { %v3748_v37 = vpop.permute.xlu1 %3747  ;;  %v3762_v23 = vpop.permute.xlu0 %3761 }
 0x72a   : > { %v10460_v48 = vmul.f32 %v3748_v37, %v9461_v2  ;;  %v10465_v41 = vmul.f32 %v3762_v23, %v9476_v58 }
 0x72b   : > { %4146 = vbcast.lane.b32.xlu1 %v4144_v61, 256  ;;  %4153 = vbcast.lane.b32.xlu0 %v4151_v29, 256 }
 0x72d   : > { %v3755_v38 = vpop.permute.xlu1 %3754  ;;  %v3776_v43 = vpop.permute.xlu0 %3775 }
 0x72e   : > { %v10468_v0 = vmul.f32 %v3755_v38, %v9470_v56  ;;  %v10473_v5 = vmul.f32 %v3776_v43, %v9486_v21 }
 0x72f   : > { %4160 = vbcast.lane.b32.xlu1 %v4158_v26, 256  ;;  %4167 = vbcast.lane.b32.xlu0 %v4165_v45, 256 }
 0x731   : > { %v3769_v20 = vpop.permute.xlu1 %3768 }
 0x732   : > { %v10476_v2 = vmul.f32 %v3769_v20, %v9481_v7 }
 0x733   : > { %4174 = vbcast.lane.b32.xlu1 %v4172_v16, 256  ;;  %4369 = vperm.xlu0 %8278, %v10452_v60   ;;  %v11966_v16 = vld [vmem:[#allocation33_spill] sm:$0xff] }
 0x735   : > { %v3783_v40 = vpop.permute.xlu1 %3782  ;;  %v3846_v47 = vpop.permute.xlu0 %3845 }
 0x736   : > { %v10481_v56 = vmul.f32 %v3783_v40, %v9491_v12  ;;  %v10484_v58 = vmul.f32 %v3846_v47, %v9499_v19 }
 0x737   : > { %4375 = vperm.xlu0 %8278, %v10460_v48   ;;  %4372 = vperm.xlu1 %8277, %v10457_v18  }
 0x739   : > { %v3853_v17 = vpop.permute.xlu1 %3852  ;;  %v3860_v55 = vpop.permute.xlu0 %3859 }
 0x73a   : > { %v10489_v7 = vmul.f32 %v3853_v17, %v9444_v4  ;;  %v10492_v21 = vmul.f32 %v3860_v55, %v9505_v62 }
 0x73b   : > { %4378 = vperm.xlu1 %8277, %v10468_v0   ;;  %4381 = vperm.xlu0 %8278, %v10465_v41  }
 0x73d   : > { %v3867_v31 = vpop.permute.xlu1 %3866  ;;  %v3874_v46 = vpop.permute.xlu0 %3873 }
 0x73e   : > { %v10497_v12 = vmul.f32 %v3867_v31, %v9448_v9  ;;  %v10500_v19 = vmul.f32 %v3874_v46, %v9514_v35  ;;  %v11968_v31 = vld [vmem:[#allocation34_spill] sm:$0xff] }
 0x73f   : > { %4384 = vperm.xlu1 %8277, %v10476_v2   ;;  %4387 = vperm.xlu0 %8278, %v10473_v5  }
 0x741   : > { %v3881_v63 = vpop.permute.xlu1 %3880  ;;  %v3888_v53 = vpop.permute.xlu0 %3887 }
 0x742   : > { %v10505_v4 = vmul.f32 %v3881_v63, %v9456_v32  ;;  %v10508_v62 = vmul.f32 %v3888_v53, %v9523_v49 }
 0x743   : > { %4390 = vperm.xlu1 %8277, %v10481_v56   ;;  %4417 = vperm.xlu0 %8278, %v10484_v58  }
 0x745   : > { %v3895_v39 = vpop.permute.xlu1 %3894  ;;  %v3958_v27 = vpop.permute.xlu0 %3957 }
 0x746   : > { %v10513_v9 = vmul.f32 %v3895_v39, %v9465_v15  ;;  %v10516_v35 = vmul.f32 %v3958_v27, %v9533_v6  ;;  %v11969_v39 = vld [vmem:[#allocation30_spill] sm:$0xff] }
 0x747   : > { %4420 = vperm.xlu1 %8277, %v10489_v7   ;;  %4423 = vperm.xlu0 %8278, %v10492_v21  }
 0x749   : > { %v3965_v24 = vpop.permute.xlu1 %3964  ;;  %v3972_v36 = vpop.permute.xlu0 %3971 }
 0x74a   : > { %v10521_v32 = vmul.f32 %v3965_v24, %v9508_v50  ;;  %v10524_v49 = vmul.f32 %v3972_v36, %v9543_v42  ;;  %v11970_v24 = vld [vmem:[#allocation36_spill] sm:$0xff] }
 0x74b   : > { %4426 = vperm.xlu1 %8277, %v10497_v12   ;;  %4429 = vperm.xlu0 %8278, %v10500_v19  }
 0x74d   : > { %v3979_v34 = vpop.permute.xlu1 %3978  ;;  %v3986_v28 = vpop.permute.xlu0 %3985 }
 0x74e   : > { %v10529_v15 = vmul.f32 %v3979_v34, %v9517_v57  ;;  %v10532_v6 = vmul.f32 %v3986_v28, %v9551_v14  ;;  %v11964_v14 = vld [vmem:[#allocation31_spill] sm:$0xff] }
 0x74f   : > { %4432 = vperm.xlu1 %8277, %v10505_v4   ;;  %4435 = vperm.xlu0 %8278, %v10508_v62  }
 0x751   : > { %v3993_v52 = vpop.permute.xlu1 %3992  ;;  %v4000_v22 = vpop.permute.xlu0 %3999 }
 0x752   : > { %v10537_v50 = vmul.f32 %v3993_v52, %v9526_v54  ;;  %v10540_v42 = vmul.f32 %v4000_v22, %v9561_v25  ;;  %v11965_v54 = vld [vmem:[#allocation28_spill] sm:$0xff] }
 0x753   : > { %4438 = vperm.xlu1 %8277, %v10513_v9   ;;  %4465 = vperm.xlu0 %8278, %v10516_v35   ;;  %v11971_v52 = vld [vmem:[#allocation32_spill] sm:$0xff] }
 0x755   : > { %v4007_v37 = vpop.permute.xlu1 %4006  ;;  %v4070_v61 = vpop.permute.xlu0 %4069 }
 0x756   : > { %v10545_v57 = vmul.f32 %v4007_v37, %v9536_v10  ;;  %v10548_v45 = vmul.f32 %v4070_v61, %v11964_v14  ;;  %v11967_v10 = vld [vmem:[#allocation29_spill] sm:$0xff]  ;;  %v11972_v37 = vld [vmem:[#allocation46_spill] sm:$0xff]  ;;  %v11974_v14 = vld [vmem:[#allocation48_spill] sm:$0xff] }
 0x757   : > { %4468 = vperm.xlu1 %8277, %v10521_v32   ;;  %4471 = vperm.xlu0 %8278, %v10524_v49  }
 0x759   : > { %v4077_v29 = vpop.permute.xlu1 %4076  ;;  %v4084_v23 = vpop.permute.xlu0 %4083 }
 0x75a   : > { %v10553_v25 = vmul.f32 %v4077_v29, %v11965_v54  ;;  %v10556_v40 = vmul.f32 %v4084_v23, %v11966_v16  ;;  %v11975_v16 = vld [vmem:[#allocation37_spill] sm:$0xff] }
 0x75b   : > { %4474 = vperm.xlu1 %8277, %v10529_v15   ;;  %4477 = vperm.xlu0 %8278, %v10532_v6  }
 0x75d   : > { %v4091_v38 = vpop.permute.xlu1 %4090  ;;  %v4098_v26 = vpop.permute.xlu0 %4097 }
 0x75e   : > { %v10561_v55 = vmul.f32 %v4091_v38, %v11967_v10  ;;  %v10564_v46 = vmul.f32 %v4098_v26, %v11968_v31  ;;  %v11973_v38 = vld [vmem:[#allocation35_spill] sm:$0xff] }
 0x75f   : > { %4480 = vperm.xlu1 %8277, %v10537_v50   ;;  %4483 = vperm.xlu0 %8278, %v10540_v42  }
 0x761   : > { %v4105_v43 = vpop.permute.xlu1 %4104  ;;  %v4112_v20 = vpop.permute.xlu0 %4111 }
 0x762   : > { %v10569_v27 = vmul.f32 %v4105_v43, %v11969_v39  ;;  %v10572_v36 = vmul.f32 %v4112_v20, %v11970_v24  ;;  %v11979_v24 = vld [vmem:[#allocation52_spill] sm:$0xff] }
 0x763   : > { %4486 = vperm.xlu1 %8277, %v10545_v57   ;;  %4513 = vperm.xlu0 %8278, %v10548_v45  }
 0x765   : > { %v4119_v47 = vpop.permute.xlu1 %4118  ;;  %v3790_v17 = vpop.permute.xlu0 %3789 }
 0x766   : > { %v10577_v22 = vmul.f32 %v4119_v47, %v11971_v52  ;;  %v10580_v61 = vmul.f32 %v3790_v17, %v11972_v37  ;;  %v11976_v17 = vld [vmem:[#allocation50_spill] sm:$0xff] }
 0x767   : > { %4516 = vperm.xlu1 %8277, %v10553_v25   ;;  %4519 = vperm.xlu0 %8278, %v10556_v40  }
 0x769   : > { %v3797_v63 = vpop.permute.xlu1 %3796  ;;  %v3804_v53 = vpop.permute.xlu0 %3803 }
 0x76a   : > { %v10585_v26 = vmul.f32 %v3797_v63, %v11973_v38  ;;  %v10588_v43 = vmul.f32 %v3804_v53, %v11974_v14  ;;  %v11978_v63 = vld [vmem:[#allocation38_spill] sm:$0xff] }
 0x76b   : > { %4522 = vperm.xlu1 %8277, %v10561_v55   ;;  %4525 = vperm.xlu0 %8278, %v10564_v46   ;;  %v11983_v14 = vld [vmem:[#allocation54_spill] sm:$0xff] }
 0x76d   : > { %v3811_v34 = vpop.permute.xlu1 %3810  ;;  %v3818_v28 = vpop.permute.xlu0 %3817 }
 0x76e   : > { %v10593_v47 = vmul.f32 %v3811_v34, %v11975_v16  ;;  %v10596_v10 = vmul.f32 %v3818_v28, %v11976_v17  ;;  %v11981_v34 = vld [vmem:[#allocation39_spill] sm:$0xff] }
 0x76f   : > { %4528 = vperm.xlu1 %8277, %v10569_v27   ;;  %4531 = vperm.xlu0 %8278, %v10572_v36  }
 0x770   : > { %11977 = vst [vmem:[#allocation25_spill] sm:$0xff] %v10596_v10 }
 0x771   : > { %v3825_v29 = vpop.permute.xlu1 %3824  ;;  %v3832_v23 = vpop.permute.xlu0 %3831 }
 0x772   : > { %v10601_v53 = vmul.f32 %v3825_v29, %v11978_v63  ;;  %v10604_v52 = vmul.f32 %v3832_v23, %v11979_v24  ;;  %v11985_v29 = vld [vmem:[#allocation40_spill] sm:$0xff] }
 0x773   : > { %4534 = vperm.xlu1 %8277, %v10577_v22   ;;  %4393 = vperm.xlu0 %8278, %v10580_v61   ;;  %v11987_v63 = vld [vmem:[#allocation56_spill] sm:$0xff] }
 0x774   : > { %11980 = vst [vmem:[#allocation31_spill] sm:$0xff] %v10604_v52 }
 0x775   : > { %v3839_v20 = vpop.permute.xlu1 %3838  ;;  %v3902_v54 = vpop.permute.xlu0 %3901 }
 0x776   : > { %v10609_v28 = vmul.f32 %v3839_v20, %v11981_v34  ;;  %v10612_v16 = vmul.f32 %v3902_v54, %v11983_v14  ;;  %v11989_v20 = vld [vmem:[#allocation41_spill] sm:$0xff]  ;;  %v11991_v34 = vld [vmem:[#allocation58_spill] sm:$0xff] }
 0x777   : > { %4396 = vperm.xlu1 %8277, %v10585_v26   ;;  %4399 = vperm.xlu0 %8278, %v10588_v43  }
 0x778   : > { %11982 = vst [vmem:[#allocation28_spill] sm:$0xff] %v10609_v28  ;;  %11984 = vst [vmem:[#allocation33_spill] sm:$0xff] %v10612_v16 }
 0x779   : > { %v3909_v31 = vpop.permute.xlu1 %3908  ;;  %v3916_v39 = vpop.permute.xlu0 %3915 }
 0x77a   : > { %v10617_v23 = vmul.f32 %v3909_v31, %v11985_v29  ;;  %v10620_v24 = vmul.f32 %v3916_v39, %v11987_v63  ;;  %v11993_v31 = vld [vmem:[#allocation42_spill] sm:$0xff]  ;;  %v11995_v29 = vld [vmem:[#allocation59_spill] sm:$0xff] }
 0x77b   : > { %4402 = vperm.xlu1 %8277, %v10593_v47   ;;  %4405 = vperm.xlu0 %8278, %v10596_v10  }
 0x77c   : > { %11986 = vst [vmem:[#allocation29_spill] sm:$0xff] %v10617_v23  ;;  %11988 = vst [vmem:[#allocation34_spill] sm:$0xff] %v10620_v24 }
 0x77d   : > { %v3923_v37 = vpop.permute.xlu1 %3922  ;;  %v3930_v38 = vpop.permute.xlu0 %3929 }
 0x77e   : > { %v10625_v54 = vmul.f32 %v3923_v37, %v11989_v20  ;;  %v10628_v14 = vmul.f32 %v3930_v38, %v11991_v34  ;;  %v11997_v37 = vld [vmem:[#allocation43_spill] sm:$0xff]  ;;  %v11999_v20 = vld [vmem:[#allocation60_spill] sm:$0xff] }
 0x77f   : > { %4408 = vperm.xlu1 %8277, %v10601_v53   ;;  %4411 = vperm.xlu0 %8278, %v10604_v52  }
 0x780   : > { %11990 = vst [vmem:[#allocation30_spill] sm:$0xff] %v10625_v54  ;;  %11992 = vst [vmem:[#allocation36_spill] sm:$0xff] %v10628_v14 }
 0x781   : > { %v3937_v17 = vpop.permute.xlu1 %3936  ;;  %v3944_v1 = vpop.permute.xlu0 %3943 }
 0x782   : > { %v10633_v39 = vmul.f32 %v3937_v17, %v11993_v31  ;;  %v10636_v63 = vmul.f32 %v3944_v1, %v11995_v29  ;;  %v12001_v1 = vld [vmem:[#allocation44_spill] sm:$0xff]  ;;  %v12003_v31 = vld [vmem:[#allocation61_spill] sm:$0xff] }
 0x783   : > { %4414 = vperm.xlu1 %8277, %v10609_v28   ;;  %4441 = vperm.xlu0 %8278, %v10612_v16  }
 0x784   : > { %11994 = vst [vmem:[#allocation32_spill] sm:$0xff] %v10633_v39  ;;  %11996 = vst [vmem:[#allocation46_spill] sm:$0xff] %v10636_v63 }
 0x785   : > { %v3951_v10 = vpop.permute.xlu1 %3950  ;;  %v4014_v52 = vpop.permute.xlu0 %4013 }
 0x786   : > { %v10641_v38 = vmul.f32 %v3951_v10, %v11997_v37  ;;  %v10644_v34 = vmul.f32 %v4014_v52, %v11999_v20  ;;  %v12005_v52 = vld [vmem:[#allocation45_spill] sm:$0xff]  ;;  %v12007_v20 = vld [vmem:[#allocation62_spill] sm:$0xff] }
 0x787   : > { %4444 = vperm.xlu1 %8277, %v10617_v23   ;;  %4447 = vperm.xlu0 %8278, %v10620_v24  }
 0x788   : > { %11998 = vst [vmem:[#allocation35_spill] sm:$0xff] %v10641_v38  ;;  %12000 = vst [vmem:[#allocation48_spill] sm:$0xff] %v10644_v34 }
 0x789   : > { %v4021_v28 = vpop.permute.xlu1 %4020  ;;  %v4028_v16 = vpop.permute.xlu0 %4027 }
 0x78a   : > { %v10649_v17 = vmul.f32 %v4021_v28, %v12001_v1  ;;  %v10652_v29 = vmul.f32 %v4028_v16, %v12003_v31  ;;  %v12009_v1 = vld [vmem:[#allocation47_spill] sm:$0xff] }
 0x78b   : > { %4450 = vperm.xlu1 %8277, %v10625_v54   ;;  %4453 = vperm.xlu0 %8278, %v10628_v14   ;;  %v12011_v31 = vld [vmem:[#allocation63_spill] sm:$0xff] }
 0x78c   : > { %12002 = vst [vmem:[#allocation37_spill] sm:$0xff] %v10649_v17  ;;  %12004 = vst [vmem:[#allocation50_spill] sm:$0xff] %v10652_v29 }
 0x78d   : > { %v4035_v23 = vpop.permute.xlu1 %4034  ;;  %v4042_v24 = vpop.permute.xlu0 %4041 }
 0x78e   : > { %v10657_v37 = vmul.f32 %v4035_v23, %v12005_v52  ;;  %v12013_v23 = vld [vmem:[#allocation49_spill] sm:$0xff] }
 0x78f   : > { %4456 = vperm.xlu1 %8277, %v10633_v39   ;;  %4459 = vperm.xlu0 %8278, %v10636_v63   ;;  %v10660_v63 = vmul.f32 %v4042_v24, %v12007_v20  ;;  %v12015_v24 = vld [vmem:[#allocation64_spill] sm:$0xff] }
 0x790   : > { %12006 = vst [vmem:[#allocation38_spill] sm:$0xff] %v10657_v37 }
 0x791   : > { %v4049_v54 = vpop.permute.xlu1 %4048  ;;  %v4056_v14 = vpop.permute.xlu0 %4055  ;;  %12008 = vst [vmem:[#allocation52_spill] sm:$0xff] %v10660_v63 }
 0x792   : > { %v10665_v16 = vmul.f32 %v4049_v54, %v12009_v1  ;;  %v12017_v1 = vld [vmem:[#allocation51_spill] sm:$0xff] }
 0x793   : > { %4462 = vperm.xlu1 %8277, %v10641_v38   ;;  %4489 = vperm.xlu0 %8278, %v10644_v34   ;;  %v10668_v34 = vmul.f32 %v4056_v14, %v12011_v31  ;;  %v12019_v31 = vld [vmem:[#allocation65_spill] sm:$0xff] }
 0x794   : > { %12010 = vst [vmem:[#allocation39_spill] sm:$0xff] %v10665_v16 }
 0x795   : > { %v4063_v39 = vpop.permute.xlu1 %4062  ;;  %v4126_v10 = vpop.permute.xlu0 %4125  ;;  %12012 = vst [vmem:[#allocation54_spill] sm:$0xff] %v10668_v34 }
 0x796   : > { %v10673_v52 = vmul.f32 %v4063_v39, %v12013_v23  ;;  %v10676_v20 = vmul.f32 %v4126_v10, %v12015_v24  ;;  %v12021_v23 = vld [vmem:[#allocation53_spill] sm:$0xff]  ;;  %v12023_v24 = vld [vmem:[#allocation66_spill] sm:$0xff] }
 0x797   : > { %4492 = vperm.xlu1 %8277, %v10649_v17   ;;  %4495 = vperm.xlu0 %8278, %v10652_v29  }
 0x798   : > { %12014 = vst [vmem:[#allocation40_spill] sm:$0xff] %v10673_v52  ;;  %12016 = vst [vmem:[#allocation56_spill] sm:$0xff] %v10676_v20 }
 0x799   : > { %v4133_v28 = vpop.permute.xlu1 %4132  ;;  %v4140_v17 = vpop.permute.xlu0 %4139 }
 0x79a   : > { %v10681_v14 = vmul.f32 %v4133_v28, %v12017_v1  ;;  %v12025_v28 = vld [vmem:[#allocation55_spill] sm:$0xff] }
 0x79b   : > { %4498 = vperm.xlu1 %8277, %v10657_v37   ;;  %4501 = vperm.xlu0 %8278, %v10660_v63   ;;  %v10684_v63 = vmul.f32 %v4140_v17, %v12019_v31  ;;  %v12027_v17 = vld [vmem:[#allocation67_spill] sm:$0xff] }
 0x79c   : > { %12018 = vst [vmem:[#allocation41_spill] sm:$0xff] %v10681_v14 }
 0x79d   : > { %v4147_v29 = vpop.permute.xlu1 %4146  ;;  %v4154_v54 = vpop.permute.xlu0 %4153  ;;  %12020 = vst [vmem:[#allocation58_spill] sm:$0xff] %v10684_v63 }
 0x79e   : > { %v10689_v10 = vmul.f32 %v4147_v29, %v12021_v23  ;;  %v12029_v29 = vld [vmem:[#allocation57_spill] sm:$0xff] }
 0x79f   : > { %4504 = vperm.xlu1 %8277, %v10665_v16   ;;  %4507 = vperm.xlu0 %8278, %v10668_v34   ;;  %v10692_v34 = vmul.f32 %v4154_v54, %v12023_v24 }
 0x7a0   : > { %12022 = vst [vmem:[#allocation42_spill] sm:$0xff] %v10689_v10 }
 0x7a1   : > { %v4161_v39 = vpop.permute.xlu1 %4160  ;;  %12024 = vst [vmem:[#allocation59_spill] sm:$0xff] %v10692_v34 }
 0x7a2   : > { %v10697_v1 = vmul.f32 %v4161_v39, %v12025_v28 }
 0x7a3   : > { %4510 = vperm.xlu1 %8277, %v10673_v52   ;;  %4537 = vperm.xlu0 %8278, %v10676_v20   ;;  %v4168_v52 = vpop.permute.xlu0 %4167 }
 0x7a4   : > { %12026 = vst [vmem:[#allocation43_spill] sm:$0xff] %v10697_v1  ;;  %v10700_v31 = vmul.f32 %v4168_v52, %v12027_v17 }
 0x7a5   : > { %v4175_v20 = vpop.permute.xlu1 %4174 }
 0x7a6   : > { %12028 = vst [vmem:[#allocation60_spill] sm:$0xff] %v10700_v31  ;;  %v10705_v23 = vmul.f32 %v4175_v20, %v12029_v29 }
 0x7a7   : > { %4540 = vperm.xlu1 %8277, %v10681_v14   ;;  %4543 = vperm.xlu0 %8278, %v10684_v63  }
 0x7a8   : > { %12030 = vst [vmem:[#allocation44_spill] sm:$0xff] %v10705_v23 }
 0x7ab   : > { %4546 = vperm.xlu1 %8277, %v10689_v10   ;;  %4549 = vperm.xlu0 %8278, %v10692_v34  }
 0x7af   : > { %4552 = vperm.xlu1 %8277, %v10697_v1   ;;  %4555 = vperm.xlu0 %8278, %v10700_v31  }
 0x7b2   : > { %v4370_v54 = vpop.permute.xlu0 %4369 }
 0x7b3   : > { %4558 = vperm.xlu1 %8277, %v10705_v23   ;;  %v4563_v52 = vrot.slane %v4370_v54, %v9753_v13 }
 0x7b6   : > { %v4373_v24 = vpop.permute.xlu1 %4372  ;;  %v4376_v10 = vpop.permute.xlu0 %4375 }
 0x7b7   : > { %v4567_v34 = vrot.slane %v4373_v24, %v9753_v13  ;;  %v4571_v17 = vrot.slane %v4376_v10, %v9753_v13 }
 0x7b9   : > { %v4816_v1 = vsel %vm2525_vm6, %v4567_v34, %v4563_v52 }
 0x7ba   : > { %v4379_v39 = vpop.permute.xlu1 %4378  ;;  %v4382_v28 = vpop.permute.xlu0 %4381  ;;  %v4817_v29 = vsel %vm2527_vm7, %v4571_v17, %v4816_v1 }
 0x7bb   : > { %v4575_v31 = vrot.slane %v4379_v39, %v9753_v13  ;;  %v4579_v23 = vrot.slane %v4382_v28, %v9753_v13 }
 0x7bd   : > { %v4818_v14 = vsel %vm2529_vm8, %v4575_v31, %v4817_v29 }
 0x7be   : > { %v4385_v63 = vpop.permute.xlu1 %4384  ;;  %v4388_v20 = vpop.permute.xlu0 %4387  ;;  %v4819_v54 = vsel %vm2531_vm9, %v4579_v23, %v4818_v14 }
 0x7bf   : > { %v4583_v24 = vrot.slane %v4385_v63, %v9753_v13  ;;  %v4587_v10 = vrot.slane %v4388_v20, %v9753_v13 }
 0x7c1   : > { %v4820_v34 = vsel %vm2533_vm10, %v4583_v24, %v4819_v54 }
 0x7c2   : > { %v4391_v16 = vpop.permute.xlu1 %4390  ;;  %v4418_v37 = vpop.permute.xlu0 %4417  ;;  %v4821_v17 = vsel %vm2535_vm11, %v4587_v10, %v4820_v34 }
 0x7c3   : > { %v4591_v39 = vrot.slane %v4391_v16, %v9753_v13  ;;  %v4627_v1 = vrot.slane %v4418_v37, %v9753_v13 }
 0x7c5   : > { %v4822_v23 = vsel %vm2537_vm12, %v4591_v39, %v4821_v17 }
 0x7c6   : > { %v4421_v52 = vpop.permute.xlu1 %4420  ;;  %v4424_v38 = vpop.permute.xlu0 %4423  ;;  %v4880_v54 = vsel %vm2596_vm13, %v4822_v23, -inf }
 0x7c7   : > { %v4631_v28 = vrot.slane %v4421_v52, %v9753_v13  ;;  %v4635_v31 = vrot.slane %v4424_v38, %v9753_v13 }
 0x7c9   : > { %v4830_v63 = vsel %vm2525_vm6, %v4631_v28, %v4627_v1 }
 0x7ca   : > { %v4427_v29 = vpop.permute.xlu1 %4426  ;;  %v4430_v14 = vpop.permute.xlu0 %4429  ;;  %v4831_v16 = vsel %vm2527_vm7, %v4635_v31, %v4830_v63 }
 0x7cb   : > { %v4639_v20 = vrot.slane %v4427_v29, %v9753_v13  ;;  %v4643_v24 = vrot.slane %v4430_v14, %v9753_v13 }
 0x7cd   : > { %v4832_v37 = vsel %vm2529_vm8, %v4639_v20, %v4831_v16 }
 0x7ce   : > { %v4433_v52 = vpop.permute.xlu1 %4432  ;;  %4881 = vmax.xlane.f32.xlu0 %v4880_v54  ;;  %v4436_v38 = vpop.permute.xlu0 %4435  ;;  %v4833_v10 = vsel %vm2531_vm9, %v4643_v24, %v4832_v37 }
 0x7cf   : > { %v4647_v1 = vrot.slane %v4433_v52, %v9753_v13  ;;  %v4651_v34 = vrot.slane %v4436_v38, %v9753_v13 }
 0x7d1   : > { %v4834_v39 = vsel %vm2533_vm10, %v4647_v1, %v4833_v10 }
 0x7d2   : > { %v4439_v28 = vpop.permute.xlu1 %4438  ;;  %v4466_v17 = vpop.permute.xlu0 %4465  ;;  %v4835_v63 = vsel %vm2535_vm11, %v4651_v34, %v4834_v39 }
 0x7d3   : > { %v4655_v31 = vrot.slane %v4439_v28, %v9753_v13  ;;  %v4691_v16 = vrot.slane %v4466_v17, %v9753_v13 }
 0x7d5   : > { %v4836_v29 = vsel %vm2537_vm12, %v4655_v31, %v4835_v63 }
 0x7d6   : > { %v4469_v14 = vpop.permute.xlu1 %4468  ;;  %v4472_v23 = vpop.permute.xlu0 %4471  ;;  %v4886_v20 = vsel %vm2596_vm13, %v4836_v29, -inf }
 0x7d7   : > { %v4695_v24 = vrot.slane %v4469_v14, %v9753_v13  ;;  %4887 = vmax.xlane.f32.xlu0 %v4886_v20  ;;  %v4699_v37 = vrot.slane %v4472_v23, %v9753_v13 }
 0x7d9   : > { %v4844_v54 = vsel %vm2525_vm6, %v4695_v24, %v4691_v16 }
 0x7da   : > { %v4475_v52 = vpop.permute.xlu1 %4474  ;;  %v4478_v38 = vpop.permute.xlu0 %4477  ;;  %v4845_v10 = vsel %vm2527_vm7, %v4699_v37, %v4844_v54 }
 0x7db   : > { %v4703_v1 = vrot.slane %v4475_v52, %v9753_v13  ;;  %v4707_v34 = vrot.slane %v4478_v38, %v9753_v13 }
 0x7dd   : > { %v4846_v39 = vsel %vm2529_vm8, %v4703_v1, %v4845_v10 }
 0x7de   : > { %v4481_v28 = vpop.permute.xlu1 %4480  ;;  %v4484_v31 = vpop.permute.xlu0 %4483  ;;  %v4847_v63 = vsel %vm2531_vm9, %v4707_v34, %v4846_v39 }
 0x7df   : > { %v4711_v17 = vrot.slane %v4481_v28, %v9753_v13  ;;  %v4715_v29 = vrot.slane %v4484_v31, %v9753_v13 }
 0x7e1   : > { %v4848_v14 = vsel %vm2533_vm10, %v4711_v17, %v4847_v63 }
 0x7e2   : > { %v4487_v23 = vpop.permute.xlu1 %4486  ;;  %v4514_v20 = vpop.permute.xlu0 %4513  ;;  %v4849_v24 = vsel %vm2535_vm11, %v4715_v29, %v4848_v14 }
 0x7e3   : > { %v4719_v16 = vrot.slane %v4487_v23, %v9753_v13  ;;  %v4755_v1 = vrot.slane %v4514_v20, %v9753_v13 }
 0x7e5   : > { %v4850_v37 = vsel %vm2537_vm12, %v4719_v16, %v4849_v24 }
 0x7e6   : > { %v4517_v54 = vpop.permute.xlu1 %4516  ;;  %v4520_v52 = vpop.permute.xlu0 %4519  ;;  %v4892_v38 = vsel %vm2596_vm13, %v4850_v37, -inf }
 0x7e7   : > { %v4759_v10 = vrot.slane %v4517_v54, %v9753_v13  ;;  %4893 = vmax.xlane.f32.xlu1 %v4892_v38  ;;  %v4763_v34 = vrot.slane %v4520_v52, %v9753_v13 }
 0x7e9   : > { %v4858_v39 = vsel %vm2525_vm6, %v4759_v10, %v4755_v1 }
 0x7ea   : > { %v4523_v28 = vpop.permute.xlu1 %4522  ;;  %v4526_v31 = vpop.permute.xlu0 %4525  ;;  %v4859_v63 = vsel %vm2527_vm7, %v4763_v34, %v4858_v39 }
 0x7eb   : > { %v4767_v17 = vrot.slane %v4523_v28, %v9753_v13  ;;  %v4771_v29 = vrot.slane %v4526_v31, %v9753_v13 }
 0x7ed   : > { %v4860_v14 = vsel %vm2529_vm8, %v4767_v17, %v4859_v63 }
 0x7ee   : > { %v4529_v23 = vpop.permute.xlu1 %4528  ;;  %v4532_v16 = vpop.permute.xlu0 %4531  ;;  %v4861_v24 = vsel %vm2531_vm9, %v4771_v29, %v4860_v14 }
 0x7ef   : > { %v4775_v20 = vrot.slane %v4529_v23, %v9753_v13  ;;  %v4779_v37 = vrot.slane %v4532_v16, %v9753_v13 }
 0x7f1   : > { %v4862_v54 = vsel %vm2533_vm10, %v4775_v20, %v4861_v24 }
 0x7f2   : > { %v4535_v52 = vpop.permute.xlu1 %4534  ;;  %v4394_v38 = vpop.permute.xlu0 %4393  ;;  %v4863_v10 = vsel %vm2535_vm11, %v4779_v37, %v4862_v54 }
 0x7f3   : > { %v4783_v1 = vrot.slane %v4535_v52, %v9753_v13  ;;  %v4595_v17 = vrot.slane %v4394_v38, %v9753_v13 }
 0x7f5   : > { %v4864_v34 = vsel %vm2537_vm12, %v4783_v1, %v4863_v10 }
 0x7f6   : > { %v4397_v39 = vpop.permute.xlu1 %4396  ;;  %v4400_v28 = vpop.permute.xlu0 %4399  ;;  %v4898_v31 = vsel %vm2596_vm13, %v4864_v34, -inf }
 0x7f7   : > { %v4599_v63 = vrot.slane %v4397_v39, %v9753_v13  ;;  %4899 = vmax.xlane.f32.xlu1 %v4898_v31  ;;  %v4603_v29 = vrot.slane %v4400_v28, %v9753_v13 }
 0x7f9   : > { %v4823_v14 = vsel %vm2525_vm6, %v4599_v63, %v4595_v17 }
 0x7fa   : > { %v4403_v23 = vpop.permute.xlu1 %4402  ;;  %v4406_v16 = vpop.permute.xlu0 %4405  ;;  %v4824_v24 = vsel %vm2527_vm7, %v4603_v29, %v4823_v14 }
 0x7fb   : > { %v4607_v20 = vrot.slane %v4403_v23, %v9753_v13  ;;  %v4611_v37 = vrot.slane %v4406_v16, %v9753_v13 }
 0x7fd   : > { %v4825_v54 = vsel %vm2529_vm8, %v4607_v20, %v4824_v24 }
 0x7fe   : > { %v4409_v52 = vpop.permute.xlu1 %4408  ;;  %v4412_v1 = vpop.permute.xlu0 %4411  ;;  %v4826_v10 = vsel %vm2531_vm9, %v4611_v37, %v4825_v54 }
 0x7ff   : > { %v4615_v38 = vrot.slane %v4409_v52, %v9753_v13  ;;  %v4619_v34 = vrot.slane %v4412_v1, %v9753_v13 }
 0x801   : > { %v4827_v39 = vsel %vm2533_vm10, %v4615_v38, %v4826_v10 }
 0x802   : > { %v4415_v28 = vpop.permute.xlu1 %4414  ;;  %v4442_v31 = vpop.permute.xlu0 %4441  ;;  %v4828_v63 = vsel %vm2535_vm11, %v4619_v34, %v4827_v39 }
 0x803   : > { %v4623_v17 = vrot.slane %v4415_v28, %v9753_v13  ;;  %v4659_v20 = vrot.slane %v4442_v31, %v9753_v13 }
 0x805   : > { %v4829_v29 = vsel %vm2537_vm12, %v4623_v17, %v4828_v63 }
 0x806   : > { %v4445_v14 = vpop.permute.xlu1 %4444  ;;  %v4448_v23 = vpop.permute.xlu0 %4447  ;;  %v4883_v16 = vsel %vm2596_vm13, %v4829_v29, -inf }
 0x807   : > { %v4663_v24 = vrot.slane %v4445_v14, %v9753_v13  ;;  %4884 = vmax.xlane.f32.xlu1 %v4883_v16  ;;  %v4667_v37 = vrot.slane %v4448_v23, %v9753_v13 }
 0x809   : > { %v4837_v54 = vsel %vm2525_vm6, %v4663_v24, %v4659_v20 }
 0x80a   : > { %v4451_v52 = vpop.permute.xlu1 %4450  ;;  %v4454_v1 = vpop.permute.xlu0 %4453  ;;  %v4838_v10 = vsel %vm2527_vm7, %v4667_v37, %v4837_v54 }
 0x80b   : > { %v4671_v38 = vrot.slane %v4451_v52, %v9753_v13  ;;  %v4675_v34 = vrot.slane %v4454_v1, %v9753_v13 }
 0x80d   : > { %v4839_v39 = vsel %vm2529_vm8, %v4671_v38, %v4838_v10 }
 0x80e   : > { %v4457_v28 = vpop.permute.xlu1 %4456  ;;  %v4460_v17 = vpop.permute.xlu0 %4459  ;;  %v4840_v63 = vsel %vm2531_vm9, %v4675_v34, %v4839_v39 }
 0x80f   : > { %v4679_v31 = vrot.slane %v4457_v28, %v9753_v13  ;;  %v4683_v29 = vrot.slane %v4460_v17, %v9753_v13 }
 0x811   : > { %v4841_v14 = vsel %vm2533_vm10, %v4679_v31, %v4840_v63 }
 0x812   : > { %v4463_v23 = vpop.permute.xlu1 %4462  ;;  %v4490_v16 = vpop.permute.xlu0 %4489  ;;  %v4842_v24 = vsel %vm2535_vm11, %v4683_v29, %v4841_v14 }
 0x813   : > { %v4687_v20 = vrot.slane %v4463_v23, %v9753_v13  ;;  %v4723_v38 = vrot.slane %v4490_v16, %v9753_v13 }
 0x815   : > { %v4843_v37 = vsel %vm2537_vm12, %v4687_v20, %v4842_v24 }
 0x816   : > { %v4493_v54 = vpop.permute.xlu1 %4492  ;;  %v4496_v52 = vpop.permute.xlu0 %4495  ;;  %v4889_v1 = vsel %vm2596_vm13, %v4843_v37, -inf }
 0x817   : > { %v4727_v10 = vrot.slane %v4493_v54, %v9753_v13  ;;  %4890 = vmax.xlane.f32.xlu0 %v4889_v1  ;;  %v4731_v34 = vrot.slane %v4496_v52, %v9753_v13 }
 0x819   : > { %v4851_v39 = vsel %vm2525_vm6, %v4727_v10, %v4723_v38 }
 0x81a   : > { %v4499_v28 = vpop.permute.xlu1 %4498  ;;  %v4502_v17 = vpop.permute.xlu0 %4501  ;;  %v4852_v63 = vsel %vm2527_vm7, %v4731_v34, %v4851_v39 }
 0x81b   : > { %v4735_v31 = vrot.slane %v4499_v28, %v9753_v13  ;;  %v4739_v29 = vrot.slane %v4502_v17, %v9753_v13 }
 0x81d   : > { %v4853_v14 = vsel %vm2529_vm8, %v4735_v31, %v4852_v63 }
 0x81e   : > { %v4505_v23 = vpop.permute.xlu1 %4504  ;;  %v4508_v20 = vpop.permute.xlu0 %4507  ;;  %v4854_v24 = vsel %vm2531_vm9, %v4739_v29, %v4853_v14 }
 0x81f   : > { %v4743_v16 = vrot.slane %v4505_v23, %v9753_v13  ;;  %v4747_v37 = vrot.slane %v4508_v20, %v9753_v13 }
 0x821   : > { %v4855_v54 = vsel %vm2533_vm10, %v4743_v16, %v4854_v24 }
 0x822   : > { %v4511_v52 = vpop.permute.xlu1 %4510  ;;  %v4538_v1 = vpop.permute.xlu0 %4537  ;;  %v4856_v10 = vsel %vm2535_vm11, %v4747_v37, %v4855_v54 }
 0x823   : > { %v4751_v38 = vrot.slane %v4511_v52, %v9753_v13  ;;  %v4787_v31 = vrot.slane %v4538_v1, %v9753_v13 }
 0x825   : > { %v4857_v34 = vsel %vm2537_vm12, %v4751_v38, %v4856_v10 }
 0x826   : > { %v4541_v39 = vpop.permute.xlu1 %4540  ;;  %v4544_v28 = vpop.permute.xlu0 %4543  ;;  %v4895_v17 = vsel %vm2596_vm13, %v4857_v34, -inf }
 0x827   : > { %v4791_v63 = vrot.slane %v4541_v39, %v9753_v13  ;;  %4896 = vmax.xlane.f32.xlu0 %v4895_v17  ;;  %v4795_v29 = vrot.slane %v4544_v28, %v9753_v13 }
 0x829   : > { %v4865_v14 = vsel %vm2525_vm6, %v4791_v63, %v4787_v31 }
 0x82a   : > { %v4547_v23 = vpop.permute.xlu1 %4546  ;;  %v4550_v20 = vpop.permute.xlu0 %4549  ;;  %v4866_v24 = vsel %vm2527_vm7, %v4795_v29, %v4865_v14 }
 0x82b   : > { %v4799_v16 = vrot.slane %v4547_v23, %v9753_v13  ;;  %v4803_v37 = vrot.slane %v4550_v20, %v9753_v13 }
 0x82d   : > { %v4867_v54 = vsel %vm2529_vm8, %v4799_v16, %v4866_v24 }
 0x82e   : > { %v4553_v52 = vpop.permute.xlu1 %4552  ;;  %v4556_v38 = vpop.permute.xlu0 %4555  ;;  %v4868_v10 = vsel %vm2531_vm9, %v4803_v37, %v4867_v54 }
 0x82f   : > { %v4807_v1 = vrot.slane %v4553_v52, %v9753_v13  ;;  %v4811_v34 = vrot.slane %v4556_v38, %v9753_v13 }
 0x831   : > { %v4869_v39 = vsel %vm2533_vm10, %v4807_v1, %v4868_v10 }
 0x832   : > { %v4559_v28 = vpop.permute.xlu1 %4558  ;;  %v4870_v31 = vsel %vm2535_vm11, %v4811_v34, %v4869_v39 }
 0x833   : > { %v4815_v17 = vrot.slane %v4559_v28, %v9753_v13 }
 0x835   : > { %v4871_v63 = vsel %vm2537_vm12, %v4815_v17, %v4870_v31 }
 0x836   : > { %v4901_v29 = vsel %vm2596_vm13, %v4871_v63, -inf }
 0x837   : > { %4902 = vmax.xlane.f32.xlu0 %v4901_v29 }
 0x85b   : > { %v4882_v14 = vpop.xlane.xlu0 %4881 }
 0x85c   : > { %v4915_v23 = vrot.slane %v4882_v14, %v8985_v59  ;;  %v4919_v20 = vrot.slane %v4882_v14, %v9014_v8  ;;  %v4923_v16 = vrot.slane %v4882_v14, %v9926_v11  ;;  %v4931_v24 = vrot.slane %v4882_v14, %v9929_v51 }
 0x85d   : > { %v4927_v37 = vrot.slane %v4882_v14, %v9941_v3  ;;  %v4939_v1 = vrot.slane %v4882_v14, %v9938_v44  ;;  %v4935_v28 = vrot.slane %v4882_v14, %v9954_v33 }
 0x85e   : > { %v5232_v54 = vsub.f32 %v10452_v60, %v4915_v23  ;;  %v5233_v52 = vsub.f32 %v10457_v18, %v4919_v20  ;;  %v5234_v38 = vsub.f32 %v10460_v48, %v4923_v16  ;;  %v5236_v10 = vsub.f32 %v10465_v41, %v4931_v24 }
 0x85f   : > { %v5235_v17 = vsub.f32 %v10468_v0, %v4927_v37  ;;  %v5238_v63 = vsub.f32 %v10473_v5, %v4939_v1  ;;  %v4943_v48 = vrot.slane %v4882_v14, %v9965_v30  ;;  %v5237_v23 = vsub.f32 %v10476_v2, %v4935_v28 }
 0x860   : > { %v5296_v34 = vmul.f32 1.442695, %v5232_v54  ;;  %v5298_v39 = vmul.f32 1.442695, %v5233_v52  ;;  %v5300_v31 = vmul.f32 1.442695, %v5234_v38 }
 0x861   : > { %v5304_v60 = vmul.f32 1.442695, %v5236_v10  ;;  %v5302_v41 = vmul.f32 1.442695, %v5235_v17  ;;  %v5308_v20 = vmul.f32 1.442695, %v5238_v63  ;;  %v5239_v24 = vsub.f32 %v10481_v56, %v4943_v48 }
 0x862   : > { %8287 = vpow2.f32 %v5296_v34  ;;  %v5306_v5 = vmul.f32 1.442695, %v5237_v23 }
 0x863   : > { %8289 = vpow2.f32 %v5298_v39 }
 0x864   : > { %v4888_v29 = vpop.xlane.xlu0 %4887  ;;  %8291 = vpow2.f32 %v5300_v31 }
 0x865   : > { %v4979_v18 = vrot.slane %v4888_v29, %v8985_v59  ;;  %8293 = vpow2.f32 %v5304_v60  ;;  %v4987_v16 = vrot.slane %v4888_v29, %v9926_v11  ;;  %v4983_v37 = vrot.slane %v4888_v29, %v9014_v8 }
 0x866   : > { %8295 = vpow2.f32 %v5302_v41  ;;  %v4995_v54 = vrot.slane %v4888_v29, %v9929_v51  ;;  %v4991_v56 = vrot.slane %v4888_v29, %v9941_v3  ;;  %v5003_v10 = vrot.slane %v4888_v29, %v9938_v44 }
 0x867   : > { %v5248_v0 = vsub.f32 %v10484_v58, %v4979_v18  ;;  %8297 = vpow2.f32 %v5308_v20  ;;  %v5250_v14 = vsub.f32 %v10492_v21, %v4987_v16  ;;  %v5310_v58 = vmul.f32 1.442695, %v5239_v24 }
 0x868   : > { %8299 = vpow2.f32 %v5306_v5  ;;  %v5249_v1 = vsub.f32 %v10489_v7, %v4983_v37  ;;  %v5252_v34 = vsub.f32 %v10500_v19, %v4995_v54  ;;  %v4999_v17 = vrot.slane %v4888_v29, %v9954_v33 }
 0x869   : > { %v5328_v2 = vmul.f32 1.442695, %v5248_v0  ;;  %v5332_v21 = vmul.f32 1.442695, %v5250_v14  ;;  %v5251_v31 = vsub.f32 %v10497_v12, %v4991_v56  ;;  %v5254_v63 = vsub.f32 %v10508_v62, %v5003_v10 }
 0x86a   : > { %v5330_v7 = vmul.f32 1.442695, %v5249_v1  ;;  %v5336_v19 = vmul.f32 1.442695, %v5252_v34  ;;  %v5007_v12 = vrot.slane %v4888_v29, %v9965_v30  ;;  %v5253_v41 = vsub.f32 %v10505_v4, %v4999_v17 }
 0x86b   : > { %8301 = vpow2.f32 %v5328_v2  ;;  %v5334_v20 = vmul.f32 1.442695, %v5251_v31  ;;  %v5340_v62 = vmul.f32 1.442695, %v5254_v63 }
 0x86c   : > { %v10858_v52 = vpop.eup %8287  ;;  %8303 = vpow2.f32 %v5310_v58  ;;  %v5255_v29 = vsub.f32 %v10513_v9, %v5007_v12  ;;  %v5338_v4 = vmul.f32 1.442695, %v5253_v41 }
 0x86d   : > { %v10860_v38 = vpop.eup %8289  ;;  %5489 = vperm.xlu1 %8277, %v10858_v52   ;;  %8305 = vpow2.f32 %v5332_v21 }
 0x86e   : > { %5492 = vperm.xlu0 %8278, %v10860_v38   ;;  %v10868_v39 = vpop.eup %8291  ;;  %8307 = vpow2.f32 %v5330_v7  ;;  %v5342_v9 = vmul.f32 1.442695, %v5255_v29 }
 0x86f   : > { %v10870_v28 = vpop.eup %8293  ;;  %8309 = vpow2.f32 %v5336_v19 }
 0x870   : > { %v10877_v60 = vpop.eup %8295  ;;  %8311 = vpow2.f32 %v5334_v20 }
 0x871   : > { %5495 = vperm.xlu1 %8277, %v10868_v39   ;;  %v10881_v48 = vpop.eup %8297  ;;  %8313 = vpow2.f32 %v5340_v62 }
 0x872   : > { %5501 = vperm.xlu0 %8278, %v10870_v28   ;;  %v10892_v24 = vpop.eup %8299  ;;  %8315 = vpow2.f32 %v5338_v4 }
 0x874   : > { %v10879_v18 = vpop.xlane.xlu1 %4893 }
 0x875   : > { %v5043_v23 = vrot.slane %v10879_v18, %v8985_v59  ;;  %5498 = vperm.xlu1 %8277, %v10877_v60   ;;  %v5051_v16 = vrot.slane %v10879_v18, %v9926_v11  ;;  %v10894_v5 = vpop.eup %8301  ;;  %v5047_v37 = vrot.slane %v10879_v18, %v9014_v8  ;;  %v5059_v54 = vrot.slane %v10879_v18, %v9929_v51 }
 0x876   : > { %5507 = vperm.xlu0 %8278, %v10881_v48   ;;  %v10904_v2 = vpop.eup %8303  ;;  %v5055_v56 = vrot.slane %v10879_v18, %v9941_v3  ;;  %v5067_v10 = vrot.slane %v10879_v18, %v9938_v44  ;;  %v5063_v31 = vrot.slane %v10879_v18, %v9954_v33  ;;  %v5071_v20 = vrot.slane %v10879_v18, %v9965_v30 }
 0x877   : > { %v5264_v0 = vsub.f32 %v10516_v35, %v5043_v23  ;;  %v5266_v35 = vsub.f32 %v10524_v49, %v5051_v16  ;;  %v10906_v58 = vpop.eup %8305  ;;  %v5265_v1 = vsub.f32 %v10521_v32, %v5047_v37  ;;  %v5268_v49 = vsub.f32 %v10532_v6, %v5059_v54 }
 0x878   : > { %v10916_v21 = vpop.eup %8307  ;;  %v5267_v32 = vsub.f32 %v10529_v15, %v5055_v56  ;;  %v5270_v63 = vsub.f32 %v10540_v42, %v5067_v10  ;;  %v5269_v15 = vsub.f32 %v10537_v50, %v5063_v31  ;;  %v5271_v18 = vsub.f32 %v10545_v57, %v5071_v20 }
 0x879   : > { %5504 = vperm.xlu1 %8277, %v10892_v24   ;;  %v5360_v14 = vmul.f32 1.442695, %v5264_v0  ;;  %v5364_v34 = vmul.f32 1.442695, %v5266_v35  ;;  %v10918_v17 = vpop.eup %8309  ;;  %v5362_v7 = vmul.f32 1.442695, %v5265_v1 }
 0x87a   : > { %5537 = vperm.xlu0 %8278, %v10894_v5   ;;  %v5368_v6 = vmul.f32 1.442695, %v5268_v49  ;;  %v10926_v19 = vpop.eup %8311  ;;  %v5366_v62 = vmul.f32 1.442695, %v5267_v32  ;;  %v5372_v42 = vmul.f32 1.442695, %v5270_v63 }
 0x87b   : > { %8317 = vpow2.f32 %v5360_v14  ;;  %v10928_v12 = vpop.eup %8313  ;;  %v5370_v50 = vmul.f32 1.442695, %v5269_v15  ;;  %v5374_v57 = vmul.f32 1.442695, %v5271_v18 }
 0x87c   : > { %8319 = vpow2.f32 %v5342_v9  ;;  %v10938_v29 = vpop.eup %8315 }
 0x87d   : > { %5510 = vperm.xlu1 %8277, %v10904_v2   ;;  %8321 = vpow2.f32 %v5364_v34 }
 0x87e   : > { %5543 = vperm.xlu0 %8278, %v10906_v58   ;;  %8323 = vpow2.f32 %v5362_v7 }
 0x87f   : > { %8325 = vpow2.f32 %v5368_v6 }
 0x880   : > { %8327 = vpow2.f32 %v5366_v62 }
 0x881   : > { %5540 = vperm.xlu1 %8277, %v10916_v21   ;;  %8329 = vpow2.f32 %v5372_v42 }
 0x882   : > { %5549 = vperm.xlu0 %8278, %v10918_v17   ;;  %8331 = vpow2.f32 %v5370_v50 }
 0x884   : > { %v4900_v23 = vpop.xlane.xlu1 %4899 }
 0x885   : > { %v5107_v41 = vrot.slane %v4900_v23, %v8985_v59  ;;  %5546 = vperm.xlu1 %8277, %v10926_v19   ;;  %v5115_v16 = vrot.slane %v4900_v23, %v9926_v11  ;;  %v10940_v4 = vpop.eup %8317  ;;  %v5111_v37 = vrot.slane %v4900_v23, %v9014_v8  ;;  %v5123_v54 = vrot.slane %v4900_v23, %v9929_v51 }
 0x886   : > { %5555 = vperm.xlu0 %8278, %v10928_v12   ;;  %v10948_v14 = vpop.eup %8319  ;;  %v5119_v56 = vrot.slane %v4900_v23, %v9941_v3  ;;  %v5131_v10 = vrot.slane %v4900_v23, %v9938_v44  ;;  %v5127_v32 = vrot.slane %v4900_v23, %v9954_v33  ;;  %v5135_v63 = vrot.slane %v4900_v23, %v9965_v30 }
 0x887   : > { %v5280_v0 = vsub.f32 %v10548_v45, %v5107_v41  ;;  %v5282_v35 = vsub.f32 %v10556_v40, %v5115_v16  ;;  %v10950_v9 = vpop.eup %8321  ;;  %v5281_v1 = vsub.f32 %v10553_v25, %v5111_v37  ;;  %v5284_v49 = vsub.f32 %v10564_v46, %v5123_v54 }
 0x888   : > { %v10958_v34 = vpop.eup %8323  ;;  %v5283_v7 = vsub.f32 %v10561_v55, %v5119_v56  ;;  %v5286_v46 = vsub.f32 %v10572_v36, %v5131_v10  ;;  %v5285_v62 = vsub.f32 %v10569_v27, %v5127_v32  ;;  %v5287_v23 = vsub.f32 %v10577_v22, %v5135_v63 }
 0x889   : > { %5552 = vperm.xlu1 %8277, %v10938_v29   ;;  %v5392_v45 = vmul.f32 1.442695, %v5280_v0  ;;  %v5396_v40 = vmul.f32 1.442695, %v5282_v35  ;;  %v10960_v31 = vpop.eup %8325  ;;  %v5394_v25 = vmul.f32 1.442695, %v5281_v1 }
 0x88a   : > { %5585 = vperm.xlu0 %8278, %v10940_v4   ;;  %v5400_v6 = vmul.f32 1.442695, %v5284_v49  ;;  %v10968_v41 = vpop.eup %8327  ;;  %v5398_v55 = vmul.f32 1.442695, %v5283_v7  ;;  %v5404_v36 = vmul.f32 1.442695, %v5286_v46 }
 0x88b   : > { %8333 = vpow2.f32 %v5392_v45  ;;  %v10970_v15 = vpop.eup %8329  ;;  %v5402_v27 = vmul.f32 1.442695, %v5285_v62  ;;  %v5406_v22 = vmul.f32 1.442695, %v5287_v23  ;;  %v12031_v46 = vld [vmem:[#allocation25_spill] sm:$0xff]  ;;  %v12032_v23 = vld [vmem:[#allocation28_spill] sm:$0xff] }
 0x88c   : > { %8335 = vpow2.f32 %v5374_v57  ;;  %v10978_v0 = vpop.eup %8331 }
 0x88d   : > { %5558 = vperm.xlu1 %8277, %v10948_v14   ;;  %8337 = vpow2.f32 %v5396_v40 }
 0x88e   : > { %5591 = vperm.xlu0 %8278, %v10950_v9   ;;  %8339 = vpow2.f32 %v5394_v25 }
 0x88f   : > { %8341 = vpow2.f32 %v5400_v6 }
 0x890   : > { %8343 = vpow2.f32 %v5398_v55 }
 0x891   : > { %5588 = vperm.xlu1 %8277, %v10958_v34   ;;  %8345 = vpow2.f32 %v5404_v36 }
 0x892   : > { %5597 = vperm.xlu0 %8278, %v10960_v31   ;;  %8347 = vpow2.f32 %v5402_v27 }
 0x893   : > { %8349 = vpow2.f32 %v5406_v22 }
 0x894   : > { %v4885_v20 = vpop.xlane.xlu1 %4884 }
 0x895   : > { %5594 = vperm.xlu1 %8277, %v10968_v41   ;;  %v4951_v42 = vrot.slane %v4885_v20, %v9014_v8  ;;  %v4947_v16 = vrot.slane %v4885_v20, %v8985_v59  ;;  %v10980_v18 = vpop.eup %8333  ;;  %v4959_v50 = vrot.slane %v4885_v20, %v9941_v3  ;;  %v4955_v54 = vrot.slane %v4885_v20, %v9926_v11 }
 0x896   : > { %5603 = vperm.xlu0 %8278, %v10970_v15   ;;  %v10988_v45 = vpop.eup %8335  ;;  %v4967_v56 = vrot.slane %v4885_v20, %v9954_v33  ;;  %v4963_v10 = vrot.slane %v4885_v20, %v9929_v51  ;;  %v4975_v7 = vrot.slane %v4885_v20, %v9965_v30  ;;  %v4971_v63 = vrot.slane %v4885_v20, %v9938_v44  ;;  %v12033_v20 = vld [vmem:[#allocation31_spill] sm:$0xff] }
 0x897   : > { %v5241_v37 = vsub.f32 %v10585_v26, %v4951_v42  ;;  %v5240_v35 = vsub.f32 %v10580_v61, %v4947_v16  ;;  %v10990_v57 = vpop.eup %8337  ;;  %v5243_v1 = vsub.f32 %v10593_v47, %v4959_v50  ;;  %v5242_v49 = vsub.f32 %v10588_v43, %v4955_v54 }
 0x898   : > { %v10998_v40 = vpop.eup %8339  ;;  %v5245_v25 = vsub.f32 %v10601_v53, %v4967_v56  ;;  %v5244_v6 = vsub.f32 %v12031_v46, %v4963_v10  ;;  %v5247_v36 = vsub.f32 %v12032_v23, %v4975_v7  ;;  %v5246_v27 = vsub.f32 %v12033_v20, %v4971_v63  ;;  %v12036_v46 = vld [vmem:[#allocation30_spill] sm:$0xff] }
 0x899   : > { %5600 = vperm.xlu1 %8277, %v10978_v0   ;;  %v5314_v26 = vmul.f32 1.442695, %v5241_v37  ;;  %v5312_v61 = vmul.f32 1.442695, %v5240_v35  ;;  %v11000_v32 = vpop.eup %8341  ;;  %v5318_v47 = vmul.f32 1.442695, %v5243_v1 }
 0x89a   : > { %5633 = vperm.xlu0 %8278, %v10980_v18   ;;  %v5316_v43 = vmul.f32 1.442695, %v5242_v49  ;;  %v11008_v62 = vpop.eup %8343  ;;  %v5322_v53 = vmul.f32 1.442695, %v5245_v25  ;;  %v5320_v50 = vmul.f32 1.442695, %v5244_v6 }
 0x89b   : > { %8351 = vpow2.f32 %v5314_v26  ;;  %v11010_v42 = vpop.eup %8345  ;;  %v5326_v35 = vmul.f32 1.442695, %v5247_v36  ;;  %v12034_v1 = vld [vmem:[#allocation29_spill] sm:$0xff]  ;;  %v5324_v10 = vmul.f32 1.442695, %v5246_v27  ;;  %v12037_v36 = vld [vmem:[#allocation34_spill] sm:$0xff] }
 0x89c   : > { %8353 = vpow2.f32 %v5312_v61  ;;  %v11018_v22 = vpop.eup %8347  ;;  %v12035_v61 = vld [vmem:[#allocation33_spill] sm:$0xff] }
 0x89d   : > { %5606 = vperm.xlu1 %8277, %v10988_v45   ;;  %8355 = vpow2.f32 %v5318_v47  ;;  %v11020_v54 = vpop.eup %8349 }
 0x89e   : > { %5639 = vperm.xlu0 %8278, %v10990_v57   ;;  %8357 = vpow2.f32 %v5316_v43 }
 0x89f   : > { %8359 = vpow2.f32 %v5322_v53 }
 0x8a0   : > { %8361 = vpow2.f32 %v5320_v50 }
 0x8a1   : > { %5636 = vperm.xlu1 %8277, %v10998_v40   ;;  %8363 = vpow2.f32 %v5326_v35 }
 0x8a2   : > { %5645 = vperm.xlu0 %8278, %v11000_v32   ;;  %8365 = vpow2.f32 %v5324_v10 }
 0x8a4   : > { %v4891_v55 = vpop.xlane.xlu0 %4890 }
 0x8a5   : > { %5642 = vperm.xlu1 %8277, %v11008_v62   ;;  %v5015_v16 = vrot.slane %v4891_v55, %v9014_v8  ;;  %v5011_v37 = vrot.slane %v4891_v55, %v8985_v59  ;;  %v5023_v56 = vrot.slane %v4891_v55, %v9941_v3  ;;  %v5019_v49 = vrot.slane %v4891_v55, %v9926_v11  ;;  %v11028_v25 = vpop.eup %8351 }
 0x8a6   : > { %5651 = vperm.xlu0 %8278, %v11010_v42   ;;  %v11030_v47 = vpop.eup %8353  ;;  %v5031_v63 = vrot.slane %v4891_v55, %v9954_v33  ;;  %v5027_v23 = vrot.slane %v4891_v55, %v9929_v51  ;;  %v5039_v50 = vrot.slane %v4891_v55, %v9965_v30 }
 0x8a7   : > { %v5257_v26 = vsub.f32 %v12034_v1, %v5015_v16  ;;  %v5256_v7 = vsub.f32 %v12035_v61, %v5011_v37  ;;  %v5259_v6 = vsub.f32 %v12036_v46, %v5023_v56  ;;  %v5258_v53 = vsub.f32 %v12037_v36, %v5019_v49  ;;  %v11038_v20 = vpop.eup %8355  ;;  %v12040_v37 = vld [vmem:[#allocation32_spill] sm:$0xff]  ;;  %v12044_v36 = vld [vmem:[#allocation35_spill] sm:$0xff] }
 0x8a8   : > { %12038 = vst [vmem:[#allocation61_spill] sm:$0xff] %v11038_v20  ;;  %v11040_v27 = vpop.eup %8357  ;;  %v5261_v35 = vsub.f32 %v12040_v37, %v5031_v63  ;;  %v5035_v1 = vrot.slane %v4891_v55, %v9938_v44  ;;  %v12045_v55 = vld [vmem:[#allocation46_spill] sm:$0xff] }
 0x8a9   : > { %5648 = vperm.xlu1 %8277, %v11018_v22   ;;  %v5346_v43 = vmul.f32 1.442695, %v5257_v26  ;;  %v5344_v16 = vmul.f32 1.442695, %v5256_v7  ;;  %12039 = vst [vmem:[#allocation45_spill] sm:$0xff] %v11040_v27  ;;  %v12041_v26 = vld [vmem:[#allocation36_spill] sm:$0xff]  ;;  %v11048_v61 = vpop.eup %8359 }
 0x8aa   : > { %5654 = vperm.xlu0 %8278, %v11020_v54   ;;  %v5350_v56 = vmul.f32 1.442695, %v5259_v6  ;;  %v5260_v10 = vsub.f32 %v12041_v26, %v5027_v23  ;;  %v5348_v49 = vmul.f32 1.442695, %v5258_v53  ;;  %12042 = vst [vmem:[#allocation62_spill] sm:$0xff] %v11048_v61  ;;  %v11050_v46 = vpop.eup %8361 }
 0x8ab   : > { %8367 = vpow2.f32 %v5346_v43  ;;  %12043 = vst [vmem:[#allocation47_spill] sm:$0xff] %v11050_v46  ;;  %v5354_v63 = vmul.f32 1.442695, %v5261_v35  ;;  %v5262_v43 = vsub.f32 %v12045_v55, %v5035_v1 }
 0x8ac   : > { %8369 = vpow2.f32 %v5344_v16  ;;  %v5352_v23 = vmul.f32 1.442695, %v5260_v10  ;;  %v11058_v16 = vpop.eup %8363 }
 0x8ad   : > { %5516 = vperm.xlu1 %8277, %v11028_v25   ;;  %8371 = vpow2.f32 %v5350_v56  ;;  %12046 = vst [vmem:[#allocation63_spill] sm:$0xff] %v11058_v16  ;;  %v11060_v37 = vpop.eup %8365  ;;  %v12048_v56 = vld [vmem:[#allocation37_spill] sm:$0xff]  ;;  %v5356_v1 = vmul.f32 1.442695, %v5262_v43 }
 0x8ae   : > { %5513 = vperm.xlu0 %8278, %v11030_v47   ;;  %8373 = vpow2.f32 %v5348_v49  ;;  %12047 = vst [vmem:[#allocation49_spill] sm:$0xff] %v11060_v37  ;;  %v12049_v49 = vld [vmem:[#allocation48_spill] sm:$0xff] }
 0x8af   : > { %8375 = vpow2.f32 %v5354_v63  ;;  %v12052_v63 = vld [vmem:[#allocation38_spill] sm:$0xff] }
 0x8b0   : > { %8377 = vpow2.f32 %v5352_v23  ;;  %v12053_v23 = vld [vmem:[#allocation50_spill] sm:$0xff] }
 0x8b1   : > { %5522 = vperm.xlu1 %8277, %v11038_v20   ;;  %v5263_v20 = vsub.f32 %v12044_v36, %v5039_v50 }
 0x8b2   : > { %5519 = vperm.xlu0 %8278, %v11040_v27  }
 0x8b3   : > { %v5358_v50 = vmul.f32 1.442695, %v5263_v20 }
 0x8b4   : > { %v4897_v7 = vpop.xlane.xlu0 %4896 }
 0x8b5   : > { %5528 = vperm.xlu1 %8277, %v11048_v61   ;;  %v5079_v6 = vrot.slane %v4897_v7, %v9014_v8  ;;  %v5075_v53 = vrot.slane %v4897_v7, %v8985_v59  ;;  %v5087_v35 = vrot.slane %v4897_v7, %v9941_v3  ;;  %v5083_v10 = vrot.slane %v4897_v7, %v9926_v11  ;;  %v11068_v55 = vpop.eup %8367 }
 0x8b6   : > { %5525 = vperm.xlu0 %8278, %v11050_v46   ;;  %12050 = vst [vmem:[#allocation64_spill] sm:$0xff] %v11068_v55  ;;  %v11070_v61 = vpop.eup %8369  ;;  %8379 = vpow2.f32 %v5358_v50  ;;  %v5095_v20 = vrot.slane %v4897_v7, %v9954_v33  ;;  %v5091_v43 = vrot.slane %v4897_v7, %v9929_v51  ;;  %v5103_v50 = vrot.slane %v4897_v7, %v9965_v30 }
 0x8b7   : > { %v5273_v26 = vsub.f32 %v12048_v56, %v5079_v6  ;;  %v5272_v36 = vsub.f32 %v12049_v49, %v5075_v53  ;;  %12051 = vst [vmem:[#allocation51_spill] sm:$0xff] %v11070_v61  ;;  %8381 = vpow2.f32 %v5356_v1  ;;  %v5274_v56 = vsub.f32 %v12053_v23, %v5083_v10  ;;  %v11078_v49 = vpop.eup %8371  ;;  %v12056_v1 = vld [vmem:[#allocation52_spill] sm:$0xff] }
 0x8b8   : > { %12054 = vst [vmem:[#allocation65_spill] sm:$0xff] %v11078_v49 }
 0x8b9   : > { %5534 = vperm.xlu1 %8277, %v11058_v16   ;;  %v5275_v16 = vsub.f32 %v12052_v63, %v5087_v35  ;;  %v5378_v6 = vmul.f32 1.442695, %v5273_v26  ;;  %v5376_v53 = vmul.f32 1.442695, %v5272_v36  ;;  %v5099_v26 = vrot.slane %v4897_v7, %v9938_v44  ;;  %v12060_v7 = vld [vmem:[#allocation54_spill] sm:$0xff] }
 0x8ba   : > { %5531 = vperm.xlu0 %8278, %v11060_v37   ;;  %v11080_v37 = vpop.eup %8373  ;;  %v5276_v63 = vsub.f32 %v12056_v1, %v5091_v43  ;;  %v5380_v10 = vmul.f32 1.442695, %v5274_v56 }
 0x8bb   : > { %8383 = vpow2.f32 %v5378_v6  ;;  %v5382_v35 = vmul.f32 1.442695, %v5275_v16  ;;  %v11088_v36 = vpop.eup %8375 }
 0x8bc   : > { %8385 = vpow2.f32 %v5376_v53  ;;  %12057 = vst [vmem:[#allocation53_spill] sm:$0xff] %v11088_v36  ;;  %v5384_v6 = vmul.f32 1.442695, %v5276_v63  ;;  %v12064_v63 = vld [vmem:[#allocation56_spill] sm:$0xff] }
 0x8bd   : > { %5564 = vperm.xlu1 %8277, %v11068_v55   ;;  %v12055_v55 = vld [vmem:[#allocation39_spill] sm:$0xff]  ;;  %8387 = vpow2.f32 %v5382_v35 }
 0x8be   : > { %5561 = vperm.xlu0 %8278, %v11070_v61   ;;  %v5277_v27 = vsub.f32 %v12055_v55, %v5095_v20  ;;  %v11090_v61 = vpop.eup %8377  ;;  %v5278_v20 = vsub.f32 %v12060_v7, %v5099_v26  ;;  %8389 = vpow2.f32 %v5380_v10 }
 0x8bf   : > { %12058 = vst [vmem:[#allocation66_spill] sm:$0xff] %v11090_v61 }
 0x8c0   : > { %v5386_v55 = vmul.f32 1.442695, %v5277_v27  ;;  %v11098_v56 = vpop.eup %8379  ;;  %v5388_v26 = vmul.f32 1.442695, %v5278_v20 }
 0x8c1   : > { %5570 = vperm.xlu1 %8277, %v11078_v49   ;;  %v12059_v49 = vld [vmem:[#allocation40_spill] sm:$0xff]  ;;  %12061 = vst [vmem:[#allocation55_spill] sm:$0xff] %v11098_v56  ;;  %v11100_v53 = vpop.eup %8381 }
 0x8c2   : > { %5567 = vperm.xlu0 %8278, %v11080_v37   ;;  %v5279_v46 = vsub.f32 %v12059_v49, %v5103_v50  ;;  %12062 = vst [vmem:[#allocation67_spill] sm:$0xff] %v11100_v53  ;;  %8391 = vpow2.f32 %v5386_v55  ;;  %v12063_v50 = vld [vmem:[#allocation41_spill] sm:$0xff]  ;;  %v12067_v55 = vld [vmem:[#allocation58_spill] sm:$0xff] }
 0x8c3   : > { %8393 = vpow2.f32 %v5384_v6  ;;  %v12068_v6 = vld [vmem:[#allocation59_spill] sm:$0xff] }
 0x8c4   : > { %v4903_v23 = vpop.xlane.xlu0 %4902  ;;  %v5390_v49 = vmul.f32 1.442695, %v5279_v46 }
 0x8c5   : > { %5576 = vperm.xlu1 %8277, %v11088_v36   ;;  %v5143_v16 = vrot.slane %v4903_v23, %v9014_v8  ;;  %v5139_v43 = vrot.slane %v4903_v23, %v8985_v59  ;;  %v5147_v27 = vrot.slane %v4903_v23, %v9926_v11  ;;  %v5155_v1 = vrot.slane %v4903_v23, %v9929_v51  ;;  %v11108_v7 = vpop.eup %8383 }
 0x8c6   : > { %5573 = vperm.xlu0 %8278, %v11090_v61   ;;  %12065 = vst [vmem:[#allocation57_spill] sm:$0xff] %v11108_v7  ;;  %v11110_v36 = vpop.eup %8385  ;;  %8395 = vpow2.f32 %v5390_v49  ;;  %v5151_v46 = vrot.slane %v4903_v23, %v9941_v3  ;;  %v5163_v20 = vrot.slane %v4903_v23, %v9938_v44  ;;  %v5159_v49 = vrot.slane %v4903_v23, %v9954_v33  ;;  %v12070_v61 = vld [vmem:[#allocation42_spill] sm:$0xff] }
 0x8c7   : > { %v5289_v35 = vsub.f32 %v12063_v50, %v5143_v16  ;;  %v5288_v10 = vsub.f32 %v12064_v63, %v5139_v43  ;;  %12066 = vst [vmem:[#allocation25_spill] sm:$0xff] %v11110_v36  ;;  %8397 = vpow2.f32 %v5388_v26  ;;  %v5292_v50 = vsub.f32 %v12068_v6, %v5155_v1  ;;  %v11118_v63 = vpop.eup %8387 }
 0x8c8   : > { %12069 = vst [vmem:[#allocation28_spill] sm:$0xff] %v11118_v63  ;;  %v5167_v6 = vrot.slane %v4903_v23, %v9965_v30 }
 0x8c9   : > { %5582 = vperm.xlu1 %8277, %v11098_v56   ;;  %v5290_v56 = vsub.f32 %v12067_v55, %v5147_v27  ;;  %v5410_v16 = vmul.f32 1.442695, %v5289_v35  ;;  %v5408_v43 = vmul.f32 1.442695, %v5288_v10  ;;  %v12071_v35 = vld [vmem:[#allocation60_spill] sm:$0xff] }
 0x8ca   : > { %5579 = vperm.xlu0 %8278, %v11100_v53   ;;  %v11120_v53 = vpop.eup %8389  ;;  %v5294_v26 = vsub.f32 %v12071_v35, %v5163_v20  ;;  %v5416_v55 = vmul.f32 1.442695, %v5292_v50  ;;  %v12076_v20 = vld [vmem:[#allocation44_spill] sm:$0xff] }
 0x8cb   : > { %8399 = vpow2.f32 %v5410_v16  ;;  %v5412_v27 = vmul.f32 1.442695, %v5290_v56  ;;  %v5295_v50 = vsub.f32 %v12076_v20, %v5167_v6 }
 0x8cc   : > { %8401 = vpow2.f32 %v5408_v43  ;;  %v11127_v1 = vpop.eup %8391  ;;  %v5420_v56 = vmul.f32 1.442695, %v5294_v26 }
 0x8cd   : > { %5612 = vperm.xlu1 %8277, %v11108_v7   ;;  %v5291_v7 = vsub.f32 %v12070_v61, %v5151_v46  ;;  %v11129_v10 = vpop.eup %8393  ;;  %8403 = vpow2.f32 %v5412_v27 }
 0x8ce   : > { %5609 = vperm.xlu0 %8278, %v11110_v36   ;;  %12072 = vst [vmem:[#allocation31_spill] sm:$0xff] %v11129_v10  ;;  %v12073_v36 = vld [vmem:[#allocation43_spill] sm:$0xff]  ;;  %8405 = vpow2.f32 %v5416_v55 }
 0x8cf   : > { %v5414_v61 = vmul.f32 1.442695, %v5291_v7  ;;  %v5422_v7 = vmul.f32 1.442695, %v5295_v50 }
 0x8d0   : > { %v11135_v46 = vpop.eup %8395 }
 0x8d1   : > { %5618 = vperm.xlu1 %8277, %v11118_v63   ;;  %v5293_v63 = vsub.f32 %v12073_v36, %v5159_v49  ;;  %12074 = vst [vmem:[#allocation29_spill] sm:$0xff] %v11135_v46  ;;  %v11137_v16 = vpop.eup %8397  ;;  %8407 = vpow2.f32 %v5414_v61 }
 0x8d2   : > { %5615 = vperm.xlu0 %8278, %v11120_v53   ;;  %12075 = vst [vmem:[#allocation33_spill] sm:$0xff] %v11137_v16  ;;  %8409 = vpow2.f32 %v5420_v56 }
 0x8d3   : > { %v5418_v43 = vmul.f32 1.442695, %v5293_v63 }
 0x8d5   : > { %5624 = vperm.xlu1 %8277, %v11127_v1   ;;  %v11142_v36 = vpop.eup %8399  ;;  %8411 = vpow2.f32 %v5418_v43 }
 0x8d6   : > { %5621 = vperm.xlu0 %8278, %v11129_v10   ;;  %12077 = vst [vmem:[#allocation30_spill] sm:$0xff] %v11142_v36  ;;  %v11144_v23 = vpop.eup %8401  ;;  %8413 = vpow2.f32 %v5422_v7 }
 0x8d7   : > { %12078 = vst [vmem:[#allocation34_spill] sm:$0xff] %v11144_v23  ;;  %v11148_v49 = vpop.eup %8403 }
 0x8d8   : > { %12079 = vst [vmem:[#allocation32_spill] sm:$0xff] %v11148_v49  ;;  %v11150_v27 = vpop.eup %8405 }
 0x8d9   : > { %5630 = vperm.xlu1 %8277, %v11135_v46   ;;  %12080 = vst [vmem:[#allocation36_spill] sm:$0xff] %v11150_v27 }
 0x8da   : > { %5627 = vperm.xlu0 %8278, %v11137_v16  }
 0x8db   : > { %v11154_v63 = vpop.eup %8407 }
 0x8dc   : > { %12081 = vst [vmem:[#allocation35_spill] sm:$0xff] %v11154_v63  ;;  %v11156_v35 = vpop.eup %8409 }
 0x8dd   : > { %5660 = vperm.xlu1 %8277, %v11142_v36   ;;  %12082 = vst [vmem:[#allocation46_spill] sm:$0xff] %v11156_v35 }
 0x8de   : > { %5657 = vperm.xlu0 %8278, %v11144_v23  }
 0x8df   : > { %v11160_v26 = vpop.eup %8411 }
 0x8e0   : > { %12083 = vst [vmem:[#allocation37_spill] sm:$0xff] %v11160_v26  ;;  %v11163_v55 = vpop.eup %8413 }
 0x8e1   : > { %5663 = vperm.xlu1 %8277, %v11148_v49   ;;  %12084 = vst [vmem:[#allocation48_spill] sm:$0xff] %v11163_v55 }
 0x8e2   : > { %5669 = vperm.xlu0 %8278, %v11150_v27  }
 0x8e5   : > { %5666 = vperm.xlu1 %8277, %v11154_v63  }
 0x8e6   : > { %5675 = vperm.xlu0 %8278, %v11156_v35  }
 0x8e9   : > { %5672 = vperm.xlu1 %8277, %v11160_v26  }
 0x8ec   : > { %v5490_v6 = vpop.permute.xlu1 %5489 }
 0x8ed   : > { %v5493_v61 = vpop.permute.xlu0 %5492  ;;  %5678 = vperm.xlu1 %8277, %v11163_v55   ;;  %v5683_v50 = vrot.slane %v5490_v6, %v9753_v13 }
 0x8ee   : > { %v5687_v43 = vrot.slane %v5493_v61, %v9753_v13 }
 0x8f0   : > { %v5496_v56 = vpop.permute.xlu1 %5495  ;;  %v5936_v26 = vsel %vm2525_vm6, %v5687_v43, %v5683_v50 }
 0x8f1   : > { %v5502_v20 = vpop.permute.xlu0 %5501  ;;  %v5691_v7 = vrot.slane %v5496_v56, %v9753_v13 }
 0x8f2   : > { %v5699_v6 = vrot.slane %v5502_v20, %v9753_v13 }
 0x8f3   : > { %v5937_v27 = vsel %vm2527_vm7, %v5691_v7, %v5936_v26 }
 0x8f4   : > { %v5499_v49 = vpop.permute.xlu1 %5498 }
 0x8f5   : > { %v5695_v23 = vrot.slane %v5499_v49, %v9753_v13  ;;  %v5508_v35 = vpop.permute.xlu0 %5507 }
 0x8f6   : > { %v5707_v50 = vrot.slane %v5508_v35, %v9753_v13 }
 0x8f7   : > { %v5938_v46 = vsel %vm2529_vm8, %v5695_v23, %v5937_v27 }
 0x8f8   : > { %v5505_v63 = vpop.permute.xlu1 %5504  ;;  %v5939_v61 = vsel %vm2531_vm9, %v5699_v6, %v5938_v46 }
 0x8f9   : > { %v5703_v55 = vrot.slane %v5505_v63, %v9753_v13  ;;  %v5538_v36 = vpop.permute.xlu0 %5537 }
 0x8fa   : > { %v5747_v23 = vrot.slane %v5538_v36, %v9753_v13 }
 0x8fb   : > { %v5940_v56 = vsel %vm2533_vm10, %v5703_v55, %v5939_v61 }
 0x8fc   : > { %v5511_v16 = vpop.permute.xlu1 %5510  ;;  %v5941_v26 = vsel %vm2535_vm11, %v5707_v50, %v5940_v56 }
 0x8fd   : > { %v5711_v49 = vrot.slane %v5511_v16, %v9753_v13  ;;  %v5544_v10 = vpop.permute.xlu0 %5543 }
 0x8fe   : > { %v5755_v7 = vrot.slane %v5544_v10, %v9753_v13 }
 0x8ff   : > { %v5942_v20 = vsel %vm2537_vm12, %v5711_v49, %v5941_v26 }
 0x900   : > { %v5541_v43 = vpop.permute.xlu1 %5540  ;;  %v6000_v16 = vsel %vm2596_vm13, %v5942_v20, 0.0 }
 0x901   : > { %v5751_v27 = vrot.slane %v5541_v43, %v9753_v13  ;;  %v5550_v63 = vpop.permute.xlu0 %5549 }
 0x902   : > { %v5763_v56 = vrot.slane %v5550_v63, %v9753_v13 }
 0x903   : > { %v5950_v46 = vsel %vm2525_vm6, %v5751_v27, %v5747_v23 }
 0x904   : > { %v5547_v55 = vpop.permute.xlu1 %5546  ;;  %v5951_v61 = vsel %vm2527_vm7, %v5755_v7, %v5950_v46 }
 0x905   : > { %v5759_v6 = vrot.slane %v5547_v55, %v9753_v13  ;;  %6001 = vadd.xlane.f32.xlu0 %v6000_v16  ;;  %v5556_v35 = vpop.permute.xlu0 %5555 }
 0x906   : > { %v5771_v23 = vrot.slane %v5556_v35, %v9753_v13 }
 0x907   : > { %v5952_v36 = vsel %vm2529_vm8, %v5759_v6, %v5951_v61 }
 0x908   : > { %v5553_v50 = vpop.permute.xlu1 %5552  ;;  %v5953_v26 = vsel %vm2531_vm9, %v5763_v56, %v5952_v36 }
 0x909   : > { %v5767_v49 = vrot.slane %v5553_v50, %v9753_v13  ;;  %v5586_v43 = vpop.permute.xlu0 %5585 }
 0x90a   : > { %v5811_v6 = vrot.slane %v5586_v43, %v9753_v13 }
 0x90b   : > { %v5954_v10 = vsel %vm2533_vm10, %v5767_v49, %v5953_v26 }
 0x90c   : > { %v5559_v27 = vpop.permute.xlu1 %5558  ;;  %v5955_v46 = vsel %vm2535_vm11, %v5771_v23, %v5954_v10 }
 0x90d   : > { %v5775_v20 = vrot.slane %v5559_v27, %v9753_v13  ;;  %v5592_v55 = vpop.permute.xlu0 %5591 }
 0x90e   : > { %v5819_v35 = vrot.slane %v5592_v55, %v9753_v13 }
 0x90f   : > { %v5956_v7 = vsel %vm2537_vm12, %v5775_v20, %v5955_v46 }
 0x910   : > { %v5589_v16 = vpop.permute.xlu1 %5588  ;;  %v6006_v63 = vsel %vm2596_vm13, %v5956_v7, 0.0 }
 0x911   : > { %v5815_v61 = vrot.slane %v5589_v16, %v9753_v13  ;;  %v5598_v36 = vpop.permute.xlu0 %5597  ;;  %6007 = vadd.xlane.f32.xlu1 %v6006_v63 }
 0x912   : > { %v5827_v27 = vrot.slane %v5598_v36, %v9753_v13 }
 0x913   : > { %v5964_v56 = vsel %vm2525_vm6, %v5815_v61, %v5811_v6 }
 0x914   : > { %v5595_v50 = vpop.permute.xlu1 %5594  ;;  %v5965_v10 = vsel %vm2527_vm7, %v5819_v35, %v5964_v56 }
 0x915   : > { %v5823_v49 = vrot.slane %v5595_v50, %v9753_v13  ;;  %v5604_v26 = vpop.permute.xlu0 %5603 }
 0x916   : > { %v5835_v55 = vrot.slane %v5604_v26, %v9753_v13 }
 0x917   : > { %v5966_v23 = vsel %vm2529_vm8, %v5823_v49, %v5965_v10 }
 0x918   : > { %v5601_v20 = vpop.permute.xlu1 %5600  ;;  %v5967_v7 = vsel %vm2531_vm9, %v5827_v27, %v5966_v23 }
 0x919   : > { %v5831_v43 = vrot.slane %v5601_v20, %v9753_v13  ;;  %v5634_v46 = vpop.permute.xlu0 %5633 }
 0x91a   : > { %v5875_v49 = vrot.slane %v5634_v46, %v9753_v13 }
 0x91b   : > { %v5968_v16 = vsel %vm2533_vm10, %v5831_v43, %v5967_v7 }
 0x91c   : > { %v5607_v63 = vpop.permute.xlu1 %5606  ;;  %v5969_v56 = vsel %vm2535_vm11, %v5835_v55, %v5968_v16 }
 0x91d   : > { %v5839_v6 = vrot.slane %v5607_v63, %v9753_v13  ;;  %v5640_v61 = vpop.permute.xlu0 %5639 }
 0x91e   : > { %v5883_v26 = vrot.slane %v5640_v61, %v9753_v13 }
 0x91f   : > { %v5970_v35 = vsel %vm2537_vm12, %v5839_v6, %v5969_v56 }
 0x920   : > { %v5637_v50 = vpop.permute.xlu1 %5636  ;;  %v6012_v36 = vsel %vm2596_vm13, %v5970_v35, 0.0 }
 0x921   : > { %v5879_v10 = vrot.slane %v5637_v50, %v9753_v13  ;;  %v5646_v23 = vpop.permute.xlu0 %5645  ;;  %6013 = vadd.xlane.f32.xlu0 %v6012_v36 }
 0x922   : > { %v5891_v63 = vrot.slane %v5646_v23, %v9753_v13 }
 0x923   : > { %v5978_v27 = vsel %vm2525_vm6, %v5879_v10, %v5875_v49 }
 0x924   : > { %v5643_v20 = vpop.permute.xlu1 %5642  ;;  %v5979_v16 = vsel %vm2527_vm7, %v5883_v26, %v5978_v27 }
 0x925   : > { %v5887_v43 = vrot.slane %v5643_v20, %v9753_v13  ;;  %v5652_v7 = vpop.permute.xlu0 %5651 }
 0x926   : > { %v5899_v35 = vrot.slane %v5652_v7, %v9753_v13 }
 0x927   : > { %v5980_v55 = vsel %vm2529_vm8, %v5887_v43, %v5979_v16 }
 0x928   : > { %v5649_v6 = vpop.permute.xlu1 %5648  ;;  %v5981_v50 = vsel %vm2531_vm9, %v5891_v63, %v5980_v55 }
 0x929   : > { %v5895_v46 = vrot.slane %v5649_v6, %v9753_v13  ;;  %v5655_v56 = vpop.permute.xlu0 %5654 }
 0x92a   : > { %v5903_v36 = vrot.slane %v5655_v56, %v9753_v13 }
 0x92b   : > { %v5982_v61 = vsel %vm2533_vm10, %v5895_v46, %v5981_v50 }
 0x92c   : > { %v5517_v49 = vpop.permute.xlu1 %5516  ;;  %v5983_v10 = vsel %vm2535_vm11, %v5899_v35, %v5982_v61 }
 0x92d   : > { %v5514_v27 = vpop.permute.xlu0 %5513  ;;  %v5984_v26 = vsel %vm2537_vm12, %v5903_v36, %v5983_v10  ;;  %v5719_v20 = vrot.slane %v5517_v49, %v9753_v13 }
 0x92e   : > { %v6018_v23 = vsel %vm2596_vm13, %v5984_v26, 0.0  ;;  %v5715_v43 = vrot.slane %v5514_v27, %v9753_v13 }
 0x92f   : > { %6019 = vadd.xlane.f32.xlu0 %v6018_v23 }
 0x930   : > { %v5523_v7 = vpop.permute.xlu1 %5522  ;;  %v5943_v63 = vsel %vm2525_vm6, %v5719_v20, %v5715_v43 }
 0x931   : > { %v5520_v16 = vpop.permute.xlu0 %5519  ;;  %v5727_v6 = vrot.slane %v5523_v7, %v9753_v13 }
 0x932   : > { %v5723_v55 = vrot.slane %v5520_v16, %v9753_v13 }
 0x934   : > { %v5944_v46 = vsel %vm2527_vm7, %v5723_v55, %v5943_v63  ;;  %v5529_v56 = vpop.permute.xlu1 %5528 }
 0x935   : > { %v5526_v35 = vpop.permute.xlu0 %5525  ;;  %v5735_v61 = vrot.slane %v5529_v56, %v9753_v13  ;;  %v5945_v36 = vsel %vm2529_vm8, %v5727_v6, %v5944_v46 }
 0x936   : > { %v5731_v50 = vrot.slane %v5526_v35, %v9753_v13 }
 0x938   : > { %v5946_v49 = vsel %vm2531_vm9, %v5731_v50, %v5945_v36  ;;  %v5535_v10 = vpop.permute.xlu1 %5534 }
 0x939   : > { %v5743_v27 = vrot.slane %v5535_v10, %v9753_v13  ;;  %v5532_v26 = vpop.permute.xlu0 %5531  ;;  %v5947_v20 = vsel %vm2533_vm10, %v5735_v61, %v5946_v49 }
 0x93a   : > { %v5739_v23 = vrot.slane %v5532_v26, %v9753_v13 }
 0x93c   : > { %v5565_v43 = vpop.permute.xlu1 %5564  ;;  %v5948_v7 = vsel %vm2535_vm11, %v5739_v23, %v5947_v20 }
 0x93d   : > { %v5562_v16 = vpop.permute.xlu0 %5561  ;;  %v5949_v55 = vsel %vm2537_vm12, %v5743_v27, %v5948_v7  ;;  %v5783_v6 = vrot.slane %v5565_v43, %v9753_v13 }
 0x93e   : > { %v6003_v63 = vsel %vm2596_vm13, %v5949_v55, 0.0  ;;  %v5779_v46 = vrot.slane %v5562_v16, %v9753_v13 }
 0x93f   : > { %6004 = vadd.xlane.f32.xlu0 %v6003_v63 }
 0x940   : > { %v5571_v56 = vpop.permute.xlu1 %5570  ;;  %v5957_v36 = vsel %vm2525_vm6, %v5783_v6, %v5779_v46 }
 0x941   : > { %v5568_v35 = vpop.permute.xlu0 %5567  ;;  %v5791_v61 = vrot.slane %v5571_v56, %v9753_v13 }
 0x942   : > { %v5787_v50 = vrot.slane %v5568_v35, %v9753_v13 }
 0x944   : > { %v5958_v49 = vsel %vm2527_vm7, %v5787_v50, %v5957_v36  ;;  %v5577_v10 = vpop.permute.xlu1 %5576 }
 0x945   : > { %v5574_v26 = vpop.permute.xlu0 %5573  ;;  %v5799_v23 = vrot.slane %v5577_v10, %v9753_v13  ;;  %v5959_v20 = vsel %vm2529_vm8, %v5791_v61, %v5958_v49 }
 0x946   : > { %v5795_v27 = vrot.slane %v5574_v26, %v9753_v13 }
 0x948   : > { %v5960_v43 = vsel %vm2531_vm9, %v5795_v27, %v5959_v20  ;;  %v5583_v7 = vpop.permute.xlu1 %5582 }
 0x949   : > { %v5807_v16 = vrot.slane %v5583_v7, %v9753_v13  ;;  %v5580_v55 = vpop.permute.xlu0 %5579  ;;  %v5961_v6 = vsel %vm2533_vm10, %v5799_v23, %v5960_v43 }
 0x94a   : > { %v5803_v63 = vrot.slane %v5580_v55, %v9753_v13 }
 0x94c   : > { %v5613_v46 = vpop.permute.xlu1 %5612  ;;  %v5962_v56 = vsel %vm2535_vm11, %v5803_v63, %v5961_v6 }
 0x94d   : > { %v5610_v35 = vpop.permute.xlu0 %5609  ;;  %v5963_v50 = vsel %vm2537_vm12, %v5807_v16, %v5962_v56  ;;  %v5847_v61 = vrot.slane %v5613_v46, %v9753_v13 }
 0x94e   : > { %v6009_v36 = vsel %vm2596_vm13, %v5963_v50, 0.0  ;;  %v5843_v49 = vrot.slane %v5610_v35, %v9753_v13 }
 0x94f   : > { %6010 = vadd.xlane.f32.xlu1 %v6009_v36 }
 0x950   : > { %v5619_v10 = vpop.permute.xlu1 %5618  ;;  %v5971_v20 = vsel %vm2525_vm6, %v5847_v61, %v5843_v49 }
 0x951   : > { %v5616_v26 = vpop.permute.xlu0 %5615  ;;  %v5855_v23 = vrot.slane %v5619_v10, %v9753_v13 }
 0x952   : > { %v5851_v27 = vrot.slane %v5616_v26, %v9753_v13 }
 0x954   : > { %v5972_v43 = vsel %vm2527_vm7, %v5851_v27, %v5971_v20  ;;  %v5625_v7 = vpop.permute.xlu1 %5624 }
 0x955   : > { %v5622_v55 = vpop.permute.xlu0 %5621  ;;  %v5863_v63 = vrot.slane %v5625_v7, %v9753_v13  ;;  %v5973_v6 = vsel %vm2529_vm8, %v5855_v23, %v5972_v43 }
 0x956   : > { %v5859_v16 = vrot.slane %v5622_v55, %v9753_v13 }
 0x958   : > { %v5974_v46 = vsel %vm2531_vm9, %v5859_v16, %v5973_v6  ;;  %v5631_v56 = vpop.permute.xlu1 %5630 }
 0x959   : > { %v5871_v35 = vrot.slane %v5631_v56, %v9753_v13  ;;  %v5628_v50 = vpop.permute.xlu0 %5627  ;;  %v5975_v61 = vsel %vm2533_vm10, %v5863_v63, %v5974_v46 }
 0x95a   : > { %v5867_v36 = vrot.slane %v5628_v50, %v9753_v13 }
 0x95c   : > { %v5661_v49 = vpop.permute.xlu1 %5660  ;;  %v5976_v10 = vsel %vm2535_vm11, %v5867_v36, %v5975_v61 }
 0x95d   : > { %v5658_v26 = vpop.permute.xlu0 %5657  ;;  %v5977_v27 = vsel %vm2537_vm12, %v5871_v35, %v5976_v10  ;;  %v5911_v43 = vrot.slane %v5661_v49, %v9753_v13 }
 0x95e   : > { %v6015_v20 = vsel %vm2596_vm13, %v5977_v27, 0.0  ;;  %v5907_v7 = vrot.slane %v5658_v26, %v9753_v13 }
 0x95f   : > { %6016 = vadd.xlane.f32.xlu1 %v6015_v20 }
 0x960   : > { %v5664_v23 = vpop.permute.xlu1 %5663  ;;  %v5985_v63 = vsel %vm2525_vm6, %v5911_v43, %v5907_v7 }
 0x961   : > { %v5915_v55 = vrot.slane %v5664_v23, %v9753_v13  ;;  %v5670_v16 = vpop.permute.xlu0 %5669 }
 0x962   : > { %v5923_v50 = vrot.slane %v5670_v16, %v9753_v13 }
 0x963   : > { %v5986_v56 = vsel %vm2527_vm7, %v5915_v55, %v5985_v63 }
 0x964   : > { %v5667_v6 = vpop.permute.xlu1 %5666 }
 0x965   : > { %v5919_v46 = vrot.slane %v5667_v6, %v9753_v13  ;;  %v5676_v61 = vpop.permute.xlu0 %5675 }
 0x966   : > { %v5931_v27 = vrot.slane %v5676_v61, %v9753_v13 }
 0x967   : > { %v5987_v35 = vsel %vm2529_vm8, %v5919_v46, %v5986_v56 }
 0x968   : > { %v5673_v36 = vpop.permute.xlu1 %5672  ;;  %v5988_v10 = vsel %vm2531_vm9, %v5923_v50, %v5987_v35 }
 0x969   : > { %v5927_v49 = vrot.slane %v5673_v36, %v9753_v13 }
 0x96b   : > { %v5989_v26 = vsel %vm2533_vm10, %v5927_v49, %v5988_v10 }
 0x96c   : > { %v5679_v20 = vpop.permute.xlu1 %5678  ;;  %v5990_v43 = vsel %vm2535_vm11, %v5931_v27, %v5989_v26 }
 0x96d   : > { %v5935_v23 = vrot.slane %v5679_v20, %v9753_v13 }
 0x96f   : > { %v5991_v7 = vsel %vm2537_vm12, %v5935_v23, %v5990_v43 }
 0x970   : > { %v6021_v55 = vsel %vm2596_vm13, %v5991_v7, 0.0 }
 0x971   : > { %6022 = vadd.xlane.f32.xlu0 %v6021_v55 }
 0x992   : > { %v6002_v16 = vpop.xlane.xlu0 %6001 }
 0x993   : > { %8415 = vrcp.f32 %v6002_v16 }
 0x99d   : > { %v8416_v6 = vpop.eup %8415 }
 0x99e   : > { %v6032_v63 = vmul.f32 %v8416_v6, %v6002_v16  ;;  %v6008_v46 = vpop.xlane.xlu1 %6007 }
 0x99f   : > { %8417 = vrcp.f32 %v6008_v46 }
 0x9a0   : > { %v6040_v56 = vsub.f32 2.0, %v6032_v63 }
 0x9a2   : > { %v6048_v35 = vmul.f32 %v8416_v6, %v6040_v56 }
 0x9a4   : > { %v6071_v50 = vrot.slane %v6048_v35, %v9014_v8  ;;  %v6067_v36 = vrot.slane %v6048_v35, %v8985_v59  ;;  %v6075_v10 = vrot.slane %v6048_v35, %v9926_v11  ;;  %v6083_v26 = vrot.slane %v6048_v35, %v9929_v51 }
 0x9a5   : > { %v6079_v20 = vrot.slane %v6048_v35, %v9941_v3  ;;  %v6091_v55 = vrot.slane %v6048_v35, %v9938_v44  ;;  %v6087_v56 = vrot.slane %v6048_v35, %v9954_v33 }
 0x9a6   : > { %v6385_v61 = vmul.f32 %v10860_v38, %v6071_v50  ;;  %v6384_v49 = vmul.f32 %v10858_v52, %v6067_v36  ;;  %v6386_v43 = vmul.f32 %v10868_v39, %v6075_v10  ;;  %v6388_v7 = vmul.f32 %v10870_v28, %v6083_v26 }
 0x9a7   : > { %v6387_v6 = vmul.f32 %v10877_v60, %v6079_v20  ;;  %v6390_v63 = vmul.f32 %v10881_v48, %v6091_v55  ;;  %v6389_v28 = vmul.f32 %v10892_v24, %v6087_v56  ;;  %v6095_v50 = vrot.slane %v6048_v35, %v9965_v30 }
 0x9a8   : > { %6776 = vperm.xlu0 %8278, %v6385_v61   ;;  %6773 = vperm.xlu1 %8277, %v6384_v49  }
 0x9a9   : > { %v8418_v27 = vpop.eup %8417  ;;  %v6391_v60 = vmul.f32 %v10904_v2, %v6095_v50 }
 0x9aa   : > { %v6034_v23 = vmul.f32 %v8418_v27, %v6008_v46 }
 0x9ac   : > { %v6042_v16 = vsub.f32 2.0, %v6034_v23  ;;  %6779 = vperm.xlu0 %8278, %v6386_v43   ;;  %6785 = vperm.xlu1 %8277, %v6388_v7  }
 0x9ae   : > { %v6050_v52 = vmul.f32 %v8418_v27, %v6042_v16  ;;  %v6014_v38 = vpop.xlane.xlu0 %6013 }
 0x9af   : > { %8419 = vrcp.f32 %v6014_v38 }
 0x9b0   : > { %6782 = vperm.xlu0 %8278, %v6387_v6   ;;  %6791 = vperm.xlu1 %8277, %v6390_v63   ;;  %v6131_v39 = vrot.slane %v6050_v52, %v8985_v59  ;;  %v6143_v36 = vrot.slane %v6050_v52, %v9941_v3  ;;  %v6135_v61 = vrot.slane %v6050_v52, %v9014_v8 }
 0x9b1   : > { %v6147_v49 = vrot.slane %v6050_v52, %v9929_v51  ;;  %v6139_v24 = vrot.slane %v6050_v52, %v9926_v11  ;;  %v6155_v27 = vrot.slane %v6050_v52, %v9938_v44  ;;  %v6159_v55 = vrot.slane %v6050_v52, %v9965_v30 }
 0x9b2   : > { %v6400_v46 = vmul.f32 %v10894_v5, %v6131_v39  ;;  %v6403_v48 = vmul.f32 %v10926_v19, %v6143_v36  ;;  %v6401_v35 = vmul.f32 %v10916_v21, %v6135_v61  ;;  %v6151_v19 = vrot.slane %v6050_v52, %v9954_v33 }
 0x9b3   : > { %v6404_v26 = vmul.f32 %v10918_v17, %v6147_v49  ;;  %v6402_v43 = vmul.f32 %v10906_v58, %v6139_v24  ;;  %v6406_v7 = vmul.f32 %v10928_v12, %v6155_v27  ;;  %v6407_v17 = vmul.f32 %v10948_v14, %v6159_v55 }
 0x9b4   : > { %6788 = vperm.xlu0 %8278, %v6389_v28   ;;  %7069 = vperm.xlu1 %8277, %v6400_v46   ;;  %v6405_v21 = vmul.f32 %v10938_v29, %v6151_v19 }
 0x9b8   : > { %6794 = vperm.xlu0 %8278, %v6391_v60   ;;  %7078 = vperm.xlu1 %8277, %v6403_v48  }
 0x9b9   : > { %v8420_v10 = vpop.eup %8419 }
 0x9ba   : > { %v6036_v5 = vmul.f32 %v8420_v10, %v6014_v38 }
 0x9bc   : > { %v6044_v20 = vsub.f32 2.0, %v6036_v5  ;;  %7072 = vperm.xlu0 %8278, %v6401_v35   ;;  %7081 = vperm.xlu1 %8277, %v6404_v26   ;;  %v6020_v2 = vpop.xlane.xlu0 %6019 }
 0x9bd   : > { %8421 = vrcp.f32 %v6020_v2 }
 0x9be   : > { %v6052_v23 = vmul.f32 %v8420_v10, %v6044_v20 }
 0x9c0   : > { %7075 = vperm.xlu0 %8278, %v6402_v43   ;;  %7087 = vperm.xlu1 %8277, %v6406_v7   ;;  %v6199_v16 = vrot.slane %v6052_v23, %v9014_v8  ;;  %v6195_v38 = vrot.slane %v6052_v23, %v8985_v59  ;;  %v6203_v12 = vrot.slane %v6052_v23, %v9926_v11 }
 0x9c1   : > { %v6207_v52 = vrot.slane %v6052_v23, %v9941_v3  ;;  %v6215_v29 = vrot.slane %v6052_v23, %v9954_v33  ;;  %v6211_v46 = vrot.slane %v6052_v23, %v9929_v51  ;;  %v6219_v48 = vrot.slane %v6052_v23, %v9938_v44 }
 0x9c2   : > { %v6417_v6 = vmul.f32 %v10958_v34, %v6199_v16  ;;  %v6416_v58 = vmul.f32 %v10940_v4, %v6195_v38  ;;  %v6418_v39 = vmul.f32 %v10950_v9, %v6203_v12  ;;  %v6223_v4 = vrot.slane %v6052_v23, %v9965_v30 }
 0x9c3   : > { %v6419_v28 = vmul.f32 %v10968_v41, %v6207_v52  ;;  %v6421_v36 = vmul.f32 %v10978_v0, %v6215_v29  ;;  %v6420_v60 = vmul.f32 %v10960_v31, %v6211_v46  ;;  %v6422_v41 = vmul.f32 %v10970_v15, %v6219_v48 }
 0x9c4   : > { %7084 = vperm.xlu0 %8278, %v6405_v21   ;;  %7090 = vperm.xlu1 %8277, %v6407_v17   ;;  %v6423_v9 = vmul.f32 %v10988_v45, %v6223_v4 }
 0x9c7   : > { %v8422_v63 = vpop.eup %8421 }
 0x9c8   : > { %v6038_v56 = vmul.f32 %v8422_v63, %v6020_v2  ;;  %6919 = vperm.xlu0 %8278, %v6417_v6   ;;  %6916 = vperm.xlu1 %8277, %v6416_v58   ;;  %v12086_v58 = vld [vmem:[#allocation45_spill] sm:$0xff] }
 0x9ca   : > { %v6046_v14 = vsub.f32 2.0, %v6038_v56 }
 0x9cc   : > { %6922 = vperm.xlu0 %8278, %v6418_v39   ;;  %v6005_v34 = vpop.xlane.xlu0 %6004  ;;  %6925 = vperm.xlu1 %8277, %v6419_v28   ;;  %v6054_v50 = vmul.f32 %v8422_v63, %v6046_v14  ;;  %v12088_v39 = vld [vmem:[#allocation64_spill] sm:$0xff] }
 0x9cd   : > { %8423 = vrcp.f32 %v6005_v34 }
 0x9ce   : > { %v6263_v61 = vrot.slane %v6054_v50, %v9014_v8  ;;  %v6259_v49 = vrot.slane %v6054_v50, %v8985_v59  ;;  %v6267_v31 = vrot.slane %v6054_v50, %v9926_v11  ;;  %v6275_v24 = vrot.slane %v6054_v50, %v9929_v51 }
 0x9cf   : > { %v6271_v15 = vrot.slane %v6054_v50, %v9941_v3  ;;  %v6283_v20 = vrot.slane %v6054_v50, %v9938_v44  ;;  %v6279_v23 = vrot.slane %v6054_v50, %v9954_v33  ;;  %v6287_v7 = vrot.slane %v6054_v50, %v9965_v30 }
 0x9d0   : > { %6931 = vperm.xlu0 %8278, %v6421_v36   ;;  %6928 = vperm.xlu1 %8277, %v6420_v60   ;;  %v6433_v10 = vmul.f32 %v10998_v40, %v6263_v61  ;;  %v6432_v0 = vmul.f32 %v10980_v18, %v6259_v49  ;;  %v6434_v26 = vmul.f32 %v10990_v57, %v6267_v31  ;;  %v12090_v60 = vld [vmem:[#allocation49_spill] sm:$0xff] }
 0x9d1   : > { %v6436_v27 = vmul.f32 %v11000_v32, %v6275_v24  ;;  %v6435_v18 = vmul.f32 %v11008_v62, %v6271_v15  ;;  %v6438_v19 = vmul.f32 %v11010_v42, %v6283_v20  ;;  %v6437_v57 = vmul.f32 %v11018_v22, %v6279_v23 }
 0x9d2   : > { %v6439_v62 = vmul.f32 %v11020_v54, %v6287_v7 }
 0x9d4   : > { %6937 = vperm.xlu0 %8278, %v6423_v9   ;;  %6934 = vperm.xlu1 %8277, %v6422_v41  }
 0x9d7   : > { %v8424_v5 = vpop.eup %8423 }
 0x9d8   : > { %v6033_v35 = vmul.f32 %v8424_v5, %v6005_v34  ;;  %7219 = vperm.xlu0 %8278, %v6433_v10   ;;  %7216 = vperm.xlu1 %8277, %v6432_v0   ;;  %v12089_v34 = vld [vmem:[#allocation62_spill] sm:$0xff]  ;;  %v12091_v10 = vld [vmem:[#allocation63_spill] sm:$0xff] }
 0x9da   : > { %v6041_v45 = vsub.f32 2.0, %v6033_v35  ;;  %v12092_v35 = vld [vmem:[#allocation51_spill] sm:$0xff] }
 0x9dc   : > { %v6049_v40 = vmul.f32 %v8424_v5, %v6041_v45  ;;  %v6011_v2 = vpop.xlane.xlu1 %6010  ;;  %7222 = vperm.xlu0 %8278, %v6434_v26   ;;  %7228 = vperm.xlu1 %8277, %v6436_v27   ;;  %v12093_v26 = vld [vmem:[#allocation57_spill] sm:$0xff] }
 0x9dd   : > { %8425 = vrcp.f32 %v6011_v2 }
 0x9de   : > { %v6099_v43 = vrot.slane %v6049_v40, %v8985_v59  ;;  %v6103_v55 = vrot.slane %v6049_v40, %v9014_v8  ;;  %v6115_v21 = vrot.slane %v6049_v40, %v9929_v51  ;;  %v6107_v17 = vrot.slane %v6049_v40, %v9926_v11 }
 0x9df   : > { %v6111_v52 = vrot.slane %v6049_v40, %v9941_v3  ;;  %v6119_v14 = vrot.slane %v6049_v40, %v9954_v33  ;;  %v6123_v50 = vrot.slane %v6049_v40, %v9938_v44  ;;  %v6127_v9 = vrot.slane %v6049_v40, %v9965_v30  ;;  %v12094_v40 = vld [vmem:[#allocation65_spill] sm:$0xff] }
 0x9e0   : > { %7225 = vperm.xlu0 %8278, %v6435_v18   ;;  %7234 = vperm.xlu1 %8277, %v6438_v19   ;;  %v6392_v32 = vmul.f32 %v11030_v47, %v6099_v43  ;;  %v6393_v42 = vmul.f32 %v11028_v25, %v6103_v55  ;;  %v12085_v47 = vld [vmem:[#allocation47_spill] sm:$0xff]  ;;  %v6394_v12 = vmul.f32 %v12086_v58, %v6107_v17  ;;  %v12087_v25 = vld [vmem:[#allocation61_spill] sm:$0xff]  ;;  %v12095_v19 = vmov 0.0   ;;  %v12097_v55 = vld [vmem:[#allocation28_spill] sm:$0xff] }
 0x9e1   : > { %v6396_v6 = vmul.f32 %v12085_v47, %v6115_v21  ;;  %v6395_v56 = vmul.f32 %v12087_v25, %v6111_v52  ;;  %v6397_v4 = vmul.f32 %v12089_v34, %v6119_v14  ;;  %v6398_v48 = vmul.f32 %v12090_v60, %v6123_v50  ;;  %7987 = vmatprep.mubr.msk.f32.mxu1 %vm8658_vm2, %v12095_v19  ;;  %v12099_v58 = vld [vmem:[#allocation31_spill] sm:$0xff]  ;;  %v12100_v25 = vld [vmem:[#allocation33_spill] sm:$0xff] }
 0x9e2   : > { %v6399_v0 = vmul.f32 %v12091_v10, %v6127_v9  ;;  %8017 = vmatprep.mubr.msk.f32.mxu0 %vm8658_vm2, %v12095_v19  ;;  %v12103_v34 = vld [vmem:[#allocation35_spill] sm:$0xff]  ;;  %v12107_v10 = vld [vmem:[#allocation37_spill] sm:$0xff] }
 0x9e4   : > { %7231 = vperm.xlu0 %8278, %v6437_v57   ;;  %6479 = vperm.xlu1 %8277, %v6392_v32   ;;  %v12096_v57 = vld [vmem:[#allocation66_spill] sm:$0xff] }
 0x9e7   : > { %v8426_v16 = vpop.eup %8425 }
 0x9e8   : > { %v6035_v38 = vmul.f32 %v8426_v16, %v6011_v2  ;;  %7237 = vperm.xlu0 %8278, %v6439_v62   ;;  %6482 = vperm.xlu1 %8277, %v6393_v42  }
 0x9ea   : > { %v6043_v22 = vsub.f32 2.0, %v6035_v38 }
 0x9ec   : > { %v11367_v63 = vmul.f32 %v8426_v16, %v6043_v22  ;;  %v6017_v54 = vpop.xlane.xlu1 %6016  ;;  %6491 = vperm.xlu0 %8278, %v6396_v6   ;;  %6485 = vperm.xlu1 %8277, %v6394_v12   ;;  %v12098_v16 = vld [vmem:[#allocation25_spill] sm:$0xff] }
 0x9ed   : > { %8427 = vrcp.f32 %v6017_v54 }
 0x9ee   : > { %v6167_v29 = vrot.slane %v11367_v63, %v9014_v8  ;;  %v6171_v46 = vrot.slane %v11367_v63, %v9926_v11  ;;  %v6163_v31 = vrot.slane %v11367_v63, %v8985_v59  ;;  %v6175_v45 = vrot.slane %v11367_v63, %v9941_v3 }
 0x9ef   : > { %v6179_v18 = vrot.slane %v11367_v63, %v9929_v51  ;;  %v6183_v50 = vrot.slane %v11367_v63, %v9954_v33 }
 0x9f0   : > { %6488 = vperm.xlu1 %8277, %v6395_v56   ;;  %v6409_v28 = vmul.f32 %v12088_v39, %v6167_v29  ;;  %v6410_v36 = vmul.f32 %v11080_v37, %v6171_v46  ;;  %v6408_v15 = vmul.f32 %v12092_v35, %v6163_v31  ;;  %v6411_v2 = vmul.f32 %v12094_v40, %v6175_v45  ;;  %v12101_v29 = vld [vmem:[#allocation30_spill] sm:$0xff]  ;;  %v12110_v45 = vld [vmem:[#allocation48_spill] sm:$0xff] }
 0x9f1   : > { %v6412_v32 = vmul.f32 %v12096_v57, %v6179_v18  ;;  %v12109_v35 = vld [vmem:[#allocation34_spill] sm:$0xff] }
 0x9f2   : > { %7378 = vperm.xlu0 %8278, %v6409_v28  }
 0x9f4   : > { %6494 = vperm.xlu1 %8277, %v6397_v4  }
 0x9f6   : > { %7381 = vperm.xlu0 %8278, %v6410_v36  }
 0x9f7   : > { %v8428_v41 = vpop.eup %8427 }
 0x9f8   : > { %v6037_v61 = vmul.f32 %v8428_v41, %v6017_v54  ;;  %6497 = vperm.xlu1 %8277, %v6398_v48   ;;  %v12105_v48 = vld [vmem:[#allocation36_spill] sm:$0xff] }
 0x9fa   : > { %v6045_v49 = vsub.f32 2.0, %v6037_v61  ;;  %v12106_v61 = vld [vmem:[#allocation67_spill] sm:$0xff] }
 0x9fc   : > { %v6053_v24 = vmul.f32 %v8428_v41, %v6045_v49  ;;  %6500 = vperm.xlu1 %8277, %v6399_v0  }
 0x9fe   : > { %v6023_v5 = vpop.xlane.xlu0 %6022  ;;  %v6231_v37 = vrot.slane %v6053_v24, %v9014_v8  ;;  %v6235_v20 = vrot.slane %v6053_v24, %v9926_v11  ;;  %v6239_v43 = vrot.slane %v6053_v24, %v9941_v3  ;;  %v6227_v7 = vrot.slane %v6053_v24, %v8985_v59 }
 0x9ff   : > { %8429 = vrcp.f32 %v6023_v5  ;;  %v6247_v42 = vrot.slane %v6053_v24, %v9954_v33  ;;  %v6243_v22 = vrot.slane %v6053_v24, %v9929_v51  ;;  %v6251_v52 = vrot.slane %v6053_v24, %v9938_v44 }
 0xa00   : > { %7375 = vperm.xlu1 %8277, %v6408_v15   ;;  %v6425_v27 = vmul.f32 %v12093_v26, %v6231_v37  ;;  %v6426_v23 = vmul.f32 %v11120_v53, %v6235_v20  ;;  %v6427_v62 = vmul.f32 %v12097_v55, %v6239_v43  ;;  %v6424_v38 = vmul.f32 %v12098_v16, %v6227_v7  ;;  %v12113_v43 = vld [vmem:[#allocation26_spill] sm:$0xff] }
 0xa01   : > { %v6429_v47 = vmul.f32 %v11127_v1, %v6247_v42  ;;  %v6428_v12 = vmul.f32 %v12099_v58, %v6243_v22  ;;  %v6430_v56 = vmul.f32 %v12100_v25, %v6251_v52  ;;  %v6255_v39 = vrot.slane %v6053_v24, %v9965_v30  ;;  %v12102_v1 = vld [vmem:[#allocation29_spill] sm:$0xff]  ;;  %v12108_v24 = vld [vmem:[#allocation46_spill] sm:$0xff]  ;;  %v12118_v58 = vld [vmem:[#allocation72_spill] sm:$0xff] }
 0xa02   : > { %6629 = vperm.xlu0 %8278, %v6425_v27   ;;  %v12111_v27 = vld [vmem:[#allocation32_spill] sm:$0xff] }
 0xa03   : > { %v6431_v46 = vmul.f32 %v12102_v1, %v6255_v39 }
 0xa04   : > { %7384 = vperm.xlu1 %8277, %v6411_v2  }
 0xa06   : > { %6632 = vperm.xlu0 %8278, %v6426_v23   ;;  %v12112_v23 = vld [vmem:[#allocation68_spill] sm:$0xff] }
 0xa08   : > { %7387 = vperm.xlu1 %8277, %v6412_v32   ;;  %v12114_v32 = vld [vmem:[#allocation55_spill] sm:$0xff] }
 0xa09   : > { %v8430_v21 = vpop.eup %8429 }
 0xa0a   : > { %v6039_v17 = vmul.f32 %v8430_v21, %v6023_v5  ;;  %6635 = vperm.xlu0 %8278, %v6427_v62  }
 0xa0c   : > { %v6047_v53 = vsub.f32 2.0, %v6039_v17  ;;  %6626 = vperm.xlu1 %8277, %v6424_v38   ;;  %v12117_v17 = vld [vmem:[#allocation71_spill] sm:$0xff] }
 0xa0e   : > { %v6055_v6 = vmul.f32 %v8430_v21, %v6047_v53  ;;  %6641 = vperm.xlu0 %8278, %v6429_v47   ;;  %v12116_v21 = vld [vmem:[#allocation27_spill] sm:$0xff] }
 0xa0f   : > { %v7058_v16 = vmul.f32 %v12117_v17, %v12116_v21 }
 0xa10   : > { %6638 = vperm.xlu1 %8277, %v6428_v12   ;;  %v6295_v54 = vrot.slane %v6055_v6, %v9014_v8  ;;  %v6303_v28 = vrot.slane %v6055_v6, %v9941_v3  ;;  %v6307_v36 = vrot.slane %v6055_v6, %v9929_v51  ;;  %v12104_v8 = vld [vmem:[#allocation53_spill] sm:$0xff]  ;;  %v6187_v3 = vrot.slane %v11367_v63, %v9938_v44 }
 0xa11   : > { %v6413_v60 = vmul.f32 %v12104_v8, %v6183_v50  ;;  %v6311_v41 = vrot.slane %v6055_v6, %v9954_v33  ;;  %v6315_v31 = vrot.slane %v6055_v6, %v9938_v44  ;;  %v6291_v51 = vrot.slane %v6055_v6, %v8985_v59 }
 0xa12   : > { %v6441_v14 = vmul.f32 %v12101_v29, %v6295_v54  ;;  %v6443_v4 = vmul.f32 %v12103_v34, %v6303_v28  ;;  %v6444_v9 = vmul.f32 %v12105_v48, %v6307_v36  ;;  %v6414_v49 = vmul.f32 %v12106_v61, %v6187_v3 }
 0xa13   : > { %v6445_v0 = vmul.f32 %v12107_v10, %v6311_v41  ;;  %v6446_v5 = vmul.f32 %v12108_v24, %v6315_v31  ;;  %v6440_v15 = vmul.f32 %v12109_v35, %v6291_v51  ;;  %v6319_v37 = vrot.slane %v6055_v6, %v9965_v30 }
 0xa14   : > { %6644 = vperm.xlu1 %8277, %v6430_v56   ;;  %7525 = vperm.xlu0 %8278, %v6441_v14   ;;  %v6299_v33 = vrot.slane %v6055_v6, %v9926_v11  ;;  %v6191_v44 = vrot.slane %v11367_v63, %v9965_v30  ;;  %v7059_v11 = vmul.f32 %v12113_v43, %v12112_v23  ;;  %v12115_v30 = vld [vmem:[#allocation69_spill] sm:$0xff] }
 0xa15   : > { %v6447_v26 = vmul.f32 %v12110_v45, %v6319_v37  ;;  %v7365_v63 = vmul.f32 %v12113_v43, %v12115_v30  ;;  %v7364_v12 = vmul.f32 %v12118_v58, %v12116_v21 }
 0xa16   : > { %v6442_v20 = vmul.f32 %v12111_v27, %v6299_v33  ;;  %v6415_v7 = vmul.f32 %v12114_v32, %v6191_v44 }
 0xa18   : > { %6647 = vperm.xlu1 %8277, %v6431_v46   ;;  %7531 = vperm.xlu0 %8278, %v6443_v4  }
 0xa1c   : > { %7390 = vperm.xlu1 %8277, %v6413_v60   ;;  %7534 = vperm.xlu0 %8278, %v6444_v9  }
 0xa20   : > { %7393 = vperm.xlu1 %8277, %v6414_v49   ;;  %7537 = vperm.xlu0 %8278, %v6445_v0  }
 0xa24   : > { %7540 = vperm.xlu0 %8278, %v6446_v5   ;;  %7522 = vperm.xlu1 %8277, %v6440_v15  }
 0xa27   : > { %v6774_v59 = vpop.permute.xlu1 %6773  ;;  %v6777_v40 = vpop.permute.xlu0 %6776 }
 0xa28   : > { %v6799_v2 = vrot.slane %v6774_v59, %v9753_v13  ;;  %v6803_v18 = vrot.slane %v6777_v40, %v9753_v13  ;;  %7543 = vperm.xlu0 %8278, %v6447_v26   ;;  %7528 = vperm.xlu1 %8277, %v6442_v20  }
 0xa2a   : > { %v6828_v57 = vsel %vm2525_vm6, %v6803_v18, %v6799_v2 }
 0xa2b   : > { %v6786_v55 = vpop.permute.xlu1 %6785  ;;  %v6780_v62 = vpop.permute.xlu0 %6779 }
 0xa2c   : > { %v6807_v42 = vrot.slane %v6780_v62, %v9753_v13  ;;  %7279 = vrot.lane.b32.xlu0 %v7059_v11, %s8652_s14  ;;  %7396 = vperm.xlu1 %8277, %v6415_v7   ;;  %v6815_v6 = vrot.slane %v6786_v55, %v9753_v13 }
 0xa2e   : > { %v6829_v38 = vsel %vm2527_vm7, %v6807_v42, %v6828_v57 }
 0xa2f   : > { %v6792_v22 = vpop.permute.xlu1 %6791  ;;  %v6783_v53 = vpop.permute.xlu0 %6782 }
 0xa30   : > { %v6811_v47 = vrot.slane %v6783_v53, %v9753_v13  ;;  %7585 = vrot.lane.b32.xlu0 %v7365_v63, %s8659_s22  ;;  %7132 = vrot.lane.b32.xlu1 %v7058_v16, %s8652_s14  ;;  %v6823_v14 = vrot.slane %v6792_v22, %v9753_v13  ;;  %s7818_s14 = sshll.u32 %s505_s30, 4 }
 0xa31   : > { %s507_s18 = scalar_lea.vmem [#allocation12], %s7818_s14 }
 0xa32   : > { %v6830_v52 = vsel %vm2529_vm8, %v6811_v47, %v6829_v38  ;;  %s7687_s19 = sshll.u32 %s507_s18, 4  ;;  %s11640_s19 = int_to_ptr.vmem [resolvable:$true] %s7687_s19 }
 0xa33   : > { %v6831_v54 = vsel %vm2531_vm9, %v6815_v6, %v6830_v52  ;;  %v6789_v25 = vpop.permute.xlu0 %6788  ;;  %v7070_v56 = vpop.permute.xlu1 %7069  ;;  %s8558_s29 = scalar_lea.vmem %s11640_s19, 256  ;;  %p8565_p3 = scmp.lt.s32.totalorder %s11640_s19, %s8563_s16 }
 0xa34   : > { %v6819_v29 = vrot.slane %v6789_v25, %v9753_v13  ;;  %7438 = vrot.lane.b32.xlu1 %v7364_v12, %s8659_s22  ;;  %v7095_v8 = vrot.slane %v7070_v56, %v9753_v13  ;;  %p8559_p9 = scmp.ne.s32.totalorder %s11640_s19, %s8558_s29  ;;  %p8566_p4 = scmp.lt.s32.totalorder %s8564_s24, %s8558_s29 }
 0xa36   : > { %v6832_v39 = vsel %vm2533_vm10, %v6819_v29, %v6831_v54  ;;  %p8560_p1 = pnand %p8559_p9, %p12124_p10  ;;  %p8567_p7 = por %p8566_p4, %p8565_p3 }
 0xa37   : > { %v6833_v28 = vsel %vm2535_vm11, %v6823_v14, %v6832_v39  ;;  %v6795_v1 = vpop.permute.xlu0 %6794  ;;  %v7079_v46 = vpop.permute.xlu1 %7078 }
 0xa38   : > { %v6827_v34 = vrot.slane %v6795_v1, %v9753_v13  ;;  %v7107_v61 = vrot.slane %v7079_v46, %v9753_v13  ;;  %p8561_p2 = pneg %p8560_p1 }
 0xa3a   : > { %v11461_v4 = vsel %vm2537_vm12, %v6827_v34, %v6833_v28  ;;  %p8568_p0 = pnand %p8567_p7, %p8561_p2 }
 0xa3b   : > { %v7073_v50 = vpop.permute.xlu0 %7072  ;;  %v7082_v36 = vpop.permute.xlu1 %7081 }
 0xa3c   : > { %v7099_v60 = vrot.slane %v7073_v50, %v9753_v13  ;;  %v7111_v49 = vrot.slane %v7082_v36, %v9753_v13 }
 0xa3e   : > { %v7124_v48 = vsel %vm2525_vm6, %v7099_v60, %v7095_v8 }
 0xa3f   : > { %v7076_v9 = vpop.permute.xlu0 %7075  ;;  %v7088_v3 = vpop.permute.xlu1 %7087 }
 0xa40   : > { %v7103_v41 = vrot.slane %v7076_v9, %v9753_v13  ;;  %v7119_v15 = vrot.slane %v7088_v3, %v9753_v13 }
 0xa42   : > { %v7125_v10 = vsel %vm2527_vm7, %v7103_v41, %v7124_v48 }
 0xa43   : > { %v7126_v0 = vsel %vm2529_vm8, %v7107_v61, %v7125_v10  ;;  %v7085_v31 = vpop.permute.xlu0 %7084  ;;  %v7091_v51 = vpop.permute.xlu1 %7090 }
 0xa44   : > { %v7127_v24 = vsel %vm2531_vm9, %v7111_v49, %v7126_v0  ;;  %v7115_v5 = vrot.slane %v7085_v31, %v9753_v13  ;;  %v7123_v35 = vrot.slane %v7091_v51, %v9753_v13 }
 0xa46   : > { %v7128_v37 = vsel %vm2533_vm10, %v7115_v5, %v7127_v24 }
 0xa47   : > { %v7129_v33 = vsel %vm2535_vm11, %v7119_v15, %v7128_v37  ;;  %v6920_v45 = vpop.permute.xlu0 %6919  ;;  %v6917_v26 = vpop.permute.xlu1 %6916 }
 0xa48   : > { %v11478_v27 = vsel %vm2537_vm12, %v7123_v35, %v7129_v33  ;;  %v6946_v20 = vrot.slane %v6920_v45, %v9753_v13  ;;  %v6942_v44 = vrot.slane %v6917_v26, %v9753_v13 }
 0xa4a   : > { %v6971_v59 = vsel %vm2525_vm6, %v6946_v20, %v6942_v44 }
 0xa4b   : > { %v6923_v40 = vpop.permute.xlu0 %6922  ;;  %v6926_v2 = vpop.permute.xlu1 %6925 }
 0xa4c   : > { %v6950_v18 = vrot.slane %v6923_v40, %v9753_v13  ;;  %v6954_v23 = vrot.slane %v6926_v2, %v9753_v13 }
 0xa4e   : > { %v6972_v11 = vsel %vm2527_vm7, %v6950_v18, %v6971_v59 }
 0xa4f   : > { %v6973_v57 = vsel %vm2529_vm8, %v6954_v23, %v6972_v11  ;;  %v6932_v32 = vpop.permute.xlu0 %6931  ;;  %v6929_v7 = vpop.permute.xlu1 %6928 }
 0xa50   : > { %v6958_v55 = vrot.slane %v6929_v7, %v9753_v13  ;;  %v6962_v62 = vrot.slane %v6932_v32, %v9753_v13 }
 0xa52   : > { %v6974_v42 = vsel %vm2531_vm9, %v6958_v55, %v6973_v57  ;;  %v12119_v57 = vld [vmem:[#allocation74_spill] sm:$0xff] }
 0xa53   : > { %v11490_v30 = vpop.permute.xlu0 %6937  ;;  %v6935_v63 = vpop.permute.xlu1 %6934  ;;  %v6975_v17 = vsel %vm2533_vm10, %v6962_v62, %v6974_v42 }
 0xa54   : > { %v6966_v16 = vrot.slane %v6935_v63, %v9753_v13 }
 0xa56   : > { %v11495_v38 = vsel %vm2535_vm11, %v6966_v16, %v6975_v17 }
 0xa57   : > { %v7220_v22 = vpop.permute.xlu0 %7219  ;;  %v7217_v53 = vpop.permute.xlu1 %7216 }
 0xa58   : > { %v7246_v47 = vrot.slane %v7220_v22, %v9753_v13  ;;  %v7242_v6 = vrot.slane %v7217_v53, %v9753_v13 }
 0xa5a   : > { %v7271_v58 = vsel %vm2525_vm6, %v7246_v47, %v7242_v6 }
 0xa5b   : > { %v7223_v12 = vpop.permute.xlu0 %7222  ;;  %v7229_v52 = vpop.permute.xlu1 %7228 }
 0xa5c   : > { %v7250_v54 = vrot.slane %v7223_v12, %v9753_v13  ;;  %v7258_v39 = vrot.slane %v7229_v52, %v9753_v13 }
 0xa5e   : > { %v7272_v25 = vsel %vm2527_vm7, %v7250_v54, %v7271_v58 }
 0xa5f   : > { %v7226_v56 = vpop.permute.xlu0 %7225  ;;  %v7235_v29 = vpop.permute.xlu1 %7234 }
 0xa60   : > { %v7254_v14 = vrot.slane %v7226_v56, %v9753_v13  ;;  %v7266_v36 = vrot.slane %v7235_v29, %v9753_v13 }
 0xa62   : > { %v7273_v28 = vsel %vm2529_vm8, %v7254_v14, %v7272_v25 }
 0xa63   : > { %v7274_v1 = vsel %vm2531_vm9, %v7258_v39, %v7273_v28  ;;  %v7232_v46 = vpop.permute.xlu0 %7231  ;;  %v6480_v34 = vpop.permute.xlu1 %6479 }
 0xa64   : > { %v7262_v50 = vrot.slane %v7232_v46, %v9753_v13  ;;  %v6505_v31 = vrot.slane %v6480_v34, %v9753_v13 }
 0xa66   : > { %v7275_v8 = vsel %vm2533_vm10, %v7262_v50, %v7274_v1 }
 0xa67   : > { %v11510_v60 = vsel %vm2535_vm11, %v7266_v36, %v7275_v8  ;;  %v6483_v48 = vpop.permute.xlu1 %6482  ;;  %v11512_v3 = vpop.permute.xlu0 %7237  ;;  %v12120_v36 = vld [vmem:[#allocation73_spill] sm:$0xff] }
 0xa68   : > { %v6509_v61 = vrot.slane %v6483_v48, %v9753_v13  ;;  %v6458_v8 = vmul.f32 %v12120_v36, %v12116_v21 }
 0xa6a   : > { %v6534_v24 = vsel %vm2525_vm6, %v6509_v61, %v6505_v31  ;;  %v12121_v61 = vld [vmem:[#allocation70_spill] sm:$0xff] }
 0xa6b   : > { %v6486_v9 = vpop.permute.xlu1 %6485  ;;  %v6492_v49 = vpop.permute.xlu0 %6491 }
 0xa6c   : > { %v6513_v10 = vrot.slane %v6486_v9, %v9753_v13  ;;  %v6521_v45 = vrot.slane %v6492_v49, %v9753_v13  ;;  %v6459_v49 = vmul.f32 %v12113_v43, %v12121_v61 }
 0xa6e   : > { %v6535_v5 = vsel %vm2527_vm7, %v6513_v10, %v6534_v24 }
 0xa6f   : > { %v6489_v41 = vpop.permute.xlu1 %6488 }
 0xa70   : > { %v6517_v51 = vrot.slane %v6489_v41, %v9753_v13 }
 0xa71   : > { %v11520_v35 = vpop.permute.xlu0 %7378 }
 0xa72   : > { %v6536_v37 = vsel %vm2529_vm8, %v6517_v51, %v6535_v5 }
 0xa73   : > { %v6495_v0 = vpop.permute.xlu1 %6494  ;;  %v6537_v20 = vsel %vm2531_vm9, %v6521_v45, %v6536_v37 }
 0xa74   : > { %v6525_v33 = vrot.slane %v6495_v0, %v9753_v13  ;;  %v6970_v0 = vrot.slane %v11490_v30, %v9753_v13 }
 0xa75   : > { %v11529_v2 = vpop.permute.xlu0 %7381 }
 0xa76   : > { %v6538_v59 = vsel %vm2533_vm10, %v6525_v33, %v6537_v20  ;;  %v6977_v31 = vsel %vm2537_vm12, %v6970_v0, %v11495_v38  ;;  %v7405_v33 = vrot.slane %v11520_v35, %v9753_v13 }
 0xa77   : > { %v6498_v15 = vpop.permute.xlu1 %6497 }
 0xa78   : > { %v6529_v26 = vrot.slane %v6498_v15, %v9753_v13 }
 0xa7a   : > { %v6539_v18 = vsel %vm2535_vm11, %v6529_v26, %v6538_v59 }
 0xa7b   : > { %v6501_v44 = vpop.permute.xlu1 %6500 }
 0xa7c   : > { %v6533_v40 = vrot.slane %v6501_v44, %v9753_v13 }
 0xa7e   : > { %v6540_v23 = vsel %vm2537_vm12, %v6533_v40, %v6539_v18  ;;  %v7409_v18 = vrot.slane %v11529_v2, %v9753_v13 }
 0xa7f   : > { %v11533_v11 = vpop.permute.xlu1 %7375  ;;  %7988 = vmatmul.mubr.msk.f32.vlgmr.msra.gmra.mrb[8].mxu1 %vm2596_vm13, %v6540_v23 }
 0xa80   : > { %7991 = vmatpush3.msra.mxu1 %v12119_v57  ;;  %7992 = vmatprep.mubr.msk.f32.mxu1 %vm8658_vm2, %v12095_v19  ;;  %v7401_v5 = vrot.slane %v11533_v11, %v9753_v13 }
 0xa81   : > { %v6630_v32 = vpop.permute.xlu0 %6629  ;;  %7995 = vmatprep.subr.mxu1 %v12095_v19 }
 0xa82   : > { %v6656_v17 = vrot.slane %v6630_v32, %v9753_v13  ;;  %v7430_v44 = vsel %vm2525_vm6, %v7405_v33, %v7401_v5 }
 0xa83   : > { %v11540_v7 = vpop.permute.xlu1 %7384  ;;  %v7431_v57 = vsel %vm2527_vm7, %v7409_v18, %v7430_v44 }
 0xa84   : > { %v7413_v59 = vrot.slane %v11540_v7, %v9753_v13 }
 0xa85   : > { %v6633_v55 = vpop.permute.xlu0 %6632 }
 0xa86   : > { %v6660_v22 = vrot.slane %v6633_v55, %v9753_v13  ;;  %v7432_v2 = vsel %vm2529_vm8, %v7413_v59, %v7431_v57 }
 0xa87   : > { %v11542_v62 = vpop.permute.xlu1 %7387 }
 0xa88   : > { %v7417_v23 = vrot.slane %v11542_v62, %v9753_v13 }
 0xa89   : > { %v6636_v42 = vpop.permute.xlu0 %6635 }
 0xa8a   : > { %v6664_v12 = vrot.slane %v6636_v42, %v9753_v13 }
 0xa8b   : > { %v6627_v63 = vpop.permute.xlu1 %6626 }
 0xa8c   : > { %v6652_v16 = vrot.slane %v6627_v63, %v9753_v13  ;;  %v7270_v63 = vrot.slane %v11512_v3, %v9753_v13 }
 0xa8d   : > { %v6642_v6 = vpop.permute.xlu0 %6641 }
 0xa8e   : > { %v6681_v53 = vsel %vm2525_vm6, %v6656_v17, %v6652_v16  ;;  %v6672_v39 = vrot.slane %v6642_v6, %v9753_v13  ;;  %v7433_v16 = vsel %vm2531_vm9, %v7417_v23, %v7432_v2 }
 0xa8f   : > { %v6682_v47 = vsel %vm2527_vm7, %v6660_v22, %v6681_v53  ;;  %v6639_v58 = vpop.permute.xlu1 %6638 }
 0xa90   : > { %v6668_v52 = vrot.slane %v6639_v58, %v9753_v13  ;;  %v6683_v54 = vsel %vm2529_vm8, %v6664_v12, %v6682_v47 }
 0xa92   : > { %v6684_v29 = vsel %vm2531_vm9, %v6668_v52, %v6683_v54 }
 0xa93   : > { %v6645_v25 = vpop.permute.xlu1 %6644  ;;  %v7526_v56 = vpop.permute.xlu0 %7525  ;;  %v6685_v46 = vsel %vm2533_vm10, %v6672_v39, %v6684_v29 }
 0xa94   : > { %v6676_v14 = vrot.slane %v6645_v25, %v9753_v13  ;;  %v7552_v30 = vrot.slane %v7526_v56, %v9753_v13 }
 0xa96   : > { %v6686_v50 = vsel %vm2535_vm11, %v6676_v14, %v6685_v46 }
 0xa97   : > { %v6648_v28 = vpop.permute.xlu1 %6647  ;;  %v7532_v1 = vpop.permute.xlu0 %7531 }
 0xa98   : > { %v6680_v34 = vrot.slane %v6648_v28, %v9753_v13  ;;  %v7560_v45 = vrot.slane %v7532_v1, %v9753_v13 }
 0xa9a   : > { %v6687_v48 = vsel %vm2537_vm12, %v6680_v34, %v6686_v50 }
 0xa9b   : > { %v7391_v9 = vpop.permute.xlu1 %7390  ;;  %7993 = vmatmul.mubr.msk.f32.vlgmr.msra.gmra.mrb[10].mxu1 %vm2596_vm13, %v6687_v48  ;;  %v7535_v41 = vpop.permute.xlu0 %7534 }
 0xa9c   : > { %7996 = vmatpush3.msra.mxu1 %v6458_v8  ;;  %7997 = vmatprep.mubr.msk.f32.mxu1 %vm8658_vm2, %v12095_v19  ;;  %v7564_v35 = vrot.slane %v7535_v41, %v9753_v13  ;;  %v7421_v11 = vrot.slane %v7391_v9, %v9753_v13  ;;  %v7846_v9 = vld [vmem:[%s11695_s11] ss:$0 sm:$0xff] }
 0xa9d   : > { %8000 = vmatprep.subr.mxu1 %v12095_v19 }
 0xa9e   : > { %v7434_v22 = vsel %vm2533_vm10, %v7421_v11, %v7433_v16 }
 0xa9f   : > { %v7394_v10 = vpop.permute.xlu1 %7393  ;;  %7998 = vmatmul.mubr.msk.f32.vlgmr.msra.gmra.mrb[12].mxu1 %vm2596_vm13, %v11461_v4  ;;  %v7538_v21 = vpop.permute.xlu0 %7537 }
 0xaa0   : > { %8001 = vmatpush3.msra.mxu1 %v6459_v49  ;;  %8002 = vmatprep.mubr.msk.f32.mxu1 %vm8658_vm2, %v12095_v19  ;;  %v7425_v32 = vrot.slane %v7394_v10, %v9753_v13  ;;  %v7568_v17 = vrot.slane %v7538_v21, %v9753_v13 }
 0xaa1   : > { %8005 = vmatprep.subr.mxu1 %v12095_v19 }
 0xaa2   : > { %v7435_v3 = vsel %vm2535_vm11, %v7425_v32, %v7434_v22 }
 0xaa3   : > { %v7523_v51 = vpop.permute.xlu1 %7522  ;;  %8003 = vmatmul.mubr.msk.f32.vlgmr.msra.gmra.mrb[14].mxu1 %vm2596_vm13, %v6977_v31  ;;  %v7541_v43 = vpop.permute.xlu0 %7540 }
 0xaa4   : > { %8007 = vmatprep.mubr.msk.f32.mxu1 %vm8658_vm2, %v12095_v19  ;;  %v7548_v4 = vrot.slane %v7523_v51, %v9753_v13  ;;  %v7572_v47 = vrot.slane %v7541_v43, %v9753_v13 }
 0xaa6   : > { %v7577_v37 = vsel %vm2525_vm6, %v7552_v30, %v7548_v4 }
 0xaa7   : > { %v7529_v24 = vpop.permute.xlu1 %7528  ;;  %v7544_v38 = vpop.permute.xlu0 %7543 }
 0xaa8   : > { %v7556_v15 = vrot.slane %v7529_v24, %v9753_v13  ;;  %v7576_v54 = vrot.slane %v7544_v38, %v9753_v13 }
 0xaaa   : > { %v7578_v26 = vsel %vm2527_vm7, %v7556_v15, %v7577_v37 }
 0xaab   : > { %v7397_v20 = vpop.permute.xlu1 %7396  ;;  %v7579_v40 = vsel %vm2529_vm8, %v7560_v45, %v7578_v26  ;;  %v7280_v42 = vpop.permute.xlu0 %7279 }
 0xaac   : > { %v7580_v55 = vsel %vm2531_vm9, %v7564_v35, %v7579_v40  ;;  %v7429_v62 = vrot.slane %v7397_v20, %v9753_v13 }
 0xaad   : > { %v7581_v53 = vsel %vm2533_vm10, %v7568_v17, %v7580_v55 }
 0xaae   : > { %v7436_v58 = vsel %vm2537_vm12, %v7429_v62, %v7435_v3  ;;  %v7582_v12 = vsel %vm2535_vm11, %v7572_v47, %v7581_v53 }
 0xaaf   : > { %v7133_v7 = vpop.permute.xlu1 %7132  ;;  %v7586_v52 = vpop.permute.xlu0 %7585  ;;  %v7583_v25 = vsel %vm2537_vm12, %v7576_v54, %v7582_v12 }
 0xab0   : > { %8006 = vmatpush3.msra.mxu1 %v7133_v7 }
 0xab1   : > { %8008 = vmatmul.mubr.msk.f32.vlgmr.msra.gmra.mrb[16].mxu1 %vm2596_vm13, %v11478_v27  ;;  %8010 = vmatprep.subr.mxu1 %v12095_v19  ;;  %v7277_v27 = vsel %vm2537_vm12, %v7270_v63, %v11510_v60 }
 0xab2   : > { %8011 = vmatpush3.msra.mxu1 %v7280_v42  ;;  %8012 = vmatprep.mubr.msk.f32.mxu1 %vm8658_vm2, %v12095_v19 }
 0xab3   : > { %v7439_v6 = vpop.permute.xlu1 %7438  ;;  %8020 = vmatprep.subr.mxu1 %v12095_v19 }
 0xab4   : > { %8016 = vmatpush3.msra.mxu0 %v7439_v6 }
 0xab5   : > { %8013 = vmatmul.mubr.msk.f32.vlgmr.msra.gmra.mrb[18].mxu1 %vm2596_vm13, %v7277_v27  ;;  %8018 = vmatmul.mubr.msk.f32.vlgmr.msra.gmra.mrb[10].mxu0 %vm2596_vm13, %v7436_v58 }
 0xab6   : > { %8021 = vmatpush3.msra.mxu1 %v7586_v52  ;;  %8022 = vmatprep.mubr.msk.f32.mxu1 %vm8658_vm2, %v12095_v19 }
 0xab9   : > { %8023 = vmatmul.mubr.msk.f32.vlgmr.msra.gmra.mrb[20].mxu1 %vm2596_vm13, %v7583_v25 }
 0xb52   : > { %v6613_v60 = vpop.f32.mrb[8].mxu1 }
 0xb53   : > { %v7989_v56 = vpop.f32.mrb[9].mxu1 }
 0xb6e   : > { %v6760_v29 = vpop.f32.mrb[10].mxu1 }
 0xb6f   : > { %v7994_v14 = vpop.f32.mrb[11].mxu1 }
 0xb72   : > { %v6903_v39 = vpop.f32.mrb[12].mxu1 }
 0xb73   : > { %v6904_v28 = vadd.f32 %v6903_v39, %v6613_v60  ;;  %v7999_v1 = vpop.f32.mrb[13].mxu1 }
 0xb76   : > { %v7046_v46 = vpop.f32.mrb[14].mxu1 }
 0xb77   : > { %v7047_v34 = vadd.f32 %v7046_v46, %v6760_v29  ;;  %v8004_v50 = vpop.f32.mrb[15].mxu1 }
 0xb84   : > { %v7203_v13 = vpop.f32.mrb[16].mxu1 }
 0xb85   : > { %v7354_v36 = vadd.f32 %v7203_v13, %v6904_v28  ;;  %v8009_v8 = vpop.f32.mrb[17].mxu1 }
 0xb88   : > { %v7350_v19 = vpop.f32.mrb[18].mxu1  ;;  %v7509_v48 = vpop.f32.mrb[10].mxu0 }
 0xb89   : > { %v7355_v41 = vadd.f32 %v7350_v19, %v7047_v34  ;;  %v7660_v61 = vadd.f32 %v7509_v48, %v7354_v36  ;;  %v8014_v49 = vpop.f32.mrb[19].mxu1  ;;  %v8019_v10 = vpop.f32.mrb[11].mxu0 }
 0xb8b   : > { %v7669_v21 = vadd.f32 %v7846_v9, %v7660_v61 }
 0xb8c   : > { %v7656_v0 = vpop.f32.mrb[20].mxu1 }
 0xb8d   : > { %7671 = vst.msk [vmem:[%s507_s18] sm:$0xff] %vm521_vm0, %v7669_v21  ;;  %v7661_v31 = vadd.f32 %v7656_v0, %v7355_v41  ;;  %v8024_v51 = vpop.f32.mrb[21].mxu1 }
 0xb8f   : > { %v7670_v43 = vadd.f32 %v7846_v9, %v7661_v31 }
 0xb91   : > { %7672 = vst.msk [vmem:[%s507_s18 + $0x8] sm:$0xff] %vm521_vm0, %v7670_v43 }
 0xb92   : > { %8571 = shalt.err (!%p8568_p0)
}
 0xb93   : > { %s8572_s15 = scalar_lea.hbm %s11638_s13, 256  ;;  %s8576_s14 = scalar_lea.hbm %s12123_s21, 512 }
 0xb94   : > { %p8573_p8 = scmp.ne.s32.totalorder %s11638_s13, %s8572_s15  ;;  %p8577_p13 = scmp.lt.u32.totalorder %s11638_s13, %s12123_s21 }
 0xb95   : > { %p8578_p5 = scmp.lt.u32.totalorder %s8576_s14, %s8572_s15  ;;  %p8580_p9 = scmp.lt.u32.totalorder %s8572_s15, %s11638_s13 }
 0xb96   : > { %p8574_p11 = pnand %p8573_p8, %p12124_p10 }
 0xb97   : > { %p8579_p6 = por %p8578_p5, %p8577_p13 }
 0xb98   : > { %p8575_p12 = pneg %p8574_p11 }
 0xb99   : > { %p8581_p1 = por %p8580_p9, %p8579_p6 }
 0xb9b   : > { %p8582_p2 = pnand %p8581_p1, %p8575_p12 }
 0xb9d   : > { %8585 = shalt.err (!%p8582_p2)
}
 0xb9e   : > { %s8661_s18 = smov 128   ;;  %s8662_s17 = smov 8  }
 0xb9f   : > { %8179 = dma.vmem_to_hbm [thread:$0]  (%p12124_p10), %s11640_s19, 256, %s11638_s13, %s11643_s25, %s8661_s18, %s8661_s18, %s8662_s17  }
 0xba0 PF: > { %s12125_s20 = sld [smem:[#allocation20_spill]]  ;;  %s12126_s23 = sld [smem:[#allocation18_spill]] }
 0xba1   : > { %s12127_s29 = sld [smem:[#allocation24_spill]] }
 0xba6   : > { %p8211_p3 = scmp.ge.s32.totalorder %s12125_s20, 2  ;;  %s7702_s27 = sand.u32 1, %s12126_s23  }
 0xba7   : > { %p12128_p4 = scmp.ne.s32.totalorder %s12127_s29, 0  ;;  %s7703_s16 = scalar_lea.sflag [#allocation4], %s7702_s27 }
 0xba9   : > { %p8198_p7 = pnand %p8211_p3, %p12128_p4 }
 0xbab   : > { %8619 = dma.done.wait (!%p8198_p7), %s7703_s16, 256  }
 0xbac   : > { %8621 = vsyncadd (!%p8198_p7), %s7703_s16, 4294967040  ;;  %s12129_s28 = sld [smem:[#allocation21_spill]]  ;;  %s12130_s24 = sld [smem:[#allocation19_spill]] }
 0xbad   : > { %s12131_s27 = sld [smem:[#allocation22_spill]]  ;;  %s12132_s25 = smov %s8628_s26 }
 0xbb2   : > { %p27_p0 = scmp.ge.s32.totalorder %s12129_s28, 4   ;;  %s12133_s26 = smov %s12130_s24 }
 0xbb4   :  { %29 = sbr.rel (!%p27_p0) target bundleno = 11 (0xb), region = 130 }
 0xbbb   :  { %7708 = vsyncpa [#allocation3], 1 }
 0xbbc   :  { %7710 = vsyncpa [#allocation3 + $0x1], 1 }
 0xbbd   :  { %7711 = vsyncpa [#allocation7], 1 }
 0xbbe   :  { %7712 = vsyncpa [#allocation10], 1 }
 0xbbf   :  { %7713 = vsyncpa [#allocation4], 1 }
 0xbc0   :  { %7715 = vsyncpa [#allocation4 + $0x1], 1 }
 0xbc1   :  { %7716 = vsyncpa [#allocation5], 1 }
 0xbc2   :  { %7718 = vsyncpa [#allocation5 + $0x1], 1 }

</bundles_post_ra>
